<compile_context>
chip_gen: v6e
topology: v6e:2x2x1
jax: 0.10.0
libtpu: 0.0.40
codegen_flags: <defaults>
</compile_context>

<pallas_src>
import functools

import jax
import jax.numpy as jnp
from jax.experimental import pallas as pl
from jax.experimental.pallas import tpu as pltpu


def _round_up(x, m):
    return (x + m - 1) // m * m


# ----------------------------------------------------------------------------
# Pallas kernels
# ----------------------------------------------------------------------------
def _conv_bn_act_kernel(t_ref, w_ref, b_ref, o_ref, acc_ref, *, ntaps, act):
    """One grid step: accumulate one (dy,dx) tap of the conv into a f32 scratch.

    t_ref: (1, tm, Kp) bf16 activation tap tile
    w_ref: (1, Kp, Np) bf16 per-tap weight (BN scale pre-folded)
    b_ref: (1, Np)     f32 folded BN bias
    o_ref: (tm, Np)    output tile (activation dtype)
    acc_ref: (tm, Np)  f32 accumulator scratch (resident across the tap axis)
    """
    t = pl.program_id(1)

    @pl.when(t == 0)
    def _():
        acc_ref[...] = jnp.zeros_like(acc_ref)

    acc_ref[...] += jnp.dot(t_ref[0], w_ref[0], preferred_element_type=jnp.float32)

    @pl.when(t == ntaps - 1)
    def _():
        y = acc_ref[...] + b_ref[...]
        if act == "relu":
            y = jnp.maximum(y, 0.0)
        elif act == "relu6":
            y = jnp.clip(y, 0.0, 6.0)
        elif act == "leaky":
            y = jnp.where(y >= 0.0, y, 0.01 * y)
        elif act == "tanh":
            y = jnp.tanh(y)
        o_ref[...] = y.astype(o_ref.dtype)


def _maxpool_kernel(t_ref, o_ref, *, ntaps):
    # t_ref: (ntaps, tm, C) stacked pooling taps; reduce max over taps.
    acc = t_ref[0]
    for t in range(1, ntaps):
        acc = jnp.maximum(acc, t_ref[t])
    o_ref[...] = acc


def _head_kernel(x_ref, w_ref, b_ref, o_ref, *, inv_hw):
    # x_ref: (Np, HW, C); global average pool over HW then Linear (output tile).
    pooled = jnp.sum(x_ref[...].astype(jnp.float32), axis=1) * inv_hw    # (Np, C)
    o_ref[...] = (
        jnp.dot(pooled.astype(jnp.bfloat16), w_ref[...],
                preferred_element_type=jnp.float32)
        + b_ref[...]
    )


# ----------------------------------------------------------------------------
# Wrappers (glue: padding / tap slicing / reshapes in plain JAX)
# ----------------------------------------------------------------------------
_TM = 256  # M-tile rows; safe for v5e/v6e/v7x scoped-VMEM defaults at these K/N.


def conv_bn_act(x, p):
    """Conv2d(bias=False) + BatchNorm2d(eval) + activation. x is NHWC bf16."""
    KH, KW = p["kh"], p["kw"]
    stride, padding, act = p["stride"], p["padding"], p["act"]
    wstk, bias, cout = p["wstk"], p["bias"], p["cout"]     # prepared at build time
    T, Kp, Np = wstk.shape

    N, H, W, Cin = x.shape
    Ho = (H + 2 * padding - KH) // stride + 1
    Wo = (W + 2 * padding - KW) // stride + 1
    M = N * Ho * Wo

    xs = x
    if padding > 0:
        xs = jnp.pad(x, ((0, 0), (padding, padding), (padding, padding), (0, 0)))

    if KH == 1 and KW == 1 and stride == 1:
        taps = xs.reshape(1, M, Cin)                 # free reshape, no HBM blowup
    else:
        tap_list = []
        for dy in range(KH):
            for dx in range(KW):
                tap_list.append(
                    jax.lax.slice(
                        xs,
                        (0, dy, dx, 0),
                        (N, dy + (Ho - 1) * stride + 1,
                         dx + (Wo - 1) * stride + 1, Cin),
                        (1, stride, stride, 1),
                    )
                )
        taps = jnp.stack(tap_list, axis=0).reshape(T, M, Cin)

    tm = _TM if M >= _TM else _round_up(M, 16)
    Mp = _round_up(M, tm)
    if Mp > M or Kp > Cin:
        taps = jnp.pad(taps, ((0, 0), (0, Mp - M), (0, Kp - Cin)))

    out = pl.pallas_call(
        functools.partial(_conv_bn_act_kernel, ntaps=T, act=act),
        out_shape=jax.ShapeDtypeStruct((Mp, Np), x.dtype),
        grid=(Mp // tm, T),
        in_specs=[
            pl.BlockSpec((1, tm, Kp), lambda i, t: (t, i, 0)),
            pl.BlockSpec((1, Kp, Np), lambda i, t: (t, 0, 0)),
            pl.BlockSpec((1, Np), lambda i, t: (0, 0)),
        ],
        out_specs=pl.BlockSpec((tm, Np), lambda i, t: (i, 0)),
        scratch_shapes=[pltpu.VMEM((tm, Np), jnp.float32)],
        compiler_params=pltpu.CompilerParams(
            dimension_semantics=("parallel", "arbitrary")),
    )(taps, wstk, bias)

    return out[:M, :cout].reshape(N, Ho, Wo, cout)


def max_pool(x, *, kernel, stride, padding):
    """MaxPool2d. x is NHWC; output keeps x.dtype."""
    N, H, W, C = x.shape
    Ho = (H + 2 * padding - kernel) // stride + 1
    Wo = (W + 2 * padding - kernel) // stride + 1
    M = N * Ho * Wo
    T = kernel * kernel

    xs = x
    if padding > 0:
        neg = float(jnp.finfo(x.dtype).min)
        xs = jnp.pad(x, ((0, 0), (padding, padding), (padding, padding), (0, 0)),
                     constant_values=neg)

    taps = []
    for dy in range(kernel):
        for dx in range(kernel):
            taps.append(
                jax.lax.slice(
                    xs,
                    (0, dy, dx, 0),
                    (N, dy + (Ho - 1) * stride + 1, dx + (Wo - 1) * stride + 1, C),
                    (1, stride, stride, 1),
                )
            )
    t = jnp.stack(taps, axis=0).reshape(T, M, C)

    tm = _TM if M >= _TM else _round_up(M, 16)
    Mp = _round_up(M, tm)
    if Mp > M:
        t = jnp.pad(t, ((0, 0), (0, Mp - M), (0, 0)))

    out = pl.pallas_call(
        functools.partial(_maxpool_kernel, ntaps=T),
        out_shape=jax.ShapeDtypeStruct((Mp, C), x.dtype),
        grid=(Mp // tm,),
        in_specs=[pl.BlockSpec((T, tm, C), lambda i: (0, i, 0))],
        out_specs=pl.BlockSpec((tm, C), lambda i: (i, 0)),
        compiler_params=pltpu.CompilerParams(dimension_semantics=("parallel",)),
    )(t)
    return out[:M].reshape(N, Ho, Wo, C)


def avgpool_linear(x, wT, b, n_classes):
    """AdaptiveAvgPool2d((1,1)) + Flatten + (eval) Dropout + Linear. x is NHWC."""
    N, H, W, C = x.shape
    Op = wT.shape[1]
    to = 256                    # output-feature tile (Op built as a multiple of 256)
    Np = _round_up(N, 8)

    xr = x.reshape(N, H * W, C)
    if Np > N:
        xr = jnp.pad(xr, ((0, Np - N), (0, 0), (0, 0)))

    out = pl.pallas_call(
        functools.partial(_head_kernel, inv_hw=1.0 / float(H * W)),
        out_shape=jax.ShapeDtypeStruct((Np, Op), jnp.float32),
        grid=(Op // to,),
        in_specs=[
            pl.BlockSpec((Np, H * W, C), lambda j: (0, 0, 0)),
            pl.BlockSpec((C, to), lambda j: (0, j)),
            pl.BlockSpec((1, to), lambda j: (0, j)),
        ],
        out_specs=pl.BlockSpec((Np, to), lambda j: (0, j)),
        compiler_params=pltpu.CompilerParams(dimension_semantics=("parallel",)),
    )(xr, wT, b)
    return out[:N, :n_classes]


# ----------------------------------------------------------------------------
# Parameter construction (mirrors the PyTorch __init__ logic; BN pre-folded)
# ----------------------------------------------------------------------------
class ParamGen:
    def __init__(self, seed):
        self._key = jax.random.PRNGKey(seed)

    def normal(self, shape):
        self._key, sub = jax.random.split(self._key)
        return jax.random.normal(sub, shape, dtype=jnp.float32)


def fold_conv_bn(w, gamma, beta, mean, var, eps=1e-5):
    """Fold eval-mode BN into conv weights; return kernel-ready (wstk, bias)."""
    cout, cin, kh, kw = w.shape
    scale = gamma / jnp.sqrt(var + eps)
    bias = beta - mean * scale
    Np = _round_up(cout, 128)          # lane-dense output channels
    Kp = _round_up(cin, 8)             # sublane-friendly contraction dim (no 128 pad)
    wt = jnp.transpose(w, (2, 3, 1, 0)).reshape(kh * kw, cin, cout)
    wt = wt * scale[None, None, :]
    wt = jnp.pad(wt, ((0, 0), (0, Kp - cin), (0, Np - cout))).astype(jnp.bfloat16)
    b = jnp.pad(bias, (0, Np - cout)).reshape(1, Np).astype(jnp.float32)
    return wt, b


def make_conv(pg, cin, cout, kernel, stride, padding, act):
    w = 0.2 * pg.normal((cout, cin, kernel, kernel))
    gamma = 1.0 + 0.1 * pg.normal((cout,))
    beta = 0.1 * pg.normal((cout,))
    mean = 0.05 * pg.normal((cout,))
    var = 1.0 + 0.1 * jnp.abs(pg.normal((cout,)))
    wstk, bias = fold_conv_bn(w, gamma, beta, mean, var)
    return dict(
        kind="conv", wstk=wstk, bias=bias,
        kh=kernel, kw=kernel, cin=cin, cout=cout,
        stride=stride, padding=padding, act=act,
    )


def get_links(layer, base_ch, k, m):
    """Exact port of HarDBlock.get_links."""
    if layer == 0:
        return 0, base_ch, []
    out_ch = k
    links = []
    for i in range(10):
        check = 2 ** i
        if layer % check == 0:
            link = layer - check
            links.append(link)
            if i > 0:
                out_ch *= m
    out_ch = int(int(out_ch + 1) / 2) * 2
    in_ch = 0
    for j in links:
        _, ch, _ = get_links(j, base_ch, k, m)
        in_ch += ch
    return in_ch, out_ch, links


# Small synthetic config (stands in for configs/*.yaml; same structure as '68').
ARCH_CONFIG = dict(
    first_ch=[8, 16],
    ch_list=[24, 32],
    gr=[4, 6],
    grmul=1.7,
    n_layers=[4, 4],
    downSamp=[1, 0],
    drop_rate=0.1,
    depthwise=False,
)


def build_hardnet(seed=0, act="relu"):
    pg = ParamGen(seed)
    cfg = ARCH_CONFIG
    init_ch = 1
    second_kernel = 3
    max_pool_flag = True  # depthwise == False

    first_ch = cfg["first_ch"]
    ch_list = cfg["ch_list"]
    gr = cfg["gr"]
    m = cfg["grmul"]
    n_layers = cfg["n_layers"]
    downSamp = cfg["downSamp"]
    blocks = len(n_layers)

    layers = []
    layers.append(make_conv(pg, init_ch, first_ch[0], 3, 2, 0, "relu6"))
    layers.append(make_conv(pg, first_ch[0], first_ch[1], second_kernel, 1, 1, "relu6"))
    if max_pool_flag:
        layers.append(dict(kind="maxpool", kernel=3, stride=2, padding=1))

    ch = first_ch[1]
    for i in range(blocks):
        links_all, convs = [], []
        out_channels = 0
        for li in range(n_layers[i]):
            in_ch, out_ch, links = get_links(li + 1, ch, gr[i], m)
            links_all.append(links)
            convs.append(make_conv(pg, in_ch, out_ch, 3, 1, 1, act))
            if li % 2 == 0 or li == n_layers[i] - 1:
                out_channels += out_ch
        layers.append(dict(kind="hardblock", links=links_all, convs=convs, keepbase=False))
        ch = out_channels
        layers.append(make_conv(pg, ch, ch_list[i], 1, 1, 0, act))
        ch = ch_list[i]
        if downSamp[i] == 1:
            layers.append(dict(kind="maxpool", kernel=2, stride=2, padding=0))

    # classifier head: AdaptiveAvgPool2d((1,1)) + Flatten + Dropout(eval) + Linear(ch, 1000)
    n_classes = 1000
    Op = _round_up(n_classes, 256)
    w = 0.1 * pg.normal((n_classes, ch))
    b = 0.1 * pg.normal((n_classes,))
    wT = jnp.pad(jnp.transpose(w), ((0, 0), (0, Op - n_classes))).astype(jnp.bfloat16)
    bp = jnp.pad(b, (0, Op - n_classes)).reshape(1, Op).astype(jnp.float32)
    layers.append(dict(kind="head", wT=wT, b=bp, n_classes=n_classes))
    return layers


# ----------------------------------------------------------------------------
# Forward pass
# ----------------------------------------------------------------------------
def apply_hardblock(p, x):
    # TODO(synk): fuse the channel concat into the conv kernel as a K-partition
    #             (separate inputs + per-source weight splits) to avoid one
    #             activation write/read per block layer.
    layers = [x]
    for conv_p, link in zip(p["convs"], p["links"]):
        tin = [layers[i] for i in link]
        xin = jnp.concatenate(tin, axis=-1) if len(tin) > 1 else tin[0]
        layers.append(conv_bn_act(xin, conv_p))
    t = len(layers)
    out = [
        layers[i]
        for i in range(t)
        if (p["keepbase"] and i == 0) or i == t - 1 or i % 2 == 1
    ]
    return jnp.concatenate(out, axis=-1)


def hardnet_forward(layers, x_nchw):
    x = jnp.transpose(x_nchw, (0, 2, 3, 1)).astype(jnp.bfloat16)  # NCHW -> NHWC, bf16
    for layer in layers:
        kind = layer["kind"]
        if kind == "conv":
            x = conv_bn_act(x, layer)
        elif kind == "maxpool":
            x = max_pool(
                x, kernel=layer["kernel"], stride=layer["stride"], padding=layer["padding"]
            )
        elif kind == "hardblock":
            x = apply_hardblock(layer, x)
        elif kind == "head":
            x = avgpool_linear(x, layer["wT"], layer["b"], layer["n_classes"])
    return x  # (N, 1000) f32


# ----------------------------------------------------------------------------
if __name__ == "__main__":
    key = jax.random.PRNGKey(0)
    x = jax.random.normal(key, (2, 1, 32, 32), dtype=jnp.float32)  # NCHW, init_ch=1

    model = build_hardnet(seed=0, act="relu")
    fwd = jax.jit(lambda xin: hardnet_forward(model, xin))
    out = jax.block_until_ready(fwd(x))

    assert out.shape == (2, 1000), out.shape
    assert jnp.all(jnp.isfinite(out))
    print("KERNEL_OK")
</pallas_src>

<mosaic_0001>
module attributes {stable_mosaic.version = 11 : i64} {
  func.func @_conv_bn_act_kernel(%arg0: i32, %arg1: i32, %arg2: memref<1x256x8xbf16, #tpu.memory_space<vmem>>, %arg3: memref<1x8x128xbf16, #tpu.memory_space<vmem>>, %arg4: memref<1x128xf32, #tpu.memory_space<vmem>>, %arg5: memref<256x128xbf16, #tpu.memory_space<vmem>>, %arg6: memref<256x128xf32, #tpu.memory_space<vmem>>) attributes {dimension_semantics = [#tpu.dimension_semantics<parallel>, #tpu.dimension_semantics<arbitrary>], iteration_bounds = array<i64: 2, 9>, scalar_prefetch = 0 : i64, scratch_operands = 1 : i64, tpu.core_type = #tpu.core_type<tc>, window_params = [{transform_indices = @transform_0, window_bounds = array<i64: 1, 256, 8>}, {transform_indices = @transform_1, window_bounds = array<i64: 1, 8, 128>}, {pipeline_mode = #tpu.pipeline_mode<synchronous>, transform_indices = @transform_2, window_bounds = array<i64: 1, 128>}, {transform_indices = @transform_3, window_bounds = array<i64: 256, 128>}]} {
    %c0_i32 = arith.constant 0 : i32
    %0 = arith.cmpi eq, %arg1, %c0_i32 : i32
    %1 = arith.extui %0 : i1 to i32
    %c0_i32_0 = arith.constant 0 : i32
    %2 = arith.cmpi ne, %1, %c0_i32_0 : i32
    scf.if %2 {
      %cst_11 = arith.constant 0.000000e+00 : f32
      %14 = vector.broadcast %cst_11 : f32 to vector<256x128xf32>
      %c0_12 = arith.constant 0 : index
      %c0_13 = arith.constant 0 : index
      %15 = vector.load %arg6[%c0_12, %c0_13] : memref<256x128xf32, #tpu.memory_space<vmem>>, vector<256x128xf32>
      tpu.vector_store %arg6[%c0_12, %c0_13], %14 {strides = array<i32>} : memref<256x128xf32, #tpu.memory_space<vmem>>, vector<256x128xf32>,
    } else {
    }
    %c0 = arith.constant 0 : index
    %c0_1 = arith.constant 0 : index
    %3 = vector.load %arg6[%c0, %c0_1] : memref<256x128xf32, #tpu.memory_space<vmem>>, vector<256x128xf32>
    %c0_2 = arith.constant 0 : index
    %c0_3 = arith.constant 0 : index
    %c0_4 = arith.constant 0 : index
    %4 = vector.load %arg2[%c0_2, %c0_3, %c0_4] : memref<1x256x8xbf16, #tpu.memory_space<vmem>>, vector<1x256x8xbf16>
    %5 = vector.shape_cast %4 : vector<1x256x8xbf16> to vector<256x8xbf16>
    %c0_5 = arith.constant 0 : index
    %c0_6 = arith.constant 0 : index
    %c0_7 = arith.constant 0 : index
    %6 = vector.load %arg3[%c0_5, %c0_6, %c0_7] : memref<1x8x128xbf16, #tpu.memory_space<vmem>>, vector<1x8x128xbf16>
    %7 = vector.shape_cast %6 : vector<1x8x128xbf16> to vector<8x128xbf16>
    %cst = arith.constant dense<0.000000e+00> : vector<256x128xf32>
    %8 = tpu.matmul %5, %7, %cst {dimension_numbers = #tpu.dot_dimension_numbers<[1], [0], [0], [1], [0, 0, 1, 1], [], []>} : vector<256x8xbf16>, vector<8x128xbf16>, vector<256x128xf32> -> vector<256x128xf32>
    %9 = arith.addf %3, %8 : vector<256x128xf32>
    %c0_8 = arith.constant 0 : index
    %c0_9 = arith.constant 0 : index
    %10 = vector.load %arg6[%c0_8, %c0_9] : memref<256x128xf32, #tpu.memory_space<vmem>>, vector<256x128xf32>
    tpu.vector_store %arg6[%c0_8, %c0_9], %9 {strides = array<i32>} : memref<256x128xf32, #tpu.memory_space<vmem>>, vector<256x128xf32>,
    %c8_i32 = arith.constant 8 : i32
    %11 = arith.cmpi eq, %arg1, %c8_i32 : i32
    %12 = arith.extui %11 : i1 to i32
    %c0_i32_10 = arith.constant 0 : i32
    %13 = arith.cmpi ne, %12, %c0_i32_10 : i32
    scf.if %13 {
      %c0_11 = arith.constant 0 : index
      %c0_12 = arith.constant 0 : index
      %14 = vector.load %arg6[%c0_11, %c0_12] : memref<256x128xf32, #tpu.memory_space<vmem>>, vector<256x128xf32>
      %c0_13 = arith.constant 0 : index
      %c0_14 = arith.constant 0 : index
      %15 = vector.load %arg4[%c0_13, %c0_14] : memref<1x128xf32, #tpu.memory_space<vmem>>, vector<1x128xf32>
      %16 = vector.broadcast %15 : vector<1x128xf32> to vector<256x128xf32>
      %17 = arith.addf %14, %16 : vector<256x128xf32>
      %cst_15 = arith.constant 0.000000e+00 : f32
      %cst_16 = arith.constant 6.000000e+00 : f32
      %18 = vector.broadcast %cst_15 : f32 to vector<256x128xf32>
      %19 = arith.maximumf %18, %17 : vector<256x128xf32>
      %20 = vector.broadcast %cst_16 : f32 to vector<256x128xf32>
      %21 = arith.minimumf %20, %19 : vector<256x128xf32>
      %22 = arith.truncf %21 : vector<256x128xf32> to vector<256x128xbf16>
      %c0_17 = arith.constant 0 : index
      %c0_18 = arith.constant 0 : index
      %23 = vector.load %arg5[%c0_17, %c0_18] : memref<256x128xbf16, #tpu.memory_space<vmem>>, vector<256x128xbf16>
      tpu.vector_store %arg5[%c0_17, %c0_18], %22 {strides = array<i32>} : memref<256x128xbf16, #tpu.memory_space<vmem>>, vector<256x128xbf16>,
    } else {
    }
    return
  }
  func.func @transform_0(%arg0: i32, %arg1: i32) -> (i32, i32, i32) {
    %c0_i32 = arith.constant 0 : i32
    %c0_i32_0 = arith.constant 0 : i32
    return %arg1, %arg0, %c0_i32 : i32, i32, i32
  }
  func.func @transform_1(%arg0: i32, %arg1: i32) -> (i32, i32, i32) {
    %c0_i32 = arith.constant 0 : i32
    %c0_i32_0 = arith.constant 0 : i32
    %c0_i32_1 = arith.constant 0 : i32
    return %arg1, %c0_i32, %c0_i32_0 : i32, i32, i32
  }
  func.func @transform_2(%arg0: i32, %arg1: i32) -> (i32, i32) {
    %c0_i32 = arith.constant 0 : i32
    %c0_i32_0 = arith.constant 0 : i32
    %c0_i32_1 = arith.constant 0 : i32
    return %c0_i32, %c0_i32_0 : i32, i32
  }
  func.func @transform_3(%arg0: i32, %arg1: i32) -> (i32, i32) {
    %c0_i32 = arith.constant 0 : i32
    %c0_i32_0 = arith.constant 0 : i32
    return %arg0, %c0_i32 : i32, i32
  }
}

module attributes {stable_mosaic.version = 11 : i64} {
  func.func @_maxpool_kernel(%arg0: i32, %arg1: memref<9x128x16xbf16, #tpu.memory_space<vmem>>, %arg2: memref<128x16xbf16, #tpu.memory_space<vmem>>) attributes {dimension_semantics = [#tpu.dimension_semantics<parallel>], iteration_bounds = array<i64: 1>, scalar_prefetch = 0 : i64, scratch_operands = 0 : i64, tpu.core_type = #tpu.core_type<tc>, window_params = [{transform_indices = @transform_0, window_bounds = array<i64: 9, 128, 16>}, {transform_indices = @transform_1, window_bounds = array<i64: 128, 16>}]} {
    %c0 = arith.constant 0 : index
    %c0_0 = arith.constant 0 : index
    %c0_1 = arith.constant 0 : index
    %0 = vector.load %arg1[%c0, %c0_0, %c0_1] : memref<9x128x16xbf16, #tpu.memory_space<vmem>>, vector<1x128x16xbf16>
    %1 = vector.shape_cast %0 : vector<1x128x16xbf16> to vector<128x16xbf16>
    %c1 = arith.constant 1 : index
    %c0_2 = arith.constant 0 : index
    %c0_3 = arith.constant 0 : index
    %2 = vector.load %arg1[%c1, %c0_2, %c0_3] : memref<9x128x16xbf16, #tpu.memory_space<vmem>>, vector<1x128x16xbf16>
    %3 = vector.shape_cast %2 : vector<1x128x16xbf16> to vector<128x16xbf16>
    %4 = arith.maximumf %1, %3 : vector<128x16xbf16>
    %c2 = arith.constant 2 : index
    %c0_4 = arith.constant 0 : index
    %c0_5 = arith.constant 0 : index
    %5 = vector.load %arg1[%c2, %c0_4, %c0_5] : memref<9x128x16xbf16, #tpu.memory_space<vmem>>, vector<1x128x16xbf16>
    %6 = vector.shape_cast %5 : vector<1x128x16xbf16> to vector<128x16xbf16>
    %7 = arith.maximumf %4, %6 : vector<128x16xbf16>
    %c3 = arith.constant 3 : index
    %c0_6 = arith.constant 0 : index
    %c0_7 = arith.constant 0 : index
    %8 = vector.load %arg1[%c3, %c0_6, %c0_7] : memref<9x128x16xbf16, #tpu.memory_space<vmem>>, vector<1x128x16xbf16>
    %9 = vector.shape_cast %8 : vector<1x128x16xbf16> to vector<128x16xbf16>
    %10 = arith.maximumf %7, %9 : vector<128x16xbf16>
    %c4 = arith.constant 4 : index
    %c0_8 = arith.constant 0 : index
    %c0_9 = arith.constant 0 : index
    %11 = vector.load %arg1[%c4, %c0_8, %c0_9] : memref<9x128x16xbf16, #tpu.memory_space<vmem>>, vector<1x128x16xbf16>
    %12 = vector.shape_cast %11 : vector<1x128x16xbf16> to vector<128x16xbf16>
    %13 = arith.maximumf %10, %12 : vector<128x16xbf16>
    %c5 = arith.constant 5 : index
    %c0_10 = arith.constant 0 : index
    %c0_11 = arith.constant 0 : index
    %14 = vector.load %arg1[%c5, %c0_10, %c0_11] : memref<9x128x16xbf16, #tpu.memory_space<vmem>>, vector<1x128x16xbf16>
    %15 = vector.shape_cast %14 : vector<1x128x16xbf16> to vector<128x16xbf16>
    %16 = arith.maximumf %13, %15 : vector<128x16xbf16>
    %c6 = arith.constant 6 : index
    %c0_12 = arith.constant 0 : index
    %c0_13 = arith.constant 0 : index
    %17 = vector.load %arg1[%c6, %c0_12, %c0_13] : memref<9x128x16xbf16, #tpu.memory_space<vmem>>, vector<1x128x16xbf16>
    %18 = vector.shape_cast %17 : vector<1x128x16xbf16> to vector<128x16xbf16>
    %19 = arith.maximumf %16, %18 : vector<128x16xbf16>
    %c7 = arith.constant 7 : index
    %c0_14 = arith.constant 0 : index
    %c0_15 = arith.constant 0 : index
    %20 = vector.load %arg1[%c7, %c0_14, %c0_15] : memref<9x128x16xbf16, #tpu.memory_space<vmem>>, vector<1x128x16xbf16>
    %21 = vector.shape_cast %20 : vector<1x128x16xbf16> to vector<128x16xbf16>
    %22 = arith.maximumf %19, %21 : vector<128x16xbf16>
    %c8 = arith.constant 8 : index
    %c0_16 = arith.constant 0 : index
    %c0_17 = arith.constant 0 : index
    %23 = vector.load %arg1[%c8, %c0_16, %c0_17] : memref<9x128x16xbf16, #tpu.memory_space<vmem>>, vector<1x128x16xbf16>
    %24 = vector.shape_cast %23 : vector<1x128x16xbf16> to vector<128x16xbf16>
    %25 = arith.maximumf %22, %24 : vector<128x16xbf16>
    %c0_18 = arith.constant 0 : index
    %c0_19 = arith.constant 0 : index
    %26 = vector.load %arg2[%c0_18, %c0_19] : memref<128x16xbf16, #tpu.memory_space<vmem>>, vector<128x16xbf16>
    tpu.vector_store %arg2[%c0_18, %c0_19], %25 {strides = array<i32>} : memref<128x16xbf16, #tpu.memory_space<vmem>>, vector<128x16xbf16>,
    return
  }
  func.func @transform_0(%arg0: i32) -> (i32, i32, i32) {
    %c0_i32 = arith.constant 0 : i32
    %c0_i32_0 = arith.constant 0 : i32
    %c0_i32_1 = arith.constant 0 : i32
    return %c0_i32, %arg0, %c0_i32_0 : i32, i32, i32
  }
  func.func @transform_1(%arg0: i32) -> (i32, i32) {
    %c0_i32 = arith.constant 0 : i32
    %c0_i32_0 = arith.constant 0 : i32
    return %arg0, %c0_i32 : i32, i32
  }
}

module attributes {stable_mosaic.version = 11 : i64} {
  func.func @_conv_bn_act_kernel(%arg0: i32, %arg1: i32, %arg2: memref<1x128x16xbf16, #tpu.memory_space<vmem>>, %arg3: memref<1x16x128xbf16, #tpu.memory_space<vmem>>, %arg4: memref<1x128xf32, #tpu.memory_space<vmem>>, %arg5: memref<128x128xbf16, #tpu.memory_space<vmem>>, %arg6: memref<128x128xf32, #tpu.memory_space<vmem>>) attributes {dimension_semantics = [#tpu.dimension_semantics<parallel>, #tpu.dimension_semantics<arbitrary>], iteration_bounds = array<i64: 1, 9>, scalar_prefetch = 0 : i64, scratch_operands = 1 : i64, tpu.core_type = #tpu.core_type<tc>, window_params = [{transform_indices = @transform_0, window_bounds = array<i64: 1, 128, 16>}, {transform_indices = @transform_1, window_bounds = array<i64: 1, 16, 128>}, {pipeline_mode = #tpu.pipeline_mode<synchronous>, transform_indices = @transform_2, window_bounds = array<i64: 1, 128>}, {transform_indices = @transform_3, window_bounds = array<i64: 128, 128>}]} {
    %c0_i32 = arith.constant 0 : i32
    %0 = arith.cmpi eq, %arg1, %c0_i32 : i32
    %1 = arith.extui %0 : i1 to i32
    %c0_i32_0 = arith.constant 0 : i32
    %2 = arith.cmpi ne, %1, %c0_i32_0 : i32
    scf.if %2 {
      %cst_11 = arith.constant 0.000000e+00 : f32
      %14 = vector.broadcast %cst_11 : f32 to vector<128x128xf32>
      %c0_12 = arith.constant 0 : index
      %c0_13 = arith.constant 0 : index
      %15 = vector.load %arg6[%c0_12, %c0_13] : memref<128x128xf32, #tpu.memory_space<vmem>>, vector<128x128xf32>
      tpu.vector_store %arg6[%c0_12, %c0_13], %14 {strides = array<i32>} : memref<128x128xf32, #tpu.memory_space<vmem>>, vector<128x128xf32>,
    } else {
    }
    %c0 = arith.constant 0 : index
    %c0_1 = arith.constant 0 : index
    %3 = vector.load %arg6[%c0, %c0_1] : memref<128x128xf32, #tpu.memory_space<vmem>>, vector<128x128xf32>
    %c0_2 = arith.constant 0 : index
    %c0_3 = arith.constant 0 : index
    %c0_4 = arith.constant 0 : index
    %4 = vector.load %arg2[%c0_2, %c0_3, %c0_4] : memref<1x128x16xbf16, #tpu.memory_space<vmem>>, vector<1x128x16xbf16>
    %5 = vector.shape_cast %4 : vector<1x128x16xbf16> to vector<128x16xbf16>
    %c0_5 = arith.constant 0 : index
    %c0_6 = arith.constant 0 : index
    %c0_7 = arith.constant 0 : index
    %6 = vector.load %arg3[%c0_5, %c0_6, %c0_7] : memref<1x16x128xbf16, #tpu.memory_space<vmem>>, vector<1x16x128xbf16>
    %7 = vector.shape_cast %6 : vector<1x16x128xbf16> to vector<16x128xbf16>
    %cst = arith.constant dense<0.000000e+00> : vector<128x128xf32>
    %8 = tpu.matmul %5, %7, %cst {dimension_numbers = #tpu.dot_dimension_numbers<[1], [0], [0], [1], [0, 0, 1, 1], [], []>} : vector<128x16xbf16>, vector<16x128xbf16>, vector<128x128xf32> -> vector<128x128xf32>
    %9 = arith.addf %3, %8 : vector<128x128xf32>
    %c0_8 = arith.constant 0 : index
    %c0_9 = arith.constant 0 : index
    %10 = vector.load %arg6[%c0_8, %c0_9] : memref<128x128xf32, #tpu.memory_space<vmem>>, vector<128x128xf32>
    tpu.vector_store %arg6[%c0_8, %c0_9], %9 {strides = array<i32>} : memref<128x128xf32, #tpu.memory_space<vmem>>, vector<128x128xf32>,
    %c8_i32 = arith.constant 8 : i32
    %11 = arith.cmpi eq, %arg1, %c8_i32 : i32
    %12 = arith.extui %11 : i1 to i32
    %c0_i32_10 = arith.constant 0 : i32
    %13 = arith.cmpi ne, %12, %c0_i32_10 : i32
    scf.if %13 {
      %c0_11 = arith.constant 0 : index
      %c0_12 = arith.constant 0 : index
      %14 = vector.load %arg6[%c0_11, %c0_12] : memref<128x128xf32, #tpu.memory_space<vmem>>, vector<128x128xf32>
      %c0_13 = arith.constant 0 : index
      %c0_14 = arith.constant 0 : index
      %15 = vector.load %arg4[%c0_13, %c0_14] : memref<1x128xf32, #tpu.memory_space<vmem>>, vector<1x128xf32>
      %16 = vector.broadcast %15 : vector<1x128xf32> to vector<128x128xf32>
      %17 = arith.addf %14, %16 : vector<128x128xf32>
      %cst_15 = arith.constant 0.000000e+00 : f32
      %18 = vector.broadcast %cst_15 : f32 to vector<128x128xf32>
      %19 = arith.maximumf %17, %18 : vector<128x128xf32>
      %20 = arith.truncf %19 : vector<128x128xf32> to vector<128x128xbf16>
      %c0_16 = arith.constant 0 : index
      %c0_17 = arith.constant 0 : index
      %21 = vector.load %arg5[%c0_16, %c0_17] : memref<128x128xbf16, #tpu.memory_space<vmem>>, vector<128x128xbf16>
      tpu.vector_store %arg5[%c0_16, %c0_17], %20 {strides = array<i32>} : memref<128x128xbf16, #tpu.memory_space<vmem>>, vector<128x128xbf16>,
    } else {
    }
    return
  }
  func.func @transform_0(%arg0: i32, %arg1: i32) -> (i32, i32, i32) {
    %c0_i32 = arith.constant 0 : i32
    %c0_i32_0 = arith.constant 0 : i32
    return %arg1, %arg0, %c0_i32 : i32, i32, i32
  }
  func.func @transform_1(%arg0: i32, %arg1: i32) -> (i32, i32, i32) {
    %c0_i32 = arith.constant 0 : i32
    %c0_i32_0 = arith.constant 0 : i32
    %c0_i32_1 = arith.constant 0 : i32
    return %arg1, %c0_i32, %c0_i32_0 : i32, i32, i32
  }
  func.func @transform_2(%arg0: i32, %arg1: i32) -> (i32, i32) {
    %c0_i32 = arith.constant 0 : i32
    %c0_i32_0 = arith.constant 0 : i32
    %c0_i32_1 = arith.constant 0 : i32
    return %c0_i32, %c0_i32_0 : i32, i32
  }
  func.func @transform_3(%arg0: i32, %arg1: i32) -> (i32, i32) {
    %c0_i32 = arith.constant 0 : i32
    %c0_i32_0 = arith.constant 0 : i32
    return %arg0, %c0_i32 : i32, i32
  }
}

module attributes {stable_mosaic.version = 11 : i64} {
  func.func @_conv_bn_act_kernel(%arg0: i32, %arg1: i32, %arg2: memref<1x128x24xbf16, #tpu.memory_space<vmem>>, %arg3: memref<1x24x128xbf16, #tpu.memory_space<vmem>>, %arg4: memref<1x128xf32, #tpu.memory_space<vmem>>, %arg5: memref<128x128xbf16, #tpu.memory_space<vmem>>, %arg6: memref<128x128xf32, #tpu.memory_space<vmem>>) attributes {dimension_semantics = [#tpu.dimension_semantics<parallel>, #tpu.dimension_semantics<arbitrary>], iteration_bounds = array<i64: 1, 9>, scalar_prefetch = 0 : i64, scratch_operands = 1 : i64, tpu.core_type = #tpu.core_type<tc>, window_params = [{transform_indices = @transform_0, window_bounds = array<i64: 1, 128, 24>}, {transform_indices = @transform_1, window_bounds = array<i64: 1, 24, 128>}, {pipeline_mode = #tpu.pipeline_mode<synchronous>, transform_indices = @transform_2, window_bounds = array<i64: 1, 128>}, {transform_indices = @transform_3, window_bounds = array<i64: 128, 128>}]} {
    %c0_i32 = arith.constant 0 : i32
    %0 = arith.cmpi eq, %arg1, %c0_i32 : i32
    %1 = arith.extui %0 : i1 to i32
    %c0_i32_0 = arith.constant 0 : i32
    %2 = arith.cmpi ne, %1, %c0_i32_0 : i32
    scf.if %2 {
      %cst_11 = arith.constant 0.000000e+00 : f32
      %14 = vector.broadcast %cst_11 : f32 to vector<128x128xf32>
      %c0_12 = arith.constant 0 : index
      %c0_13 = arith.constant 0 : index
      %15 = vector.load %arg6[%c0_12, %c0_13] : memref<128x128xf32, #tpu.memory_space<vmem>>, vector<128x128xf32>
      tpu.vector_store %arg6[%c0_12, %c0_13], %14 {strides = array<i32>} : memref<128x128xf32, #tpu.memory_space<vmem>>, vector<128x128xf32>,
    } else {
    }
    %c0 = arith.constant 0 : index
    %c0_1 = arith.constant 0 : index
    %3 = vector.load %arg6[%c0, %c0_1] : memref<128x128xf32, #tpu.memory_space<vmem>>, vector<128x128xf32>
    %c0_2 = arith.constant 0 : index
    %c0_3 = arith.constant 0 : index
    %c0_4 = arith.constant 0 : index
    %4 = vector.load %arg2[%c0_2, %c0_3, %c0_4] : memref<1x128x24xbf16, #tpu.memory_space<vmem>>, vector<1x128x24xbf16>
    %5 = vector.shape_cast %4 : vector<1x128x24xbf16> to vector<128x24xbf16>
    %c0_5 = arith.constant 0 : index
    %c0_6 = arith.constant 0 : index
    %c0_7 = arith.constant 0 : index
    %6 = vector.load %arg3[%c0_5, %c0_6, %c0_7] : memref<1x24x128xbf16, #tpu.memory_space<vmem>>, vector<1x24x128xbf16>
    %7 = vector.shape_cast %6 : vector<1x24x128xbf16> to vector<24x128xbf16>
    %cst = arith.constant dense<0.000000e+00> : vector<128x128xf32>
    %8 = tpu.matmul %5, %7, %cst {dimension_numbers = #tpu.dot_dimension_numbers<[1], [0], [0], [1], [0, 0, 1, 1], [], []>} : vector<128x24xbf16>, vector<24x128xbf16>, vector<128x128xf32> -> vector<128x128xf32>
    %9 = arith.addf %3, %8 : vector<128x128xf32>
    %c0_8 = arith.constant 0 : index
    %c0_9 = arith.constant 0 : index
    %10 = vector.load %arg6[%c0_8, %c0_9] : memref<128x128xf32, #tpu.memory_space<vmem>>, vector<128x128xf32>
    tpu.vector_store %arg6[%c0_8, %c0_9], %9 {strides = array<i32>} : memref<128x128xf32, #tpu.memory_space<vmem>>, vector<128x128xf32>,
    %c8_i32 = arith.constant 8 : i32
    %11 = arith.cmpi eq, %arg1, %c8_i32 : i32
    %12 = arith.extui %11 : i1 to i32
    %c0_i32_10 = arith.constant 0 : i32
    %13 = arith.cmpi ne, %12, %c0_i32_10 : i32
    scf.if %13 {
      %c0_11 = arith.constant 0 : index
      %c0_12 = arith.constant 0 : index
      %14 = vector.load %arg6[%c0_11, %c0_12] : memref<128x128xf32, #tpu.memory_space<vmem>>, vector<128x128xf32>
      %c0_13 = arith.constant 0 : index
      %c0_14 = arith.constant 0 : index
      %15 = vector.load %arg4[%c0_13, %c0_14] : memref<1x128xf32, #tpu.memory_space<vmem>>, vector<1x128xf32>
      %16 = vector.broadcast %15 : vector<1x128xf32> to vector<128x128xf32>
      %17 = arith.addf %14, %16 : vector<128x128xf32>
      %cst_15 = arith.constant 0.000000e+00 : f32
      %18 = vector.broadcast %cst_15 : f32 to vector<128x128xf32>
      %19 = arith.maximumf %17, %18 : vector<128x128xf32>
      %20 = arith.truncf %19 : vector<128x128xf32> to vector<128x128xbf16>
      %c0_16 = arith.constant 0 : index
      %c0_17 = arith.constant 0 : index
      %21 = vector.load %arg5[%c0_16, %c0_17] : memref<128x128xbf16, #tpu.memory_space<vmem>>, vector<128x128xbf16>
      tpu.vector_store %arg5[%c0_16, %c0_17], %20 {strides = array<i32>} : memref<128x128xbf16, #tpu.memory_space<vmem>>, vector<128x128xbf16>,
    } else {
    }
    return
  }
  func.func @transform_0(%arg0: i32, %arg1: i32) -> (i32, i32, i32) {
    %c0_i32 = arith.constant 0 : i32
    %c0_i32_0 = arith.constant 0 : i32
    return %arg1, %arg0, %c0_i32 : i32, i32, i32
  }
  func.func @transform_1(%arg0: i32, %arg1: i32) -> (i32, i32, i32) {
    %c0_i32 = arith.constant 0 : i32
    %c0_i32_0 = arith.constant 0 : i32
    %c0_i32_1 = arith.constant 0 : i32
    return %arg1, %c0_i32, %c0_i32_0 : i32, i32, i32
  }
  func.func @transform_2(%arg0: i32, %arg1: i32) -> (i32, i32) {
    %c0_i32 = arith.constant 0 : i32
    %c0_i32_0 = arith.constant 0 : i32
    %c0_i32_1 = arith.constant 0 : i32
    return %c0_i32, %c0_i32_0 : i32, i32
  }
  func.func @transform_3(%arg0: i32, %arg1: i32) -> (i32, i32) {
    %c0_i32 = arith.constant 0 : i32
    %c0_i32_0 = arith.constant 0 : i32
    return %arg0, %c0_i32 : i32, i32
  }
}

module attributes {stable_mosaic.version = 11 : i64} {
  func.func @_conv_bn_act_kernel(%arg0: i32, %arg1: i32, %arg2: memref<1x128x8xbf16, #tpu.memory_space<vmem>>, %arg3: memref<1x8x128xbf16, #tpu.memory_space<vmem>>, %arg4: memref<1x128xf32, #tpu.memory_space<vmem>>, %arg5: memref<128x128xbf16, #tpu.memory_space<vmem>>, %arg6: memref<128x128xf32, #tpu.memory_space<vmem>>) attributes {dimension_semantics = [#tpu.dimension_semantics<parallel>, #tpu.dimension_semantics<arbitrary>], iteration_bounds = array<i64: 1, 9>, scalar_prefetch = 0 : i64, scratch_operands = 1 : i64, tpu.core_type = #tpu.core_type<tc>, window_params = [{transform_indices = @transform_0, window_bounds = array<i64: 1, 128, 8>}, {transform_indices = @transform_1, window_bounds = array<i64: 1, 8, 128>}, {pipeline_mode = #tpu.pipeline_mode<synchronous>, transform_indices = @transform_2, window_bounds = array<i64: 1, 128>}, {transform_indices = @transform_3, window_bounds = array<i64: 128, 128>}]} {
    %c0_i32 = arith.constant 0 : i32
    %0 = arith.cmpi eq, %arg1, %c0_i32 : i32
    %1 = arith.extui %0 : i1 to i32
    %c0_i32_0 = arith.constant 0 : i32
    %2 = arith.cmpi ne, %1, %c0_i32_0 : i32
    scf.if %2 {
      %cst_11 = arith.constant 0.000000e+00 : f32
      %14 = vector.broadcast %cst_11 : f32 to vector<128x128xf32>
      %c0_12 = arith.constant 0 : index
      %c0_13 = arith.constant 0 : index
      %15 = vector.load %arg6[%c0_12, %c0_13] : memref<128x128xf32, #tpu.memory_space<vmem>>, vector<128x128xf32>
      tpu.vector_store %arg6[%c0_12, %c0_13], %14 {strides = array<i32>} : memref<128x128xf32, #tpu.memory_space<vmem>>, vector<128x128xf32>,
    } else {
    }
    %c0 = arith.constant 0 : index
    %c0_1 = arith.constant 0 : index
    %3 = vector.load %arg6[%c0, %c0_1] : memref<128x128xf32, #tpu.memory_space<vmem>>, vector<128x128xf32>
    %c0_2 = arith.constant 0 : index
    %c0_3 = arith.constant 0 : index
    %c0_4 = arith.constant 0 : index
    %4 = vector.load %arg2[%c0_2, %c0_3, %c0_4] : memref<1x128x8xbf16, #tpu.memory_space<vmem>>, vector<1x128x8xbf16>
    %5 = vector.shape_cast %4 : vector<1x128x8xbf16> to vector<128x8xbf16>
    %c0_5 = arith.constant 0 : index
    %c0_6 = arith.constant 0 : index
    %c0_7 = arith.constant 0 : index
    %6 = vector.load %arg3[%c0_5, %c0_6, %c0_7] : memref<1x8x128xbf16, #tpu.memory_space<vmem>>, vector<1x8x128xbf16>
    %7 = vector.shape_cast %6 : vector<1x8x128xbf16> to vector<8x128xbf16>
    %cst = arith.constant dense<0.000000e+00> : vector<128x128xf32>
    %8 = tpu.matmul %5, %7, %cst {dimension_numbers = #tpu.dot_dimension_numbers<[1], [0], [0], [1], [0, 0, 1, 1], [], []>} : vector<128x8xbf16>, vector<8x128xbf16>, vector<128x128xf32> -> vector<128x128xf32>
    %9 = arith.addf %3, %8 : vector<128x128xf32>
    %c0_8 = arith.constant 0 : index
    %c0_9 = arith.constant 0 : index
    %10 = vector.load %arg6[%c0_8, %c0_9] : memref<128x128xf32, #tpu.memory_space<vmem>>, vector<128x128xf32>
    tpu.vector_store %arg6[%c0_8, %c0_9], %9 {strides = array<i32>} : memref<128x128xf32, #tpu.memory_space<vmem>>, vector<128x128xf32>,
    %c8_i32 = arith.constant 8 : i32
    %11 = arith.cmpi eq, %arg1, %c8_i32 : i32
    %12 = arith.extui %11 : i1 to i32
    %c0_i32_10 = arith.constant 0 : i32
    %13 = arith.cmpi ne, %12, %c0_i32_10 : i32
    scf.if %13 {
      %c0_11 = arith.constant 0 : index
      %c0_12 = arith.constant 0 : index
      %14 = vector.load %arg6[%c0_11, %c0_12] : memref<128x128xf32, #tpu.memory_space<vmem>>, vector<128x128xf32>
      %c0_13 = arith.constant 0 : index
      %c0_14 = arith.constant 0 : index
      %15 = vector.load %arg4[%c0_13, %c0_14] : memref<1x128xf32, #tpu.memory_space<vmem>>, vector<1x128xf32>
      %16 = vector.broadcast %15 : vector<1x128xf32> to vector<128x128xf32>
      %17 = arith.addf %14, %16 : vector<128x128xf32>
      %cst_15 = arith.constant 0.000000e+00 : f32
      %18 = vector.broadcast %cst_15 : f32 to vector<128x128xf32>
      %19 = arith.maximumf %17, %18 : vector<128x128xf32>
      %20 = arith.truncf %19 : vector<128x128xf32> to vector<128x128xbf16>
      %c0_16 = arith.constant 0 : index
      %c0_17 = arith.constant 0 : index
      %21 = vector.load %arg5[%c0_16, %c0_17] : memref<128x128xbf16, #tpu.memory_space<vmem>>, vector<128x128xbf16>
      tpu.vector_store %arg5[%c0_16, %c0_17], %20 {strides = array<i32>} : memref<128x128xbf16, #tpu.memory_space<vmem>>, vector<128x128xbf16>,
    } else {
    }
    return
  }
  func.func @transform_0(%arg0: i32, %arg1: i32) -> (i32, i32, i32) {
    %c0_i32 = arith.constant 0 : i32
    %c0_i32_0 = arith.constant 0 : i32
    return %arg1, %arg0, %c0_i32 : i32, i32, i32
  }
  func.func @transform_1(%arg0: i32, %arg1: i32) -> (i32, i32, i32) {
    %c0_i32 = arith.constant 0 : i32
    %c0_i32_0 = arith.constant 0 : i32
    %c0_i32_1 = arith.constant 0 : i32
    return %arg1, %c0_i32, %c0_i32_0 : i32, i32, i32
  }
  func.func @transform_2(%arg0: i32, %arg1: i32) -> (i32, i32) {
    %c0_i32 = arith.constant 0 : i32
    %c0_i32_0 = arith.constant 0 : i32
    %c0_i32_1 = arith.constant 0 : i32
    return %c0_i32, %c0_i32_0 : i32, i32
  }
  func.func @transform_3(%arg0: i32, %arg1: i32) -> (i32, i32) {
    %c0_i32 = arith.constant 0 : i32
    %c0_i32_0 = arith.constant 0 : i32
    return %arg0, %c0_i32 : i32, i32
  }
}

module attributes {stable_mosaic.version = 11 : i64} {
  func.func @_conv_bn_act_kernel(%arg0: i32, %arg1: i32, %arg2: memref<1x128x32xbf16, #tpu.memory_space<vmem>>, %arg3: memref<1x32x128xbf16, #tpu.memory_space<vmem>>, %arg4: memref<1x128xf32, #tpu.memory_space<vmem>>, %arg5: memref<128x128xbf16, #tpu.memory_space<vmem>>, %arg6: memref<128x128xf32, #tpu.memory_space<vmem>>) attributes {dimension_semantics = [#tpu.dimension_semantics<parallel>, #tpu.dimension_semantics<arbitrary>], iteration_bounds = array<i64: 1, 9>, scalar_prefetch = 0 : i64, scratch_operands = 1 : i64, tpu.core_type = #tpu.core_type<tc>, window_params = [{transform_indices = @transform_0, window_bounds = array<i64: 1, 128, 32>}, {transform_indices = @transform_1, window_bounds = array<i64: 1, 32, 128>}, {pipeline_mode = #tpu.pipeline_mode<synchronous>, transform_indices = @transform_2, window_bounds = array<i64: 1, 128>}, {transform_indices = @transform_3, window_bounds = array<i64: 128, 128>}]} {
    %c0_i32 = arith.constant 0 : i32
    %0 = arith.cmpi eq, %arg1, %c0_i32 : i32
    %1 = arith.extui %0 : i1 to i32
    %c0_i32_0 = arith.constant 0 : i32
    %2 = arith.cmpi ne, %1, %c0_i32_0 : i32
    scf.if %2 {
      %cst_11 = arith.constant 0.000000e+00 : f32
      %14 = vector.broadcast %cst_11 : f32 to vector<128x128xf32>
      %c0_12 = arith.constant 0 : index
      %c0_13 = arith.constant 0 : index
      %15 = vector.load %arg6[%c0_12, %c0_13] : memref<128x128xf32, #tpu.memory_space<vmem>>, vector<128x128xf32>
      tpu.vector_store %arg6[%c0_12, %c0_13], %14 {strides = array<i32>} : memref<128x128xf32, #tpu.memory_space<vmem>>, vector<128x128xf32>,
    } else {
    }
    %c0 = arith.constant 0 : index
    %c0_1 = arith.constant 0 : index
    %3 = vector.load %arg6[%c0, %c0_1] : memref<128x128xf32, #tpu.memory_space<vmem>>, vector<128x128xf32>
    %c0_2 = arith.constant 0 : index
    %c0_3 = arith.constant 0 : index
    %c0_4 = arith.constant 0 : index
    %4 = vector.load %arg2[%c0_2, %c0_3, %c0_4] : memref<1x128x32xbf16, #tpu.memory_space<vmem>>, vector<1x128x32xbf16>
    %5 = vector.shape_cast %4 : vector<1x128x32xbf16> to vector<128x32xbf16>
    %c0_5 = arith.constant 0 : index
    %c0_6 = arith.constant 0 : index
    %c0_7 = arith.constant 0 : index
    %6 = vector.load %arg3[%c0_5, %c0_6, %c0_7] : memref<1x32x128xbf16, #tpu.memory_space<vmem>>, vector<1x32x128xbf16>
    %7 = vector.shape_cast %6 : vector<1x32x128xbf16> to vector<32x128xbf16>
    %cst = arith.constant dense<0.000000e+00> : vector<128x128xf32>
    %8 = tpu.matmul %5, %7, %cst {dimension_numbers = #tpu.dot_dimension_numbers<[1], [0], [0], [1], [0, 0, 1, 1], [], []>} : vector<128x32xbf16>, vector<32x128xbf16>, vector<128x128xf32> -> vector<128x128xf32>
    %9 = arith.addf %3, %8 : vector<128x128xf32>
    %c0_8 = arith.constant 0 : index
    %c0_9 = arith.constant 0 : index
    %10 = vector.load %arg6[%c0_8, %c0_9] : memref<128x128xf32, #tpu.memory_space<vmem>>, vector<128x128xf32>
    tpu.vector_store %arg6[%c0_8, %c0_9], %9 {strides = array<i32>} : memref<128x128xf32, #tpu.memory_space<vmem>>, vector<128x128xf32>,
    %c8_i32 = arith.constant 8 : i32
    %11 = arith.cmpi eq, %arg1, %c8_i32 : i32
    %12 = arith.extui %11 : i1 to i32
    %c0_i32_10 = arith.constant 0 : i32
    %13 = arith.cmpi ne, %12, %c0_i32_10 : i32
    scf.if %13 {
      %c0_11 = arith.constant 0 : index
      %c0_12 = arith.constant 0 : index
      %14 = vector.load %arg6[%c0_11, %c0_12] : memref<128x128xf32, #tpu.memory_space<vmem>>, vector<128x128xf32>
      %c0_13 = arith.constant 0 : index
      %c0_14 = arith.constant 0 : index
      %15 = vector.load %arg4[%c0_13, %c0_14] : memref<1x128xf32, #tpu.memory_space<vmem>>, vector<1x128xf32>
      %16 = vector.broadcast %15 : vector<1x128xf32> to vector<128x128xf32>
      %17 = arith.addf %14, %16 : vector<128x128xf32>
      %cst_15 = arith.constant 0.000000e+00 : f32
      %18 = vector.broadcast %cst_15 : f32 to vector<128x128xf32>
      %19 = arith.maximumf %17, %18 : vector<128x128xf32>
      %20 = arith.truncf %19 : vector<128x128xf32> to vector<128x128xbf16>
      %c0_16 = arith.constant 0 : index
      %c0_17 = arith.constant 0 : index
      %21 = vector.load %arg5[%c0_16, %c0_17] : memref<128x128xbf16, #tpu.memory_space<vmem>>, vector<128x128xbf16>
      tpu.vector_store %arg5[%c0_16, %c0_17], %20 {strides = array<i32>} : memref<128x128xbf16, #tpu.memory_space<vmem>>, vector<128x128xbf16>,
    } else {
    }
    return
  }
  func.func @transform_0(%arg0: i32, %arg1: i32) -> (i32, i32, i32) {
    %c0_i32 = arith.constant 0 : i32
    %c0_i32_0 = arith.constant 0 : i32
    return %arg1, %arg0, %c0_i32 : i32, i32, i32
  }
  func.func @transform_1(%arg0: i32, %arg1: i32) -> (i32, i32, i32) {
    %c0_i32 = arith.constant 0 : i32
    %c0_i32_0 = arith.constant 0 : i32
    %c0_i32_1 = arith.constant 0 : i32
    return %arg1, %c0_i32, %c0_i32_0 : i32, i32, i32
  }
  func.func @transform_2(%arg0: i32, %arg1: i32) -> (i32, i32) {
    %c0_i32 = arith.constant 0 : i32
    %c0_i32_0 = arith.constant 0 : i32
    %c0_i32_1 = arith.constant 0 : i32
    return %c0_i32, %c0_i32_0 : i32, i32
  }
  func.func @transform_3(%arg0: i32, %arg1: i32) -> (i32, i32) {
    %c0_i32 = arith.constant 0 : i32
    %c0_i32_0 = arith.constant 0 : i32
    return %arg0, %c0_i32 : i32, i32
  }
}

module attributes {stable_mosaic.version = 11 : i64} {
  func.func @_conv_bn_act_kernel(%arg0: i32, %arg1: i32, %arg2: memref<1x128x24xbf16, #tpu.memory_space<vmem>>, %arg3: memref<1x24x128xbf16, #tpu.memory_space<vmem>>, %arg4: memref<1x128xf32, #tpu.memory_space<vmem>>, %arg5: memref<128x128xbf16, #tpu.memory_space<vmem>>, %arg6: memref<128x128xf32, #tpu.memory_space<vmem>>) attributes {dimension_semantics = [#tpu.dimension_semantics<parallel>, #tpu.dimension_semantics<arbitrary>], iteration_bounds = array<i64: 1, 1>, scalar_prefetch = 0 : i64, scratch_operands = 1 : i64, tpu.core_type = #tpu.core_type<tc>, window_params = [{transform_indices = @transform_0, window_bounds = array<i64: 1, 128, 24>}, {transform_indices = @transform_1, window_bounds = array<i64: 1, 24, 128>}, {pipeline_mode = #tpu.pipeline_mode<synchronous>, transform_indices = @transform_2, window_bounds = array<i64: 1, 128>}, {transform_indices = @transform_3, window_bounds = array<i64: 128, 128>}]} {
    %c0_i32 = arith.constant 0 : i32
    %0 = arith.cmpi eq, %arg1, %c0_i32 : i32
    %1 = arith.extui %0 : i1 to i32
    %c0_i32_0 = arith.constant 0 : i32
    %2 = arith.cmpi ne, %1, %c0_i32_0 : i32
    scf.if %2 {
      %cst_12 = arith.constant 0.000000e+00 : f32
      %14 = vector.broadcast %cst_12 : f32 to vector<128x128xf32>
      %c0_13 = arith.constant 0 : index
      %c0_14 = arith.constant 0 : index
      %15 = vector.load %arg6[%c0_13, %c0_14] : memref<128x128xf32, #tpu.memory_space<vmem>>, vector<128x128xf32>
      tpu.vector_store %arg6[%c0_13, %c0_14], %14 {strides = array<i32>} : memref<128x128xf32, #tpu.memory_space<vmem>>, vector<128x128xf32>,
    } else {
    }
    %c0 = arith.constant 0 : index
    %c0_1 = arith.constant 0 : index
    %3 = vector.load %arg6[%c0, %c0_1] : memref<128x128xf32, #tpu.memory_space<vmem>>, vector<128x128xf32>
    %c0_2 = arith.constant 0 : index
    %c0_3 = arith.constant 0 : index
    %c0_4 = arith.constant 0 : index
    %4 = vector.load %arg2[%c0_2, %c0_3, %c0_4] : memref<1x128x24xbf16, #tpu.memory_space<vmem>>, vector<1x128x24xbf16>
    %5 = vector.shape_cast %4 : vector<1x128x24xbf16> to vector<128x24xbf16>
    %c0_5 = arith.constant 0 : index
    %c0_6 = arith.constant 0 : index
    %c0_7 = arith.constant 0 : index
    %6 = vector.load %arg3[%c0_5, %c0_6, %c0_7] : memref<1x24x128xbf16, #tpu.memory_space<vmem>>, vector<1x24x128xbf16>
    %7 = vector.shape_cast %6 : vector<1x24x128xbf16> to vector<24x128xbf16>
    %cst = arith.constant dense<0.000000e+00> : vector<128x128xf32>
    %8 = tpu.matmul %5, %7, %cst {dimension_numbers = #tpu.dot_dimension_numbers<[1], [0], [0], [1], [0, 0, 1, 1], [], []>} : vector<128x24xbf16>, vector<24x128xbf16>, vector<128x128xf32> -> vector<128x128xf32>
    %9 = arith.addf %3, %8 : vector<128x128xf32>
    %c0_8 = arith.constant 0 : index
    %c0_9 = arith.constant 0 : index
    %10 = vector.load %arg6[%c0_8, %c0_9] : memref<128x128xf32, #tpu.memory_space<vmem>>, vector<128x128xf32>
    tpu.vector_store %arg6[%c0_8, %c0_9], %9 {strides = array<i32>} : memref<128x128xf32, #tpu.memory_space<vmem>>, vector<128x128xf32>,
    %c0_i32_10 = arith.constant 0 : i32
    %11 = arith.cmpi eq, %arg1, %c0_i32_10 : i32
    %12 = arith.extui %11 : i1 to i32
    %c0_i32_11 = arith.constant 0 : i32
    %13 = arith.cmpi ne, %12, %c0_i32_11 : i32
    scf.if %13 {
      %c0_12 = arith.constant 0 : index
      %c0_13 = arith.constant 0 : index
      %14 = vector.load %arg6[%c0_12, %c0_13] : memref<128x128xf32, #tpu.memory_space<vmem>>, vector<128x128xf32>
      %c0_14 = arith.constant 0 : index
      %c0_15 = arith.constant 0 : index
      %15 = vector.load %arg4[%c0_14, %c0_15] : memref<1x128xf32, #tpu.memory_space<vmem>>, vector<1x128xf32>
      %16 = vector.broadcast %15 : vector<1x128xf32> to vector<128x128xf32>
      %17 = arith.addf %14, %16 : vector<128x128xf32>
      %cst_16 = arith.constant 0.000000e+00 : f32
      %18 = vector.broadcast %cst_16 : f32 to vector<128x128xf32>
      %19 = arith.maximumf %17, %18 : vector<128x128xf32>
      %20 = arith.truncf %19 : vector<128x128xf32> to vector<128x128xbf16>
      %c0_17 = arith.constant 0 : index
      %c0_18 = arith.constant 0 : index
      %21 = vector.load %arg5[%c0_17, %c0_18] : memref<128x128xbf16, #tpu.memory_space<vmem>>, vector<128x128xbf16>
      tpu.vector_store %arg5[%c0_17, %c0_18], %20 {strides = array<i32>} : memref<128x128xbf16, #tpu.memory_space<vmem>>, vector<128x128xbf16>,
    } else {
    }
    return
  }
  func.func @transform_0(%arg0: i32, %arg1: i32) -> (i32, i32, i32) {
    %c0_i32 = arith.constant 0 : i32
    %c0_i32_0 = arith.constant 0 : i32
    return %arg1, %arg0, %c0_i32 : i32, i32, i32
  }
  func.func @transform_1(%arg0: i32, %arg1: i32) -> (i32, i32, i32) {
    %c0_i32 = arith.constant 0 : i32
    %c0_i32_0 = arith.constant 0 : i32
    %c0_i32_1 = arith.constant 0 : i32
    return %arg1, %c0_i32, %c0_i32_0 : i32, i32, i32
  }
  func.func @transform_2(%arg0: i32, %arg1: i32) -> (i32, i32) {
    %c0_i32 = arith.constant 0 : i32
    %c0_i32_0 = arith.constant 0 : i32
    %c0_i32_1 = arith.constant 0 : i32
    return %c0_i32, %c0_i32_0 : i32, i32
  }
  func.func @transform_3(%arg0: i32, %arg1: i32) -> (i32, i32) {
    %c0_i32 = arith.constant 0 : i32
    %c0_i32_0 = arith.constant 0 : i32
    return %arg0, %c0_i32 : i32, i32
  }
}

module attributes {stable_mosaic.version = 11 : i64} {
  func.func @_maxpool_kernel(%arg0: i32, %arg1: memref<4x32x24xbf16, #tpu.memory_space<vmem>>, %arg2: memref<32x24xbf16, #tpu.memory_space<vmem>>) attributes {dimension_semantics = [#tpu.dimension_semantics<parallel>], iteration_bounds = array<i64: 1>, scalar_prefetch = 0 : i64, scratch_operands = 0 : i64, tpu.core_type = #tpu.core_type<tc>, window_params = [{transform_indices = @transform_0, window_bounds = array<i64: 4, 32, 24>}, {transform_indices = @transform_1, window_bounds = array<i64: 32, 24>}]} {
    %c0 = arith.constant 0 : index
    %c0_0 = arith.constant 0 : index
    %c0_1 = arith.constant 0 : index
    %0 = vector.load %arg1[%c0, %c0_0, %c0_1] : memref<4x32x24xbf16, #tpu.memory_space<vmem>>, vector<1x32x24xbf16>
    %1 = vector.shape_cast %0 : vector<1x32x24xbf16> to vector<32x24xbf16>
    %c1 = arith.constant 1 : index
    %c0_2 = arith.constant 0 : index
    %c0_3 = arith.constant 0 : index
    %2 = vector.load %arg1[%c1, %c0_2, %c0_3] : memref<4x32x24xbf16, #tpu.memory_space<vmem>>, vector<1x32x24xbf16>
    %3 = vector.shape_cast %2 : vector<1x32x24xbf16> to vector<32x24xbf16>
    %4 = arith.maximumf %1, %3 : vector<32x24xbf16>
    %c2 = arith.constant 2 : index
    %c0_4 = arith.constant 0 : index
    %c0_5 = arith.constant 0 : index
    %5 = vector.load %arg1[%c2, %c0_4, %c0_5] : memref<4x32x24xbf16, #tpu.memory_space<vmem>>, vector<1x32x24xbf16>
    %6 = vector.shape_cast %5 : vector<1x32x24xbf16> to vector<32x24xbf16>
    %7 = arith.maximumf %4, %6 : vector<32x24xbf16>
    %c3 = arith.constant 3 : index
    %c0_6 = arith.constant 0 : index
    %c0_7 = arith.constant 0 : index
    %8 = vector.load %arg1[%c3, %c0_6, %c0_7] : memref<4x32x24xbf16, #tpu.memory_space<vmem>>, vector<1x32x24xbf16>
    %9 = vector.shape_cast %8 : vector<1x32x24xbf16> to vector<32x24xbf16>
    %10 = arith.maximumf %7, %9 : vector<32x24xbf16>
    %c0_8 = arith.constant 0 : index
    %c0_9 = arith.constant 0 : index
    %11 = vector.load %arg2[%c0_8, %c0_9] : memref<32x24xbf16, #tpu.memory_space<vmem>>, vector<32x24xbf16>
    tpu.vector_store %arg2[%c0_8, %c0_9], %10 {strides = array<i32>} : memref<32x24xbf16, #tpu.memory_space<vmem>>, vector<32x24xbf16>,
    return
  }
  func.func @transform_0(%arg0: i32) -> (i32, i32, i32) {
    %c0_i32 = arith.constant 0 : i32
    %c0_i32_0 = arith.constant 0 : i32
    %c0_i32_1 = arith.constant 0 : i32
    return %c0_i32, %arg0, %c0_i32_0 : i32, i32, i32
  }
  func.func @transform_1(%arg0: i32) -> (i32, i32) {
    %c0_i32 = arith.constant 0 : i32
    %c0_i32_0 = arith.constant 0 : i32
    return %arg0, %c0_i32 : i32, i32
  }
}

module attributes {stable_mosaic.version = 11 : i64} {
  func.func @_conv_bn_act_kernel(%arg0: i32, %arg1: i32, %arg2: memref<1x32x24xbf16, #tpu.memory_space<vmem>>, %arg3: memref<1x24x128xbf16, #tpu.memory_space<vmem>>, %arg4: memref<1x128xf32, #tpu.memory_space<vmem>>, %arg5: memref<32x128xbf16, #tpu.memory_space<vmem>>, %arg6: memref<32x128xf32, #tpu.memory_space<vmem>>) attributes {dimension_semantics = [#tpu.dimension_semantics<parallel>, #tpu.dimension_semantics<arbitrary>], iteration_bounds = array<i64: 1, 9>, scalar_prefetch = 0 : i64, scratch_operands = 1 : i64, tpu.core_type = #tpu.core_type<tc>, window_params = [{transform_indices = @transform_0, window_bounds = array<i64: 1, 32, 24>}, {transform_indices = @transform_1, window_bounds = array<i64: 1, 24, 128>}, {pipeline_mode = #tpu.pipeline_mode<synchronous>, transform_indices = @transform_2, window_bounds = array<i64: 1, 128>}, {transform_indices = @transform_3, window_bounds = array<i64: 32, 128>}]} {
    %c0_i32 = arith.constant 0 : i32
    %0 = arith.cmpi eq, %arg1, %c0_i32 : i32
    %1 = arith.extui %0 : i1 to i32
    %c0_i32_0 = arith.constant 0 : i32
    %2 = arith.cmpi ne, %1, %c0_i32_0 : i32
    scf.if %2 {
      %cst_11 = arith.constant 0.000000e+00 : f32
      %14 = vector.broadcast %cst_11 : f32 to vector<32x128xf32>
      %c0_12 = arith.constant 0 : index
      %c0_13 = arith.constant 0 : index
      %15 = vector.load %arg6[%c0_12, %c0_13] : memref<32x128xf32, #tpu.memory_space<vmem>>, vector<32x128xf32>
      tpu.vector_store %arg6[%c0_12, %c0_13], %14 {strides = array<i32>} : memref<32x128xf32, #tpu.memory_space<vmem>>, vector<32x128xf32>,
    } else {
    }
    %c0 = arith.constant 0 : index
    %c0_1 = arith.constant 0 : index
    %3 = vector.load %arg6[%c0, %c0_1] : memref<32x128xf32, #tpu.memory_space<vmem>>, vector<32x128xf32>
    %c0_2 = arith.constant 0 : index
    %c0_3 = arith.constant 0 : index
    %c0_4 = arith.constant 0 : index
    %4 = vector.load %arg2[%c0_2, %c0_3, %c0_4] : memref<1x32x24xbf16, #tpu.memory_space<vmem>>, vector<1x32x24xbf16>
    %5 = vector.shape_cast %4 : vector<1x32x24xbf16> to vector<32x24xbf16>
    %c0_5 = arith.constant 0 : index
    %c0_6 = arith.constant 0 : index
    %c0_7 = arith.constant 0 : index
    %6 = vector.load %arg3[%c0_5, %c0_6, %c0_7] : memref<1x24x128xbf16, #tpu.memory_space<vmem>>, vector<1x24x128xbf16>
    %7 = vector.shape_cast %6 : vector<1x24x128xbf16> to vector<24x128xbf16>
    %cst = arith.constant dense<0.000000e+00> : vector<32x128xf32>
    %8 = tpu.matmul %5, %7, %cst {dimension_numbers = #tpu.dot_dimension_numbers<[1], [0], [0], [1], [0, 0, 1, 1], [], []>} : vector<32x24xbf16>, vector<24x128xbf16>, vector<32x128xf32> -> vector<32x128xf32>
    %9 = arith.addf %3, %8 : vector<32x128xf32>
    %c0_8 = arith.constant 0 : index
    %c0_9 = arith.constant 0 : index
    %10 = vector.load %arg6[%c0_8, %c0_9] : memref<32x128xf32, #tpu.memory_space<vmem>>, vector<32x128xf32>
    tpu.vector_store %arg6[%c0_8, %c0_9], %9 {strides = array<i32>} : memref<32x128xf32, #tpu.memory_space<vmem>>, vector<32x128xf32>,
    %c8_i32 = arith.constant 8 : i32
    %11 = arith.cmpi eq, %arg1, %c8_i32 : i32
    %12 = arith.extui %11 : i1 to i32
    %c0_i32_10 = arith.constant 0 : i32
    %13 = arith.cmpi ne, %12, %c0_i32_10 : i32
    scf.if %13 {
      %c0_11 = arith.constant 0 : index
      %c0_12 = arith.constant 0 : index
      %14 = vector.load %arg6[%c0_11, %c0_12] : memref<32x128xf32, #tpu.memory_space<vmem>>, vector<32x128xf32>
      %c0_13 = arith.constant 0 : index
      %c0_14 = arith.constant 0 : index
      %15 = vector.load %arg4[%c0_13, %c0_14] : memref<1x128xf32, #tpu.memory_space<vmem>>, vector<1x128xf32>
      %16 = vector.broadcast %15 : vector<1x128xf32> to vector<32x128xf32>
      %17 = arith.addf %14, %16 : vector<32x128xf32>
      %cst_15 = arith.constant 0.000000e+00 : f32
      %18 = vector.broadcast %cst_15 : f32 to vector<32x128xf32>
      %19 = arith.maximumf %17, %18 : vector<32x128xf32>
      %20 = arith.truncf %19 : vector<32x128xf32> to vector<32x128xbf16>
      %c0_16 = arith.constant 0 : index
      %c0_17 = arith.constant 0 : index
      %21 = vector.load %arg5[%c0_16, %c0_17] : memref<32x128xbf16, #tpu.memory_space<vmem>>, vector<32x128xbf16>
      tpu.vector_store %arg5[%c0_16, %c0_17], %20 {strides = array<i32>} : memref<32x128xbf16, #tpu.memory_space<vmem>>, vector<32x128xbf16>,
    } else {
    }
    return
  }
  func.func @transform_0(%arg0: i32, %arg1: i32) -> (i32, i32, i32) {
    %c0_i32 = arith.constant 0 : i32
    %c0_i32_0 = arith.constant 0 : i32
    return %arg1, %arg0, %c0_i32 : i32, i32, i32
  }
  func.func @transform_1(%arg0: i32, %arg1: i32) -> (i32, i32, i32) {
    %c0_i32 = arith.constant 0 : i32
    %c0_i32_0 = arith.constant 0 : i32
    %c0_i32_1 = arith.constant 0 : i32
    return %arg1, %c0_i32, %c0_i32_0 : i32, i32, i32
  }
  func.func @transform_2(%arg0: i32, %arg1: i32) -> (i32, i32) {
    %c0_i32 = arith.constant 0 : i32
    %c0_i32_0 = arith.constant 0 : i32
    %c0_i32_1 = arith.constant 0 : i32
    return %c0_i32, %c0_i32_0 : i32, i32
  }
  func.func @transform_3(%arg0: i32, %arg1: i32) -> (i32, i32) {
    %c0_i32 = arith.constant 0 : i32
    %c0_i32_0 = arith.constant 0 : i32
    return %arg0, %c0_i32 : i32, i32
  }
}

module attributes {stable_mosaic.version = 11 : i64} {
  func.func @_conv_bn_act_kernel(%arg0: i32, %arg1: i32, %arg2: memref<1x32x32xbf16, #tpu.memory_space<vmem>>, %arg3: memref<1x32x128xbf16, #tpu.memory_space<vmem>>, %arg4: memref<1x128xf32, #tpu.memory_space<vmem>>, %arg5: memref<32x128xbf16, #tpu.memory_space<vmem>>, %arg6: memref<32x128xf32, #tpu.memory_space<vmem>>) attributes {dimension_semantics = [#tpu.dimension_semantics<parallel>, #tpu.dimension_semantics<arbitrary>], iteration_bounds = array<i64: 1, 9>, scalar_prefetch = 0 : i64, scratch_operands = 1 : i64, tpu.core_type = #tpu.core_type<tc>, window_params = [{transform_indices = @transform_0, window_bounds = array<i64: 1, 32, 32>}, {transform_indices = @transform_1, window_bounds = array<i64: 1, 32, 128>}, {pipeline_mode = #tpu.pipeline_mode<synchronous>, transform_indices = @transform_2, window_bounds = array<i64: 1, 128>}, {transform_indices = @transform_3, window_bounds = array<i64: 32, 128>}]} {
    %c0_i32 = arith.constant 0 : i32
    %0 = arith.cmpi eq, %arg1, %c0_i32 : i32
    %1 = arith.extui %0 : i1 to i32
    %c0_i32_0 = arith.constant 0 : i32
    %2 = arith.cmpi ne, %1, %c0_i32_0 : i32
    scf.if %2 {
      %cst_11 = arith.constant 0.000000e+00 : f32
      %14 = vector.broadcast %cst_11 : f32 to vector<32x128xf32>
      %c0_12 = arith.constant 0 : index
      %c0_13 = arith.constant 0 : index
      %15 = vector.load %arg6[%c0_12, %c0_13] : memref<32x128xf32, #tpu.memory_space<vmem>>, vector<32x128xf32>
      tpu.vector_store %arg6[%c0_12, %c0_13], %14 {strides = array<i32>} : memref<32x128xf32, #tpu.memory_space<vmem>>, vector<32x128xf32>,
    } else {
    }
    %c0 = arith.constant 0 : index
    %c0_1 = arith.constant 0 : index
    %3 = vector.load %arg6[%c0, %c0_1] : memref<32x128xf32, #tpu.memory_space<vmem>>, vector<32x128xf32>
    %c0_2 = arith.constant 0 : index
    %c0_3 = arith.constant 0 : index
    %c0_4 = arith.constant 0 : index
    %4 = vector.load %arg2[%c0_2, %c0_3, %c0_4] : memref<1x32x32xbf16, #tpu.memory_space<vmem>>, vector<1x32x32xbf16>
    %5 = vector.shape_cast %4 : vector<1x32x32xbf16> to vector<32x32xbf16>
    %c0_5 = arith.constant 0 : index
    %c0_6 = arith.constant 0 : index
    %c0_7 = arith.constant 0 : index
    %6 = vector.load %arg3[%c0_5, %c0_6, %c0_7] : memref<1x32x128xbf16, #tpu.memory_space<vmem>>, vector<1x32x128xbf16>
    %7 = vector.shape_cast %6 : vector<1x32x128xbf16> to vector<32x128xbf16>
    %cst = arith.constant dense<0.000000e+00> : vector<32x128xf32>
    %8 = tpu.matmul %5, %7, %cst {dimension_numbers = #tpu.dot_dimension_numbers<[1], [0], [0], [1], [0, 0, 1, 1], [], []>} : vector<32x32xbf16>, vector<32x128xbf16>, vector<32x128xf32> -> vector<32x128xf32>
    %9 = arith.addf %3, %8 : vector<32x128xf32>
    %c0_8 = arith.constant 0 : index
    %c0_9 = arith.constant 0 : index
    %10 = vector.load %arg6[%c0_8, %c0_9] : memref<32x128xf32, #tpu.memory_space<vmem>>, vector<32x128xf32>
    tpu.vector_store %arg6[%c0_8, %c0_9], %9 {strides = array<i32>} : memref<32x128xf32, #tpu.memory_space<vmem>>, vector<32x128xf32>,
    %c8_i32 = arith.constant 8 : i32
    %11 = arith.cmpi eq, %arg1, %c8_i32 : i32
    %12 = arith.extui %11 : i1 to i32
    %c0_i32_10 = arith.constant 0 : i32
    %13 = arith.cmpi ne, %12, %c0_i32_10 : i32
    scf.if %13 {
      %c0_11 = arith.constant 0 : index
      %c0_12 = arith.constant 0 : index
      %14 = vector.load %arg6[%c0_11, %c0_12] : memref<32x128xf32, #tpu.memory_space<vmem>>, vector<32x128xf32>
      %c0_13 = arith.constant 0 : index
      %c0_14 = arith.constant 0 : index
      %15 = vector.load %arg4[%c0_13, %c0_14] : memref<1x128xf32, #tpu.memory_space<vmem>>, vector<1x128xf32>
      %16 = vector.broadcast %15 : vector<1x128xf32> to vector<32x128xf32>
      %17 = arith.addf %14, %16 : vector<32x128xf32>
      %cst_15 = arith.constant 0.000000e+00 : f32
      %18 = vector.broadcast %cst_15 : f32 to vector<32x128xf32>
      %19 = arith.maximumf %17, %18 : vector<32x128xf32>
      %20 = arith.truncf %19 : vector<32x128xf32> to vector<32x128xbf16>
      %c0_16 = arith.constant 0 : index
      %c0_17 = arith.constant 0 : index
      %21 = vector.load %arg5[%c0_16, %c0_17] : memref<32x128xbf16, #tpu.memory_space<vmem>>, vector<32x128xbf16>
      tpu.vector_store %arg5[%c0_16, %c0_17], %20 {strides = array<i32>} : memref<32x128xbf16, #tpu.memory_space<vmem>>, vector<32x128xbf16>,
    } else {
    }
    return
  }
  func.func @transform_0(%arg0: i32, %arg1: i32) -> (i32, i32, i32) {
    %c0_i32 = arith.constant 0 : i32
    %c0_i32_0 = arith.constant 0 : i32
    return %arg1, %arg0, %c0_i32 : i32, i32, i32
  }
  func.func @transform_1(%arg0: i32, %arg1: i32) -> (i32, i32, i32) {
    %c0_i32 = arith.constant 0 : i32
    %c0_i32_0 = arith.constant 0 : i32
    %c0_i32_1 = arith.constant 0 : i32
    return %arg1, %c0_i32, %c0_i32_0 : i32, i32, i32
  }
  func.func @transform_2(%arg0: i32, %arg1: i32) -> (i32, i32) {
    %c0_i32 = arith.constant 0 : i32
    %c0_i32_0 = arith.constant 0 : i32
    %c0_i32_1 = arith.constant 0 : i32
    return %c0_i32, %c0_i32_0 : i32, i32
  }
  func.func @transform_3(%arg0: i32, %arg1: i32) -> (i32, i32) {
    %c0_i32 = arith.constant 0 : i32
    %c0_i32_0 = arith.constant 0 : i32
    return %arg0, %c0_i32 : i32, i32
  }
}

module attributes {stable_mosaic.version = 11 : i64} {
  func.func @_conv_bn_act_kernel(%arg0: i32, %arg1: i32, %arg2: memref<1x32x16xbf16, #tpu.memory_space<vmem>>, %arg3: memref<1x16x128xbf16, #tpu.memory_space<vmem>>, %arg4: memref<1x128xf32, #tpu.memory_space<vmem>>, %arg5: memref<32x128xbf16, #tpu.memory_space<vmem>>, %arg6: memref<32x128xf32, #tpu.memory_space<vmem>>) attributes {dimension_semantics = [#tpu.dimension_semantics<parallel>, #tpu.dimension_semantics<arbitrary>], iteration_bounds = array<i64: 1, 9>, scalar_prefetch = 0 : i64, scratch_operands = 1 : i64, tpu.core_type = #tpu.core_type<tc>, window_params = [{transform_indices = @transform_0, window_bounds = array<i64: 1, 32, 16>}, {transform_indices = @transform_1, window_bounds = array<i64: 1, 16, 128>}, {pipeline_mode = #tpu.pipeline_mode<synchronous>, transform_indices = @transform_2, window_bounds = array<i64: 1, 128>}, {transform_indices = @transform_3, window_bounds = array<i64: 32, 128>}]} {
    %c0_i32 = arith.constant 0 : i32
    %0 = arith.cmpi eq, %arg1, %c0_i32 : i32
    %1 = arith.extui %0 : i1 to i32
    %c0_i32_0 = arith.constant 0 : i32
    %2 = arith.cmpi ne, %1, %c0_i32_0 : i32
    scf.if %2 {
      %cst_11 = arith.constant 0.000000e+00 : f32
      %14 = vector.broadcast %cst_11 : f32 to vector<32x128xf32>
      %c0_12 = arith.constant 0 : index
      %c0_13 = arith.constant 0 : index
      %15 = vector.load %arg6[%c0_12, %c0_13] : memref<32x128xf32, #tpu.memory_space<vmem>>, vector<32x128xf32>
      tpu.vector_store %arg6[%c0_12, %c0_13], %14 {strides = array<i32>} : memref<32x128xf32, #tpu.memory_space<vmem>>, vector<32x128xf32>,
    } else {
    }
    %c0 = arith.constant 0 : index
    %c0_1 = arith.constant 0 : index
    %3 = vector.load %arg6[%c0, %c0_1] : memref<32x128xf32, #tpu.memory_space<vmem>>, vector<32x128xf32>
    %c0_2 = arith.constant 0 : index
    %c0_3 = arith.constant 0 : index
    %c0_4 = arith.constant 0 : index
    %4 = vector.load %arg2[%c0_2, %c0_3, %c0_4] : memref<1x32x16xbf16, #tpu.memory_space<vmem>>, vector<1x32x16xbf16>
    %5 = vector.shape_cast %4 : vector<1x32x16xbf16> to vector<32x16xbf16>
    %c0_5 = arith.constant 0 : index
    %c0_6 = arith.constant 0 : index
    %c0_7 = arith.constant 0 : index
    %6 = vector.load %arg3[%c0_5, %c0_6, %c0_7] : memref<1x16x128xbf16, #tpu.memory_space<vmem>>, vector<1x16x128xbf16>
    %7 = vector.shape_cast %6 : vector<1x16x128xbf16> to vector<16x128xbf16>
    %cst = arith.constant dense<0.000000e+00> : vector<32x128xf32>
    %8 = tpu.matmul %5, %7, %cst {dimension_numbers = #tpu.dot_dimension_numbers<[1], [0], [0], [1], [0, 0, 1, 1], [], []>} : vector<32x16xbf16>, vector<16x128xbf16>, vector<32x128xf32> -> vector<32x128xf32>
    %9 = arith.addf %3, %8 : vector<32x128xf32>
    %c0_8 = arith.constant 0 : index
    %c0_9 = arith.constant 0 : index
    %10 = vector.load %arg6[%c0_8, %c0_9] : memref<32x128xf32, #tpu.memory_space<vmem>>, vector<32x128xf32>
    tpu.vector_store %arg6[%c0_8, %c0_9], %9 {strides = array<i32>} : memref<32x128xf32, #tpu.memory_space<vmem>>, vector<32x128xf32>,
    %c8_i32 = arith.constant 8 : i32
    %11 = arith.cmpi eq, %arg1, %c8_i32 : i32
    %12 = arith.extui %11 : i1 to i32
    %c0_i32_10 = arith.constant 0 : i32
    %13 = arith.cmpi ne, %12, %c0_i32_10 : i32
    scf.if %13 {
      %c0_11 = arith.constant 0 : index
      %c0_12 = arith.constant 0 : index
      %14 = vector.load %arg6[%c0_11, %c0_12] : memref<32x128xf32, #tpu.memory_space<vmem>>, vector<32x128xf32>
      %c0_13 = arith.constant 0 : index
      %c0_14 = arith.constant 0 : index
      %15 = vector.load %arg4[%c0_13, %c0_14] : memref<1x128xf32, #tpu.memory_space<vmem>>, vector<1x128xf32>
      %16 = vector.broadcast %15 : vector<1x128xf32> to vector<32x128xf32>
      %17 = arith.addf %14, %16 : vector<32x128xf32>
      %cst_15 = arith.constant 0.000000e+00 : f32
      %18 = vector.broadcast %cst_15 : f32 to vector<32x128xf32>
      %19 = arith.maximumf %17, %18 : vector<32x128xf32>
      %20 = arith.truncf %19 : vector<32x128xf32> to vector<32x128xbf16>
      %c0_16 = arith.constant 0 : index
      %c0_17 = arith.constant 0 : index
      %21 = vector.load %arg5[%c0_16, %c0_17] : memref<32x128xbf16, #tpu.memory_space<vmem>>, vector<32x128xbf16>
      tpu.vector_store %arg5[%c0_16, %c0_17], %20 {strides = array<i32>} : memref<32x128xbf16, #tpu.memory_space<vmem>>, vector<32x128xbf16>,
    } else {
    }
    return
  }
  func.func @transform_0(%arg0: i32, %arg1: i32) -> (i32, i32, i32) {
    %c0_i32 = arith.constant 0 : i32
    %c0_i32_0 = arith.constant 0 : i32
    return %arg1, %arg0, %c0_i32 : i32, i32, i32
  }
  func.func @transform_1(%arg0: i32, %arg1: i32) -> (i32, i32, i32) {
    %c0_i32 = arith.constant 0 : i32
    %c0_i32_0 = arith.constant 0 : i32
    %c0_i32_1 = arith.constant 0 : i32
    return %arg1, %c0_i32, %c0_i32_0 : i32, i32, i32
  }
  func.func @transform_2(%arg0: i32, %arg1: i32) -> (i32, i32) {
    %c0_i32 = arith.constant 0 : i32
    %c0_i32_0 = arith.constant 0 : i32
    %c0_i32_1 = arith.constant 0 : i32
    return %c0_i32, %c0_i32_0 : i32, i32
  }
  func.func @transform_3(%arg0: i32, %arg1: i32) -> (i32, i32) {
    %c0_i32 = arith.constant 0 : i32
    %c0_i32_0 = arith.constant 0 : i32
    return %arg0, %c0_i32 : i32, i32
  }
}

module attributes {stable_mosaic.version = 11 : i64} {
  func.func @_head_kernel(%arg0: i32, %arg1: memref<8x16x32xbf16, #tpu.memory_space<vmem>>, %arg2: memref<32x256xbf16, #tpu.memory_space<vmem>>, %arg3: memref<1x256xf32, #tpu.memory_space<vmem>>, %arg4: memref<8x256xf32, #tpu.memory_space<vmem>>) attributes {dimension_semantics = [#tpu.dimension_semantics<parallel>], iteration_bounds = array<i64: 4>, scalar_prefetch = 0 : i64, scratch_operands = 0 : i64, tpu.core_type = #tpu.core_type<tc>, window_params = [{pipeline_mode = #tpu.pipeline_mode<synchronous>, transform_indices = @transform_0, window_bounds = array<i64: 8, 16, 32>}, {transform_indices = @transform_1, window_bounds = array<i64: 32, 256>}, {transform_indices = @transform_2, window_bounds = array<i64: 1, 256>}, {transform_indices = @transform_3, window_bounds = array<i64: 8, 256>}]} {
    %c0 = arith.constant 0 : index
    %c0_0 = arith.constant 0 : index
    %c0_1 = arith.constant 0 : index
    %0 = vector.load %arg1[%c0, %c0_0, %c0_1] : memref<8x16x32xbf16, #tpu.memory_space<vmem>>, vector<8x16x32xbf16>
    %1 = arith.extf %0 : vector<8x16x32xbf16> to vector<8x16x32xf32>
    %cst = arith.constant dense<0.000000e+00> : vector<8x32xf32>
    %2 = vector.multi_reduction <add>, %1, %cst [1] : vector<8x16x32xf32> to vector<8x32xf32>
    %cst_2 = arith.constant 6.250000e-02 : f32
    %3 = vector.broadcast %cst_2 : f32 to vector<8x32xf32>
    %4 = arith.mulf %2, %3 : vector<8x32xf32>
    %5 = arith.truncf %4 : vector<8x32xf32> to vector<8x32xbf16>
    %c0_3 = arith.constant 0 : index
    %c0_4 = arith.constant 0 : index
    %6 = vector.load %arg2[%c0_3, %c0_4] : memref<32x256xbf16, #tpu.memory_space<vmem>>, vector<32x256xbf16>
    %cst_5 = arith.constant dense<0.000000e+00> : vector<8x256xf32>
    %7 = tpu.matmul %5, %6, %cst_5 {dimension_numbers = #tpu.dot_dimension_numbers<[1], [0], [0], [1], [0, 0, 1, 1], [], []>} : vector<8x32xbf16>, vector<32x256xbf16>, vector<8x256xf32> -> vector<8x256xf32>
    %c0_6 = arith.constant 0 : index
    %c0_7 = arith.constant 0 : index
    %8 = vector.load %arg3[%c0_6, %c0_7] : memref<1x256xf32, #tpu.memory_space<vmem>>, vector<1x256xf32>
    %9 = vector.broadcast %8 : vector<1x256xf32> to vector<8x256xf32>
    %10 = arith.addf %7, %9 : vector<8x256xf32>
    %c0_8 = arith.constant 0 : index
    %c0_9 = arith.constant 0 : index
    %11 = vector.load %arg4[%c0_8, %c0_9] : memref<8x256xf32, #tpu.memory_space<vmem>>, vector<8x256xf32>
    tpu.vector_store %arg4[%c0_8, %c0_9], %10 {strides = array<i32>} : memref<8x256xf32, #tpu.memory_space<vmem>>, vector<8x256xf32>,
    return
  }
  func.func @transform_0(%arg0: i32) -> (i32, i32, i32) {
    %c0_i32 = arith.constant 0 : i32
    %c0_i32_0 = arith.constant 0 : i32
    %c0_i32_1 = arith.constant 0 : i32
    %c0_i32_2 = arith.constant 0 : i32
    return %c0_i32, %c0_i32_0, %c0_i32_1 : i32, i32, i32
  }
  func.func @transform_1(%arg0: i32) -> (i32, i32) {
    %c0_i32 = arith.constant 0 : i32
    %c0_i32_0 = arith.constant 0 : i32
    return %c0_i32, %arg0 : i32, i32
  }
  func.func @transform_2(%arg0: i32) -> (i32, i32) {
    %c0_i32 = arith.constant 0 : i32
    %c0_i32_0 = arith.constant 0 : i32
    return %c0_i32, %arg0 : i32, i32
  }
  func.func @transform_3(%arg0: i32) -> (i32, i32) {
    %c0_i32 = arith.constant 0 : i32
    %c0_i32_0 = arith.constant 0 : i32
    return %c0_i32, %arg0 : i32, i32
  }
}

module attributes {stable_mosaic.version = 11 : i64} {
  func.func @_conv_bn_act_kernel(%arg0: i32, %arg1: i32, %arg2: memref<1x32x40xbf16, #tpu.memory_space<vmem>>, %arg3: memref<1x40x128xbf16, #tpu.memory_space<vmem>>, %arg4: memref<1x128xf32, #tpu.memory_space<vmem>>, %arg5: memref<32x128xbf16, #tpu.memory_space<vmem>>, %arg6: memref<32x128xf32, #tpu.memory_space<vmem>>) attributes {dimension_semantics = [#tpu.dimension_semantics<parallel>, #tpu.dimension_semantics<arbitrary>], iteration_bounds = array<i64: 1, 9>, scalar_prefetch = 0 : i64, scratch_operands = 1 : i64, tpu.core_type = #tpu.core_type<tc>, window_params = [{transform_indices = @transform_0, window_bounds = array<i64: 1, 32, 40>}, {transform_indices = @transform_1, window_bounds = array<i64: 1, 40, 128>}, {pipeline_mode = #tpu.pipeline_mode<synchronous>, transform_indices = @transform_2, window_bounds = array<i64: 1, 128>}, {transform_indices = @transform_3, window_bounds = array<i64: 32, 128>}]} {
    %c0_i32 = arith.constant 0 : i32
    %0 = arith.cmpi eq, %arg1, %c0_i32 : i32
    %1 = arith.extui %0 : i1 to i32
    %c0_i32_0 = arith.constant 0 : i32
    %2 = arith.cmpi ne, %1, %c0_i32_0 : i32
    scf.if %2 {
      %cst_11 = arith.constant 0.000000e+00 : f32
      %14 = vector.broadcast %cst_11 : f32 to vector<32x128xf32>
      %c0_12 = arith.constant 0 : index
      %c0_13 = arith.constant 0 : index
      %15 = vector.load %arg6[%c0_12, %c0_13] : memref<32x128xf32, #tpu.memory_space<vmem>>, vector<32x128xf32>
      tpu.vector_store %arg6[%c0_12, %c0_13], %14 {strides = array<i32>} : memref<32x128xf32, #tpu.memory_space<vmem>>, vector<32x128xf32>,
    } else {
    }
    %c0 = arith.constant 0 : index
    %c0_1 = arith.constant 0 : index
    %3 = vector.load %arg6[%c0, %c0_1] : memref<32x128xf32, #tpu.memory_space<vmem>>, vector<32x128xf32>
    %c0_2 = arith.constant 0 : index
    %c0_3 = arith.constant 0 : index
    %c0_4 = arith.constant 0 : index
    %4 = vector.load %arg2[%c0_2, %c0_3, %c0_4] : memref<1x32x40xbf16, #tpu.memory_space<vmem>>, vector<1x32x40xbf16>
    %5 = vector.shape_cast %4 : vector<1x32x40xbf16> to vector<32x40xbf16>
    %c0_5 = arith.constant 0 : index
    %c0_6 = arith.constant 0 : index
    %c0_7 = arith.constant 0 : index
    %6 = vector.load %arg3[%c0_5, %c0_6, %c0_7] : memref<1x40x128xbf16, #tpu.memory_space<vmem>>, vector<1x40x128xbf16>
    %7 = vector.shape_cast %6 : vector<1x40x128xbf16> to vector<40x128xbf16>
    %cst = arith.constant dense<0.000000e+00> : vector<32x128xf32>
    %8 = tpu.matmul %5, %7, %cst {dimension_numbers = #tpu.dot_dimension_numbers<[1], [0], [0], [1], [0, 0, 1, 1], [], []>} : vector<32x40xbf16>, vector<40x128xbf16>, vector<32x128xf32> -> vector<32x128xf32>
    %9 = arith.addf %3, %8 : vector<32x128xf32>
    %c0_8 = arith.constant 0 : index
    %c0_9 = arith.constant 0 : index
    %10 = vector.load %arg6[%c0_8, %c0_9] : memref<32x128xf32, #tpu.memory_space<vmem>>, vector<32x128xf32>
    tpu.vector_store %arg6[%c0_8, %c0_9], %9 {strides = array<i32>} : memref<32x128xf32, #tpu.memory_space<vmem>>, vector<32x128xf32>,
    %c8_i32 = arith.constant 8 : i32
    %11 = arith.cmpi eq, %arg1, %c8_i32 : i32
    %12 = arith.extui %11 : i1 to i32
    %c0_i32_10 = arith.constant 0 : i32
    %13 = arith.cmpi ne, %12, %c0_i32_10 : i32
    scf.if %13 {
      %c0_11 = arith.constant 0 : index
      %c0_12 = arith.constant 0 : index
      %14 = vector.load %arg6[%c0_11, %c0_12] : memref<32x128xf32, #tpu.memory_space<vmem>>, vector<32x128xf32>
      %c0_13 = arith.constant 0 : index
      %c0_14 = arith.constant 0 : index
      %15 = vector.load %arg4[%c0_13, %c0_14] : memref<1x128xf32, #tpu.memory_space<vmem>>, vector<1x128xf32>
      %16 = vector.broadcast %15 : vector<1x128xf32> to vector<32x128xf32>
      %17 = arith.addf %14, %16 : vector<32x128xf32>
      %cst_15 = arith.constant 0.000000e+00 : f32
      %18 = vector.broadcast %cst_15 : f32 to vector<32x128xf32>
      %19 = arith.maximumf %17, %18 : vector<32x128xf32>
      %20 = arith.truncf %19 : vector<32x128xf32> to vector<32x128xbf16>
      %c0_16 = arith.constant 0 : index
      %c0_17 = arith.constant 0 : index
      %21 = vector.load %arg5[%c0_16, %c0_17] : memref<32x128xbf16, #tpu.memory_space<vmem>>, vector<32x128xbf16>
      tpu.vector_store %arg5[%c0_16, %c0_17], %20 {strides = array<i32>} : memref<32x128xbf16, #tpu.memory_space<vmem>>, vector<32x128xbf16>,
    } else {
    }
    return
  }
  func.func @transform_0(%arg0: i32, %arg1: i32) -> (i32, i32, i32) {
    %c0_i32 = arith.constant 0 : i32
    %c0_i32_0 = arith.constant 0 : i32
    return %arg1, %arg0, %c0_i32 : i32, i32, i32
  }
  func.func @transform_1(%arg0: i32, %arg1: i32) -> (i32, i32, i32) {
    %c0_i32 = arith.constant 0 : i32
    %c0_i32_0 = arith.constant 0 : i32
    %c0_i32_1 = arith.constant 0 : i32
    return %arg1, %c0_i32, %c0_i32_0 : i32, i32, i32
  }
  func.func @transform_2(%arg0: i32, %arg1: i32) -> (i32, i32) {
    %c0_i32 = arith.constant 0 : i32
    %c0_i32_0 = arith.constant 0 : i32
    %c0_i32_1 = arith.constant 0 : i32
    return %c0_i32, %c0_i32_0 : i32, i32
  }
  func.func @transform_3(%arg0: i32, %arg1: i32) -> (i32, i32) {
    %c0_i32 = arith.constant 0 : i32
    %c0_i32_0 = arith.constant 0 : i32
    return %arg0, %c0_i32 : i32, i32
  }
}

module attributes {stable_mosaic.version = 11 : i64} {
  func.func @_conv_bn_act_kernel(%arg0: i32, %arg1: i32, %arg2: memref<1x32x32xbf16, #tpu.memory_space<vmem>>, %arg3: memref<1x32x128xbf16, #tpu.memory_space<vmem>>, %arg4: memref<1x128xf32, #tpu.memory_space<vmem>>, %arg5: memref<32x128xbf16, #tpu.memory_space<vmem>>, %arg6: memref<32x128xf32, #tpu.memory_space<vmem>>) attributes {dimension_semantics = [#tpu.dimension_semantics<parallel>, #tpu.dimension_semantics<arbitrary>], iteration_bounds = array<i64: 1, 1>, scalar_prefetch = 0 : i64, scratch_operands = 1 : i64, tpu.core_type = #tpu.core_type<tc>, window_params = [{transform_indices = @transform_0, window_bounds = array<i64: 1, 32, 32>}, {transform_indices = @transform_1, window_bounds = array<i64: 1, 32, 128>}, {pipeline_mode = #tpu.pipeline_mode<synchronous>, transform_indices = @transform_2, window_bounds = array<i64: 1, 128>}, {transform_indices = @transform_3, window_bounds = array<i64: 32, 128>}]} {
    %c0_i32 = arith.constant 0 : i32
    %0 = arith.cmpi eq, %arg1, %c0_i32 : i32
    %1 = arith.extui %0 : i1 to i32
    %c0_i32_0 = arith.constant 0 : i32
    %2 = arith.cmpi ne, %1, %c0_i32_0 : i32
    scf.if %2 {
      %cst_12 = arith.constant 0.000000e+00 : f32
      %14 = vector.broadcast %cst_12 : f32 to vector<32x128xf32>
      %c0_13 = arith.constant 0 : index
      %c0_14 = arith.constant 0 : index
      %15 = vector.load %arg6[%c0_13, %c0_14] : memref<32x128xf32, #tpu.memory_space<vmem>>, vector<32x128xf32>
      tpu.vector_store %arg6[%c0_13, %c0_14], %14 {strides = array<i32>} : memref<32x128xf32, #tpu.memory_space<vmem>>, vector<32x128xf32>,
    } else {
    }
    %c0 = arith.constant 0 : index
    %c0_1 = arith.constant 0 : index
    %3 = vector.load %arg6[%c0, %c0_1] : memref<32x128xf32, #tpu.memory_space<vmem>>, vector<32x128xf32>
    %c0_2 = arith.constant 0 : index
    %c0_3 = arith.constant 0 : index
    %c0_4 = arith.constant 0 : index
    %4 = vector.load %arg2[%c0_2, %c0_3, %c0_4] : memref<1x32x32xbf16, #tpu.memory_space<vmem>>, vector<1x32x32xbf16>
    %5 = vector.shape_cast %4 : vector<1x32x32xbf16> to vector<32x32xbf16>
    %c0_5 = arith.constant 0 : index
    %c0_6 = arith.constant 0 : index
    %c0_7 = arith.constant 0 : index
    %6 = vector.load %arg3[%c0_5, %c0_6, %c0_7] : memref<1x32x128xbf16, #tpu.memory_space<vmem>>, vector<1x32x128xbf16>
    %7 = vector.shape_cast %6 : vector<1x32x128xbf16> to vector<32x128xbf16>
    %cst = arith.constant dense<0.000000e+00> : vector<32x128xf32>
    %8 = tpu.matmul %5, %7, %cst {dimension_numbers = #tpu.dot_dimension_numbers<[1], [0], [0], [1], [0, 0, 1, 1], [], []>} : vector<32x32xbf16>, vector<32x128xbf16>, vector<32x128xf32> -> vector<32x128xf32>
    %9 = arith.addf %3, %8 : vector<32x128xf32>
    %c0_8 = arith.constant 0 : index
    %c0_9 = arith.constant 0 : index
    %10 = vector.load %arg6[%c0_8, %c0_9] : memref<32x128xf32, #tpu.memory_space<vmem>>, vector<32x128xf32>
    tpu.vector_store %arg6[%c0_8, %c0_9], %9 {strides = array<i32>} : memref<32x128xf32, #tpu.memory_space<vmem>>, vector<32x128xf32>,
    %c0_i32_10 = arith.constant 0 : i32
    %11 = arith.cmpi eq, %arg1, %c0_i32_10 : i32
    %12 = arith.extui %11 : i1 to i32
    %c0_i32_11 = arith.constant 0 : i32
    %13 = arith.cmpi ne, %12, %c0_i32_11 : i32
    scf.if %13 {
      %c0_12 = arith.constant 0 : index
      %c0_13 = arith.constant 0 : index
      %14 = vector.load %arg6[%c0_12, %c0_13] : memref<32x128xf32, #tpu.memory_space<vmem>>, vector<32x128xf32>
      %c0_14 = arith.constant 0 : index
      %c0_15 = arith.constant 0 : index
      %15 = vector.load %arg4[%c0_14, %c0_15] : memref<1x128xf32, #tpu.memory_space<vmem>>, vector<1x128xf32>
      %16 = vector.broadcast %15 : vector<1x128xf32> to vector<32x128xf32>
      %17 = arith.addf %14, %16 : vector<32x128xf32>
      %cst_16 = arith.constant 0.000000e+00 : f32
      %18 = vector.broadcast %cst_16 : f32 to vector<32x128xf32>
      %19 = arith.maximumf %17, %18 : vector<32x128xf32>
      %20 = arith.truncf %19 : vector<32x128xf32> to vector<32x128xbf16>
      %c0_17 = arith.constant 0 : index
      %c0_18 = arith.constant 0 : index
      %21 = vector.load %arg5[%c0_17, %c0_18] : memref<32x128xbf16, #tpu.memory_space<vmem>>, vector<32x128xbf16>
      tpu.vector_store %arg5[%c0_17, %c0_18], %20 {strides = array<i32>} : memref<32x128xbf16, #tpu.memory_space<vmem>>, vector<32x128xbf16>,
    } else {
    }
    return
  }
  func.func @transform_0(%arg0: i32, %arg1: i32) -> (i32, i32, i32) {
    %c0_i32 = arith.constant 0 : i32
    %c0_i32_0 = arith.constant 0 : i32
    return %arg1, %arg0, %c0_i32 : i32, i32, i32
  }
  func.func @transform_1(%arg0: i32, %arg1: i32) -> (i32, i32, i32) {
    %c0_i32 = arith.constant 0 : i32
    %c0_i32_0 = arith.constant 0 : i32
    %c0_i32_1 = arith.constant 0 : i32
    return %arg1, %c0_i32, %c0_i32_0 : i32, i32, i32
  }
  func.func @transform_2(%arg0: i32, %arg1: i32) -> (i32, i32) {
    %c0_i32 = arith.constant 0 : i32
    %c0_i32_0 = arith.constant 0 : i32
    %c0_i32_1 = arith.constant 0 : i32
    return %c0_i32, %c0_i32_0 : i32, i32
  }
  func.func @transform_3(%arg0: i32, %arg1: i32) -> (i32, i32) {
    %c0_i32 = arith.constant 0 : i32
    %c0_i32_0 = arith.constant 0 : i32
    return %arg0, %c0_i32 : i32, i32
  }
}

</mosaic_0001>

<bundles_post_ra>
// kernel: _lambda_.15
= control target key start
LH: loop header
LB: loop body
LE: loop exit
PB: predicated region body
PF: predicated region fallthrough
CT: control target
= control target key end

     0   :  { %s1442_s12 = smov 0   ;;  %s1444_s13 = smov 0   ;;  %s1594_s0 = inlined_call_operand.vmem [shape: bf16[9,512,8], index: 0, kind: input, shape index: {}]   ;;  %s1595_s1 = inlined_call_operand.vmem [shape: bf16[9,8,128], index: 1, kind: input, shape index: {}]   ;;  %s1596_s2 = inlined_call_operand.vmem [shape: f32[1,128], index: 2, kind: input, shape index: {}]   ;;  %s1597_s3 = inlined_call_operand.vmem [shape: bf16[512,128], index: 3, kind: output, shape index: {}]  }
   0x1   :  { %s1446_s14 = smov 0   ;;  %s1448_s15 = smov 0  }
   0x2   :  { %s1450_s16 = smov 0  }
   0x3 LB: > { %s22_s17 = sadd.s32 1, %s1411_s14  ;;  %s25_s18 = sadd.s32 1, %s1415_s15  ;;  %s1419_s16 = sphi %s1450_s16, %s13_s16   ;;  %s1415_s15 = sphi %s1448_s15, %s1601_s15   ;;  %s1411_s14 = sphi %s1446_s14, %s1600_s14   ;;  %s1407_s13 = sphi %s1444_s13, %s1599_s13   ;;  %s1403_s12 = sphi %s1442_s12, %s1598_s12  }
   0x4   : > { %p23_p0 = scmp.ge.s32.totalorder %s22_s17, 9  ;;  %p1066_p1 = scmp.ge.s32.totalorder %s1419_s16, 1 }
   0x5   : > { %p165_p2 = scmp.lt.s32.totalorder %s1419_s16, 19 }
   0x6   : > { %s1603_s17 = smov (%p23_p0, %s22_s17), 0  ;;  %s1605_s18 = smov (!%p23_p0, %s25_s18), %s1415_s15 }
   0x7   : > { %p166_p3 = pnand %p1066_p1, %p165_p2  ;;  %p27_p4 = scmp.ge.s32.totalorder %s1605_s18, 2 }
   0x8   : > { %s1067_s19 = sshll.u32 (!%p166_p3), %s1407_s13, 5  ;;  %p198_p5 = scmp.lt.s32.totalorder (!%p166_p3), %s1403_s12, 8 }
   0x9   : > { %s1607_s18 = smov (%p27_p4, %s1605_s18), 0  ;;  %169 = sbr.rel (%p166_p3) target bundleno = 304 (0x130), region = 32 }
   0xa   : > { %p200_p6 = scmp.lt.s32.totalorder (!%p166_p3), %s1067_s19, 63  ;;  %p1073_p7 = scmp.ne.s32.totalorder (!%p166_p3), %s1403_s12, 0 }
   0xe   : > { %s199_s20 = scalar_select %p198_p5, %s1403_s12, 8 }
   0xf   : > { %s1609_s19 = smov (!%p200_p6, %s1067_s19), 63  ;;  %221 = sbr.rel (%p1073_p7) target bundleno = 37 (0x25), region = 36 }
  0x10   : > { %s1068_s21 = sshll.u32 %s199_s20, 6  ;;  %s1070_s22 = sshll.u32 %s199_s20, 2 }
  0x11   : > { %s203_s23 = sadd.s32 %s1068_s21, %s1609_s19  ;;  %s1479_s26 = scalar_lea.vmem %s1595_s1, %s1070_s22 }
  0x12   : > { %s1069_s27 = sshll.u32 %s203_s23, 2  ;;  %s1072_s28 = sshll.u32 %s1609_s19, 2 }
  0x13   : > { %s1484_s4 = scalar_lea.vmem %s1594_s0, %s1069_s27  ;;  %s1489_s7 = scalar_lea.vmem %s1597_s3, %s1072_s28 }
  0x14   : > { %v1421_v0 = vmov 0.0  }
  0x15   : > { %222 = vst [vmem:[#allocation2 + $0xb0] sm:$0xff] %v1421_v0  ;;  %223 = vst [vmem:[#allocation2] sm:$0xff] %v1421_v0 }
  0x16   : > { %224 = vst [vmem:[#allocation2 + $0xd8] sm:$0xff] %v1421_v0  ;;  %225 = vst [vmem:[#allocation2 + $0x18] sm:$0xff] %v1421_v0 }
  0x17   : > { %226 = vst [vmem:[#allocation2 + $0x50] sm:$0xff] %v1421_v0  ;;  %227 = vst [vmem:[#allocation2 + $0x68] sm:$0xff] %v1421_v0 }
  0x18   : > { %228 = vst [vmem:[#allocation2 + $0x30] sm:$0xff] %v1421_v0  ;;  %229 = vst [vmem:[#allocation2 + $0x48] sm:$0xff] %v1421_v0 }
  0x19   : > { %230 = vst [vmem:[#allocation2 + $0x80] sm:$0xff] %v1421_v0  ;;  %231 = vst [vmem:[#allocation2 + $0x88] sm:$0xff] %v1421_v0 }
  0x1a   : > { %232 = vst [vmem:[#allocation2 + $0xe8] sm:$0xff] %v1421_v0  ;;  %233 = vst [vmem:[#allocation2 + $0xb8] sm:$0xff] %v1421_v0 }
  0x1b   : > { %234 = vst [vmem:[#allocation2 + $0x60] sm:$0xff] %v1421_v0  ;;  %235 = vst [vmem:[#allocation2 + $0xf0] sm:$0xff] %v1421_v0 }
  0x1c   : > { %236 = vst [vmem:[#allocation2 + $0x8] sm:$0xff] %v1421_v0  ;;  %237 = vst [vmem:[#allocation2 + $0x78] sm:$0xff] %v1421_v0 }
  0x1d   : > { %238 = vst [vmem:[#allocation2 + $0x38] sm:$0xff] %v1421_v0  ;;  %239 = vst [vmem:[#allocation2 + $0x58] sm:$0xff] %v1421_v0 }
  0x1e   : > { %240 = vst [vmem:[#allocation2 + $0x40] sm:$0xff] %v1421_v0  ;;  %241 = vst [vmem:[#allocation2 + $0xc8] sm:$0xff] %v1421_v0 }
  0x1f   : > { %242 = vst [vmem:[#allocation2 + $0xe0] sm:$0xff] %v1421_v0  ;;  %243 = vst [vmem:[#allocation2 + $0x90] sm:$0xff] %v1421_v0 }
  0x20   : > { %244 = vst [vmem:[#allocation2 + $0x70] sm:$0xff] %v1421_v0  ;;  %245 = vst [vmem:[#allocation2 + $0xc0] sm:$0xff] %v1421_v0 }
  0x21   : > { %246 = vst [vmem:[#allocation2 + $0xa8] sm:$0xff] %v1421_v0  ;;  %247 = vst [vmem:[#allocation2 + $0xd0] sm:$0xff] %v1421_v0 }
  0x22   : > { %248 = vst [vmem:[#allocation2 + $0x10] sm:$0xff] %v1421_v0  ;;  %249 = vst [vmem:[#allocation2 + $0x28] sm:$0xff] %v1421_v0 }
  0x23   : > { %250 = vst [vmem:[#allocation2 + $0xa0] sm:$0xff] %v1421_v0  ;;  %251 = vst [vmem:[#allocation2 + $0xf8] sm:$0xff] %v1421_v0 }
  0x24   : > { %252 = vst [vmem:[#allocation2 + $0x20] sm:$0xff] %v1421_v0  ;;  %253 = vst [vmem:[#allocation2 + $0x98] sm:$0xff] %v1421_v0 }
  0x25 PF: > { %v318_v1 = vld [vmem:[%s1479_s26] sm:$0xf]  ;;  %vm448_vm0 = vcmask 1043456   ;;  %vm399_vm1 = vcmask 64512   ;;  %v1367_v5 = vld [vmem:[%s1484_s4 + $0x8] sm:$0xff]   ;;  %v1369_v7 = vld [vmem:[%s1484_s4 + $0x10] sm:$0xff]  }
  0x26   : > { %v1365_v2 = vld [vmem:[%s1484_s4] sm:$0xff]   ;;  %1322 = vmatprep.subr.msk.bf16.mxu0 %vm448_vm0, %v318_v1  ;;  %1323 = vmatprep.subr.msk.bf16.mxu1 %vm448_vm0, %v318_v1  ;;  %v450_v3 = vsel %vm448_vm0, %v318_v1, 0  ;;  %v1368_v6 = vld [vmem:[%s1484_s4 + $0x48] sm:$0xff]   ;;  %v1370_v8 = vld [vmem:[%s1484_s4 + $0x50] sm:$0xff]   ;;  %p1106_p8 = scmp.ne.s32.totalorder %s1403_s12, 8 }
  0x27   : > { %1287 = vmatpush3.bf16.msra.mxu0 %v450_v3  ;;  %1321 = vmatpush3.bf16.msra.mxu1 %v450_v3  ;;  %v1366_v4 = vld [vmem:[%s1484_s4 + $0x40] sm:$0xff]   ;;  %v1371_v9 = vld [vmem:[%s1484_s4 + $0x18] sm:$0xff]   ;;  %v1375_v13 = vld [vmem:[%s1484_s4 + $0x28] sm:$0xff]  }
  0x28   : > { %1288 = vmatprep.mubr.msk.bf16.mxu0 %vm399_vm1, %v1365_v2  ;;  %1304 = vmatprep.mubr.msk.bf16.mxu1 %vm399_vm1, %v1366_v4  ;;  %v1372_v10 = vld [vmem:[%s1484_s4 + $0x58] sm:$0xff]   ;;  %v1373_v11 = vld [vmem:[%s1484_s4 + $0x20] sm:$0xff]   ;;  %v1376_v14 = vld [vmem:[%s1484_s4 + $0x68] sm:$0xff]  }
  0x29   : > { %v1374_v12 = vld [vmem:[%s1484_s4 + $0x60] sm:$0xff]   ;;  %v1377_v15 = vld [vmem:[%s1484_s4 + $0x30] sm:$0xff]   ;;  %v1379_v17 = vld [vmem:[%s1484_s4 + $0x38] sm:$0xff]  }
  0x2a   : > { %1289 = vmatmul.mubr.msk.bf16.vlgmr.msra.gmra.mxu0 %vm399_vm1, %v1367_v5  ;;  %1305 = vmatmul.mubr.msk.bf16.vlgmr.msra.gmra.mxu1 %vm399_vm1, %v1368_v6  ;;  %v1378_v16 = vld [vmem:[%s1484_s4 + $0x70] sm:$0xff]   ;;  %v1380_v18 = vld [vmem:[%s1484_s4 + $0x78] sm:$0xff]   ;;  %v272_v20 = vld [vmem:[#allocation2 + $0x40] sm:$0xff] }
  0x2b   : > { %1292 = vmatprep.mubr.msk.bf16.mxu0 %vm399_vm1, %v1369_v7  ;;  %1308 = vmatprep.mubr.msk.bf16.mxu1 %vm399_vm1, %v1370_v8  ;;  %v256_v19 = vld [vmem:[#allocation2 + $0xd8] sm:$0xff]  ;;  %v254_v22 = vld [vmem:[#allocation2 + $0xb0] sm:$0xff]  ;;  %v273_v31 = vld [vmem:[#allocation2 + $0xc8] sm:$0xff] }
  0x2c   : > { %v270_v25 = vld [vmem:[#allocation2 + $0x38] sm:$0xff]  ;;  %v255_v34 = vld [vmem:[#allocation2] sm:$0xff]  ;;  %v260_v40 = vld [vmem:[#allocation2 + $0x30] sm:$0xff] }
  0x2d   : > { %v257_v28 = vld [vmem:[#allocation2 + $0x18] sm:$0xff]  ;;  %v276_v43 = vld [vmem:[#allocation2 + $0x70] sm:$0xff]  ;;  %v274_v49 = vld [vmem:[#allocation2 + $0xe0] sm:$0xff] }
  0x2e   : > { %v271_v37 = vld [vmem:[#allocation2 + $0x58] sm:$0xff]  ;;  %v258_v46 = vld [vmem:[#allocation2 + $0x50] sm:$0xff]  ;;  %v261_v52 = vld [vmem:[#allocation2 + $0x48] sm:$0xff] }
  0x2f   : > { %v277_v55 = vld [vmem:[#allocation2 + $0xc0] sm:$0xff]  ;;  %v259_v58 = vld [vmem:[#allocation2 + $0x68] sm:$0xff]  ;;  %v275_v61 = vld [vmem:[#allocation2 + $0x90] sm:$0xff] }
  0x30   : > { %v264_v0 = vld [vmem:[#allocation2 + $0xe8] sm:$0xff]  ;;  %v280_v3 = vld [vmem:[#allocation2 + $0x10] sm:$0xff]  ;;  %v262_v6 = vld [vmem:[#allocation2 + $0x80] sm:$0xff] }
  0x32   : > { %1293 = vmatmul.mubr.msk.bf16.gmra.mxu0 %vm399_vm1, %v1371_v9  ;;  %1309 = vmatmul.mubr.msk.bf16.gmra.mxu1 %vm399_vm1, %v1372_v10  ;;  %v278_v9 = vld [vmem:[#allocation2 + $0xa8] sm:$0xff] }
  0x33   : > { %1296 = vmatprep.mubr.msk.bf16.mxu0 %vm399_vm1, %v1373_v11  ;;  %1312 = vmatprep.mubr.msk.bf16.mxu1 %vm399_vm1, %v1374_v12  ;;  %v265_v12 = vld [vmem:[#allocation2 + $0xb8] sm:$0xff] }
  0x3a   : > { %1297 = vmatmul.mubr.msk.bf16.gmra.mxu0 %vm399_vm1, %v1375_v13  ;;  %1313 = vmatmul.mubr.msk.bf16.gmra.mxu1 %vm399_vm1, %v1376_v14 }
  0x3b   : > { %1300 = vmatprep.mubr.msk.bf16.mxu0 %vm399_vm1, %v1377_v15  ;;  %1316 = vmatprep.mubr.msk.bf16.mxu1 %vm399_vm1, %v1378_v16  ;;  %v281_v15 = vld [vmem:[#allocation2 + $0x28] sm:$0xff] }
  0x42   : > { %1301 = vmatmul.mubr.msk.bf16.gmra.mxu0 %vm399_vm1, %v1379_v17  ;;  %1317 = vmatmul.mubr.msk.bf16.gmra.mxu1 %vm399_vm1, %v1380_v18  ;;  %v263_v18 = vld [vmem:[#allocation2 + $0x88] sm:$0xff] }
  0xea   : > { %v1290_v21 = vpop.f32.mrf.mxu0  ;;  %v1306_v24 = vpop.f32.mrf.mxu1 }
  0xeb   : > { %v615_v23 = vadd.f32 %v1290_v21, %v256_v19  ;;  %v631_v26 = vadd.f32 %v1306_v24, %v272_v20  ;;  %v279_v21 = vld [vmem:[#allocation2 + $0xd0] sm:$0xff]  ;;  %v268_v24 = vld [vmem:[#allocation2 + $0x8] sm:$0xff] }
  0xec   : > { %v486_v27 = vpop.f32.mrf.mxu0  ;;  %v550_v30 = vpop.f32.mrf.mxu1 }
  0xed   : > { %647 = vst [vmem:[#allocation2 + $0xd8] sm:$0xff] %v615_v23  ;;  %v613_v29 = vadd.f32 %v486_v27, %v254_v22  ;;  %663 = vst [vmem:[#allocation2 + $0x40] sm:$0xff] %v631_v26  ;;  %v629_v32 = vadd.f32 %v550_v30, %v270_v25  ;;  %v284_v27 = vld [vmem:[#allocation2 + $0x20] sm:$0xff] }
  0xee   : > { %v1291_v33 = vpop.f32.mrf.mxu0  ;;  %v1307_v36 = vpop.f32.mrf.mxu1  ;;  %v266_v30 = vld [vmem:[#allocation2 + $0x60] sm:$0xff] }
  0xef   : > { %645 = vst [vmem:[#allocation2 + $0xb0] sm:$0xff] %v613_v29  ;;  %v616_v35 = vadd.f32 %v1291_v33, %v257_v28  ;;  %661 = vst [vmem:[#allocation2 + $0x38] sm:$0xff] %v629_v32  ;;  %v632_v38 = vadd.f32 %v1307_v36, %v273_v31  ;;  %v282_v33 = vld [vmem:[#allocation2 + $0xa0] sm:$0xff]  ;;  %v269_v36 = vld [vmem:[#allocation2 + $0x78] sm:$0xff] }
  0xf0   : > { %v489_v39 = vpop.f32.mrf.mxu0  ;;  %v553_v42 = vpop.f32.mrf.mxu1 }
  0xf1   : > { %648 = vst [vmem:[#allocation2 + $0x18] sm:$0xff] %v616_v35  ;;  %v614_v41 = vadd.f32 %v489_v39, %v255_v34  ;;  %664 = vst [vmem:[#allocation2 + $0xc8] sm:$0xff] %v632_v38  ;;  %v630_v44 = vadd.f32 %v553_v42, %v271_v37  ;;  %v285_v39 = vld [vmem:[#allocation2 + $0x98] sm:$0xff]  ;;  %v267_v42 = vld [vmem:[#allocation2 + $0xf0] sm:$0xff] }
  0xf2   : > { %v1294_v45 = vpop.f32.mrf.mxu0  ;;  %v1310_v48 = vpop.f32.mrf.mxu1 }
  0xf3   : > { %646 = vst [vmem:[#allocation2] sm:$0xff] %v614_v41  ;;  %v619_v47 = vadd.f32 %v1294_v45, %v260_v40  ;;  %662 = vst [vmem:[#allocation2 + $0x58] sm:$0xff] %v630_v44  ;;  %v635_v50 = vadd.f32 %v1310_v48, %v276_v43  ;;  %v283_v45 = vld [vmem:[#allocation2 + $0xf8] sm:$0xff] }
  0xf4   : > { %v502_v51 = vpop.f32.mrf.mxu0  ;;  %v566_v54 = vpop.f32.mrf.mxu1 }
  0xf5   : > { %651 = vst [vmem:[#allocation2 + $0x30] sm:$0xff] %v619_v47  ;;  %v617_v53 = vadd.f32 %v502_v51, %v258_v46  ;;  %667 = vst [vmem:[#allocation2 + $0x70] sm:$0xff] %v635_v50  ;;  %v633_v56 = vadd.f32 %v566_v54, %v274_v49 }
  0xf6   : > { %v1295_v57 = vpop.f32.mrf.mxu0  ;;  %v1311_v60 = vpop.f32.mrf.mxu1 }
  0xf7   : > { %649 = vst [vmem:[#allocation2 + $0x50] sm:$0xff] %v617_v53  ;;  %v620_v59 = vadd.f32 %v1295_v57, %v261_v52  ;;  %665 = vst [vmem:[#allocation2 + $0xe0] sm:$0xff] %v633_v56  ;;  %v636_v62 = vadd.f32 %v1311_v60, %v277_v55 }
  0xf8   : > { %v505_v63 = vpop.f32.mrf.mxu0  ;;  %v569_v2 = vpop.f32.mrf.mxu1 }
  0xf9   : > { %652 = vst [vmem:[#allocation2 + $0x48] sm:$0xff] %v620_v59  ;;  %v618_v1 = vadd.f32 %v505_v63, %v259_v58  ;;  %668 = vst [vmem:[#allocation2 + $0xc0] sm:$0xff] %v636_v62  ;;  %v634_v4 = vadd.f32 %v569_v2, %v275_v61 }
  0xfa   : > { %v1298_v5 = vpop.f32.mrf.mxu0  ;;  %v1314_v8 = vpop.f32.mrf.mxu1 }
  0xfb   : > { %650 = vst [vmem:[#allocation2 + $0x68] sm:$0xff] %v618_v1  ;;  %v623_v7 = vadd.f32 %v1298_v5, %v264_v0  ;;  %666 = vst [vmem:[#allocation2 + $0x90] sm:$0xff] %v634_v4  ;;  %v639_v10 = vadd.f32 %v1314_v8, %v280_v3 }
  0xfc   : > { %v518_v11 = vpop.f32.mrf.mxu0  ;;  %v582_v14 = vpop.f32.mrf.mxu1 }
  0xfd   : > { %655 = vst [vmem:[#allocation2 + $0xe8] sm:$0xff] %v623_v7  ;;  %v621_v13 = vadd.f32 %v518_v11, %v262_v6  ;;  %671 = vst [vmem:[#allocation2 + $0x10] sm:$0xff] %v639_v10  ;;  %v637_v16 = vadd.f32 %v582_v14, %v278_v9 }
  0xfe   : > { %v1299_v17 = vpop.f32.mrf.mxu0  ;;  %v1315_v20 = vpop.f32.mrf.mxu1 }
  0xff   : > { %653 = vst [vmem:[#allocation2 + $0x80] sm:$0xff] %v621_v13  ;;  %v624_v19 = vadd.f32 %v1299_v17, %v265_v12  ;;  %669 = vst [vmem:[#allocation2 + $0xa8] sm:$0xff] %v637_v16  ;;  %v640_v22 = vadd.f32 %v1315_v20, %v281_v15 }
 0x100   : > { %v521_v23 = vpop.f32.mrf.mxu0  ;;  %v585_v26 = vpop.f32.mrf.mxu1 }
 0x101   : > { %656 = vst [vmem:[#allocation2 + $0xb8] sm:$0xff] %v624_v19  ;;  %v622_v25 = vadd.f32 %v521_v23, %v263_v18  ;;  %672 = vst [vmem:[#allocation2 + $0x28] sm:$0xff] %v640_v22  ;;  %v638_v28 = vadd.f32 %v585_v26, %v279_v21 }
 0x102   : > { %v1302_v29 = vpop.f32.mrf.mxu0  ;;  %v1318_v32 = vpop.f32.mrf.mxu1 }
 0x103   : > { %654 = vst [vmem:[#allocation2 + $0x88] sm:$0xff] %v622_v25  ;;  %v627_v31 = vadd.f32 %v1302_v29, %v268_v24  ;;  %670 = vst [vmem:[#allocation2 + $0xd0] sm:$0xff] %v638_v28  ;;  %v643_v34 = vadd.f32 %v1318_v32, %v284_v27 }
 0x104   : > { %v534_v35 = vpop.f32.mrf.mxu0  ;;  %v598_v38 = vpop.f32.mrf.mxu1 }
 0x105   : > { %659 = vst [vmem:[#allocation2 + $0x8] sm:$0xff] %v627_v31  ;;  %v625_v37 = vadd.f32 %v534_v35, %v266_v30  ;;  %675 = vst [vmem:[#allocation2 + $0x20] sm:$0xff] %v643_v34  ;;  %v641_v40 = vadd.f32 %v598_v38, %v282_v33 }
 0x106   : > { %v1303_v41 = vpop.f32.mrf.mxu0  ;;  %v1319_v44 = vpop.f32.mrf.mxu1 }
 0x107   : > { %657 = vst [vmem:[#allocation2 + $0x60] sm:$0xff] %v625_v37  ;;  %v628_v43 = vadd.f32 %v1303_v41, %v269_v36  ;;  %673 = vst [vmem:[#allocation2 + $0xa0] sm:$0xff] %v641_v40  ;;  %v644_v46 = vadd.f32 %v1319_v44, %v285_v39  ;;  %680 = sbr.rel (%p1106_p8) target bundleno = 304 (0x130), region = 40 }
 0x108   : > { %v537_v47 = vpop.f32.mrf.mxu0  ;;  %v601_v49 = vpop.f32.mrf.mxu1 }
 0x109   : > { %660 = vst [vmem:[#allocation2 + $0x78] sm:$0xff] %v628_v43  ;;  %v626_v48 = vadd.f32 %v537_v47, %v267_v42  ;;  %676 = vst [vmem:[#allocation2 + $0x98] sm:$0xff] %v644_v46  ;;  %v642_v50 = vadd.f32 %v601_v49, %v283_v45 }
 0x10b   : > { %658 = vst [vmem:[#allocation2 + $0xf0] sm:$0xff] %v626_v48  ;;  %674 = vst [vmem:[#allocation2 + $0xf8] sm:$0xff] %v642_v50 }
 0x10c   : > { %v681_v51 = vld [vmem:[#allocation2 + $0xb0] sm:$0xff]  ;;  %v682_v52 = vld [vmem:[#allocation2] sm:$0xff]  ;;  %v683_v56 = vld [vmem:[#allocation2 + $0xd8] sm:$0xff] }
 0x10d   : > { %v1529_v53 = vld [vmem:[%s1596_s2] ss:$0 sm:$0xff]  ;;  %v684_v57 = vld [vmem:[#allocation2 + $0x18] sm:$0xff]  ;;  %v685_v58 = vld [vmem:[#allocation2 + $0x50] sm:$0xff] }
 0x10e   : > { %v720_v54 = vadd.f32 %v1529_v53, %v681_v51  ;;  %v721_v55 = vadd.f32 %v1529_v53, %v682_v52  ;;  %v722_v59 = vadd.f32 %v1529_v53, %v683_v56  ;;  %v723_v60 = vadd.f32 %v1529_v53, %v684_v57  ;;  %v686_v61 = vld [vmem:[#allocation2 + $0x68] sm:$0xff]  ;;  %v687_v63 = vld [vmem:[#allocation2 + $0x30] sm:$0xff]  ;;  %v689_v9 = vld [vmem:[#allocation2 + $0x80] sm:$0xff] }
 0x10f   : > { %v724_v62 = vadd.f32 %v1529_v53, %v685_v58  ;;  %v688_v0 = vld [vmem:[#allocation2 + $0x48] sm:$0xff]  ;;  %v725_v3 = vadd.f32 %v1529_v53, %v686_v61  ;;  %v726_v4 = vadd.f32 %v1529_v53, %v687_v63  ;;  %v692_v20 = vld [vmem:[#allocation2 + $0xb8] sm:$0xff]  ;;  %v693_v21 = vld [vmem:[#allocation2 + $0x60] sm:$0xff]  ;;  %v728_v25 = vadd.f32 %v1529_v53, %v689_v9 }
 0x110   : > { %v752_v1 = vmax.f32 %v720_v54, 0.0  ;;  %v753_v2 = vmax.f32 %v721_v55, 0.0  ;;  %v754_v5 = vmax.f32 %v722_v59, 0.0  ;;  %v755_v6 = vmax.f32 %v723_v60, 0.0  ;;  %v690_v14 = vld [vmem:[#allocation2 + $0x88] sm:$0xff]  ;;  %v696_v36 = vld [vmem:[#allocation2 + $0x78] sm:$0xff] }
 0x111   : > { %v756_v7 = vmax.f32 %v724_v62, 0.0  ;;  %v727_v8 = vadd.f32 %v1529_v53, %v688_v0  ;;  %v757_v12 = vmax.f32 %v725_v3, 0.0  ;;  %v758_v13 = vmax.f32 %v726_v4, 0.0  ;;  %v691_v15 = vld [vmem:[#allocation2 + $0xe8] sm:$0xff]  ;;  %v697_v41 = vld [vmem:[#allocation2 + $0x38] sm:$0xff]  ;;  %v699_v51 = vld [vmem:[#allocation2 + $0x40] sm:$0xff] }
 0x112   : > { %v784_v10 = vmin.f32 %v752_v1, 6.0  ;;  %v785_v11 = vmin.f32 %v753_v2, 6.0  ;;  %v786_v16 = vmin.f32 %v754_v5, 6.0  ;;  %v787_v17 = vmin.f32 %v755_v6, 6.0  ;;  %v694_v26 = vld [vmem:[#allocation2 + $0xf0] sm:$0xff]  ;;  %v695_v31 = vld [vmem:[#allocation2 + $0x8] sm:$0xff] }
 0x113   : > { %v788_v18 = vmin.f32 %v756_v7, 6.0  ;;  %v759_v19 = vmax.f32 %v727_v8, 0.0  ;;  %v789_v23 = vmin.f32 %v757_v12, 6.0  ;;  %v790_v24 = vmin.f32 %v758_v13, 6.0  ;;  %v698_v46 = vld [vmem:[#allocation2 + $0x58] sm:$0xff]  ;;  %v700_v57 = vld [vmem:[#allocation2 + $0xc8] sm:$0xff] }
 0x114   : > { %v1177_v22 = vpack.c.bf16 %v785_v11, %v784_v10  ;;  %v1182_v27 = vpack.c.bf16 %v787_v17, %v786_v16  ;;  %v729_v29 = vadd.f32 %v1529_v53, %v690_v14  ;;  %v730_v30 = vadd.f32 %v1529_v53, %v691_v15  ;;  %v701_v62 = vld [vmem:[#allocation2 + $0xe0] sm:$0xff]  ;;  %v702_v63 = vld [vmem:[#allocation2 + $0x90] sm:$0xff]  ;;  %v705_v14 = vld [vmem:[#allocation2 + $0xa8] sm:$0xff] }
 0x115   : > { %v791_v28 = vmin.f32 %v759_v19, 6.0  ;;  %v1187_v32 = vpack.c.bf16 %v789_v23, %v788_v18  ;;  %v760_v33 = vmax.f32 %v728_v25, 0.0  ;;  %v731_v34 = vadd.f32 %v1529_v53, %v692_v20  ;;  %v703_v4 = vld [vmem:[#allocation2 + $0x70] sm:$0xff]  ;;  %v704_v9 = vld [vmem:[#allocation2 + $0xc0] sm:$0xff] }
 0x116   : > { %1178 = vst [vmem:[%s1489_s7] sm:$0xff] %v1177_v22   ;;  %v732_v35 = vadd.f32 %v1529_v53, %v693_v21  ;;  %1254 = vst [vmem:[%s1489_s7 + $0x8] sm:$0xff] %v1182_v27   ;;  %v761_v38 = vmax.f32 %v729_v29, 0.0  ;;  %v762_v39 = vmax.f32 %v730_v30, 0.0  ;;  %v733_v40 = vadd.f32 %v1529_v53, %v694_v26  ;;  %v706_v19 = vld [vmem:[#allocation2 + $0xd0] sm:$0xff]  ;;  %v708_v29 = vld [vmem:[#allocation2 + $0x28] sm:$0xff] }
 0x117   : > { %v1192_v37 = vpack.c.bf16 %v791_v28, %v790_v24  ;;  %1255 = vst [vmem:[%s1489_s7 + $0x10] sm:$0xff] %v1187_v32   ;;  %v792_v42 = vmin.f32 %v760_v33, 6.0  ;;  %v763_v43 = vmax.f32 %v731_v34, 0.0  ;;  %v734_v45 = vadd.f32 %v1529_v53, %v695_v31  ;;  %v707_v24 = vld [vmem:[#allocation2 + $0x10] sm:$0xff]  ;;  %v709_v34 = vld [vmem:[#allocation2 + $0xa0] sm:$0xff] }
 0x118   : > { %v764_v44 = vmax.f32 %v732_v35, 0.0  ;;  %v793_v47 = vmin.f32 %v761_v38, 6.0  ;;  %v794_v48 = vmin.f32 %v762_v39, 6.0  ;;  %v765_v49 = vmax.f32 %v733_v40, 0.0  ;;  %v710_v35 = vld [vmem:[#allocation2 + $0xf8] sm:$0xff]  ;;  %v711_v40 = vld [vmem:[#allocation2 + $0x20] sm:$0xff] }
 0x119   : > { %1256 = vst [vmem:[%s1489_s7 + $0x18] sm:$0xff] %v1192_v37   ;;  %v735_v50 = vadd.f32 %v1529_v53, %v696_v36  ;;  %v795_v52 = vmin.f32 %v763_v43, 6.0  ;;  %v766_v55 = vmax.f32 %v734_v45, 0.0  ;;  %v736_v56 = vadd.f32 %v1529_v53, %v697_v41  ;;  %v712_v45 = vld [vmem:[#allocation2 + $0x98] sm:$0xff] }
 0x11a   : > { %v796_v54 = vmin.f32 %v764_v44, 6.0  ;;  %v1197_v58 = vpack.c.bf16 %v793_v47, %v792_v42  ;;  %v797_v59 = vmin.f32 %v765_v49, 6.0  ;;  %v737_v61 = vadd.f32 %v1529_v53, %v698_v46 }
 0x11b   : > { %v767_v60 = vmax.f32 %v735_v50, 0.0  ;;  %v1202_v0 = vpack.c.bf16 %v795_v52, %v794_v48  ;;  %v798_v1 = vmin.f32 %v766_v55, 6.0  ;;  %v768_v2 = vmax.f32 %v736_v56, 0.0 }
 0x11c   : > { %v738_v3 = vadd.f32 %v1529_v53, %v699_v51  ;;  %1257 = vst [vmem:[%s1489_s7 + $0x20] sm:$0xff] %v1197_v58   ;;  %v1207_v5 = vpack.c.bf16 %v797_v59, %v796_v54  ;;  %v769_v7 = vmax.f32 %v737_v61, 0.0  ;;  %v739_v8 = vadd.f32 %v1529_v53, %v700_v57 }
 0x11d   : > { %v799_v6 = vmin.f32 %v767_v60, 6.0  ;;  %1258 = vst [vmem:[%s1489_s7 + $0x28] sm:$0xff] %v1202_v0   ;;  %v800_v10 = vmin.f32 %v768_v2, 6.0  ;;  %v740_v12 = vadd.f32 %v1529_v53, %v701_v62  ;;  %v741_v13 = vadd.f32 %v1529_v53, %v702_v63 }
 0x11e   : > { %v770_v11 = vmax.f32 %v738_v3, 0.0  ;;  %1259 = vst [vmem:[%s1489_s7 + $0x30] sm:$0xff] %v1207_v5   ;;  %v801_v16 = vmin.f32 %v769_v7, 6.0  ;;  %v771_v17 = vmax.f32 %v739_v8, 0.0  ;;  %v742_v18 = vadd.f32 %v1529_v53, %v703_v4 }
 0x11f   : > { %v1212_v15 = vpack.c.bf16 %v799_v6, %v798_v1  ;;  %v772_v21 = vmax.f32 %v740_v12, 0.0  ;;  %v773_v22 = vmax.f32 %v741_v13, 0.0  ;;  %v743_v23 = vadd.f32 %v1529_v53, %v704_v9 }
 0x120   : > { %v802_v20 = vmin.f32 %v770_v11, 6.0  ;;  %v1217_v25 = vpack.c.bf16 %v801_v16, %v800_v10  ;;  %v803_v26 = vmin.f32 %v771_v17, 6.0  ;;  %v774_v27 = vmax.f32 %v742_v18, 0.0 }
 0x121   : > { %1260 = vst [vmem:[%s1489_s7 + $0x38] sm:$0xff] %v1212_v15   ;;  %v744_v28 = vadd.f32 %v1529_v53, %v705_v14  ;;  %v804_v30 = vmin.f32 %v772_v21, 6.0  ;;  %v805_v31 = vmin.f32 %v773_v22, 6.0  ;;  %v775_v32 = vmax.f32 %v743_v23, 0.0 }
 0x122   : > { %v745_v33 = vadd.f32 %v1529_v53, %v706_v19  ;;  %1261 = vst [vmem:[%s1489_s7 + $0x40] sm:$0xff] %v1217_v25   ;;  %v1222_v36 = vpack.c.bf16 %v803_v26, %v802_v20  ;;  %v806_v37 = vmin.f32 %v774_v27, 6.0  ;;  %v746_v39 = vadd.f32 %v1529_v53, %v707_v24 }
 0x123   : > { %v776_v38 = vmax.f32 %v744_v28, 0.0  ;;  %v1227_v41 = vpack.c.bf16 %v805_v31, %v804_v30  ;;  %v807_v42 = vmin.f32 %v775_v32, 6.0  ;;  %v747_v44 = vadd.f32 %v1529_v53, %v708_v29 }
 0x124   : > { %v777_v43 = vmax.f32 %v745_v33, 0.0  ;;  %1262 = vst [vmem:[%s1489_s7 + $0x48] sm:$0xff] %v1222_v36   ;;  %v778_v47 = vmax.f32 %v746_v39, 0.0  ;;  %v748_v48 = vadd.f32 %v1529_v53, %v709_v34  ;;  %v749_v49 = vadd.f32 %v1529_v53, %v710_v35 }
 0x125   : > { %v808_v46 = vmin.f32 %v776_v38, 6.0  ;;  %1263 = vst [vmem:[%s1489_s7 + $0x50] sm:$0xff] %v1227_v41   ;;  %v1232_v50 = vpack.c.bf16 %v807_v42, %v806_v37  ;;  %v779_v52 = vmax.f32 %v747_v44, 0.0  ;;  %v750_v54 = vadd.f32 %v1529_v53, %v711_v40 }
 0x126   : > { %v809_v51 = vmin.f32 %v777_v43, 6.0  ;;  %v810_v55 = vmin.f32 %v778_v47, 6.0  ;;  %v780_v56 = vmax.f32 %v748_v48, 0.0  ;;  %v781_v57 = vmax.f32 %v749_v49, 0.0 }
 0x127   : > { %v751_v58 = vadd.f32 %v1529_v53, %v712_v45  ;;  %1264 = vst [vmem:[%s1489_s7 + $0x58] sm:$0xff] %v1232_v50   ;;  %v811_v60 = vmin.f32 %v779_v52, 6.0  ;;  %v782_v61 = vmax.f32 %v750_v54, 0.0 }
 0x128   : > { %v1237_v59 = vpack.c.bf16 %v809_v51, %v808_v46  ;;  %v812_v62 = vmin.f32 %v780_v56, 6.0  ;;  %v813_v63 = vmin.f32 %v781_v57, 6.0 }
 0x129   : > { %v783_v0 = vmax.f32 %v751_v58, 0.0  ;;  %v1242_v1 = vpack.c.bf16 %v811_v60, %v810_v55  ;;  %v814_v2 = vmin.f32 %v782_v61, 6.0 }
 0x12a   : > { %1265 = vst [vmem:[%s1489_s7 + $0x60] sm:$0xff] %v1237_v59   ;;  %v1247_v3 = vpack.c.bf16 %v813_v63, %v812_v62 }
 0x12b   : > { %v815_v4 = vmin.f32 %v783_v0, 6.0  ;;  %1266 = vst [vmem:[%s1489_s7 + $0x68] sm:$0xff] %v1242_v1  }
 0x12c   : > { %1267 = vst [vmem:[%s1489_s7 + $0x70] sm:$0xff] %v1247_v3  }
 0x12d   : > { %v1252_v5 = vpack.c.bf16 %v815_v4, %v814_v2 }
 0x12f   : > { %1268 = vst [vmem:[%s1489_s7 + $0x78] sm:$0xff] %v1252_v5  }
 0x130 PF: > { %s13_s16 = sadd.s32 1, %s1419_s16   ;;  %s1598_s12 = smov %s1411_s14 }
 0x131   : > { %p10_p9 = scmp.ge.s32.totalorder %s13_s16, 20   ;;  %s1599_s13 = smov %s1415_s15 }
 0x132   : > { %s1600_s14 = smov %s1603_s17  ;;  %s1601_s15 = smov %s1607_s18 }
 0x133   :  { %12 = sbr.rel (!%p10_p9) target bundleno = 3 (0x3), region = 73 }

// kernel: _lambda_.17
= control target key start
LH: loop header
LB: loop body
LE: loop exit
PB: predicated region body
PF: predicated region fallthrough
CT: control target
= control target key end

     0   :  { %vm288_vm0 = vcmask 125952   ;;  %s943_s0 = inlined_call_operand.vmem [shape: bf16[9,128,16], index: 0, kind: input, shape index: {}]   ;;  %s944_s1 = inlined_call_operand.vmem [shape: bf16[128,16], index: 1, kind: output, shape index: {}]  }
   0x1   :  { %v8_v0 = vld [vmem:[%s943_s0] sm:$0xf]  ;;  %v9_v6 = vld [vmem:[%s943_s0 + $0x4] sm:$0xf]  ;;  %v10_v15 = vld [vmem:[%s943_s0 + $0x8] sm:$0xf] }
   0x2   :  { %v309_v1 = vld [vmem:[%s943_s0 + $0x40] sm:$0xf]  ;;  %v310_v7 = vld [vmem:[%s943_s0 + $0x44] sm:$0xf]  ;;  %v311_v16 = vld [vmem:[%s943_s0 + $0x48] sm:$0xf] }
   0x3   :  { %v325_v2 = vld [vmem:[%s943_s0 + $0x80] sm:$0xf]  ;;  %v41_v3 = vmax.bf16 %v309_v1, %v8_v0  ;;  %v326_v8 = vld [vmem:[%s943_s0 + $0x84] sm:$0xf]  ;;  %v42_v10 = vmax.bf16 %v310_v7, %v9_v6  ;;  %v327_v17 = vld [vmem:[%s943_s0 + $0x88] sm:$0xf]  ;;  %v43_v20 = vmax.bf16 %v311_v16, %v10_v15 }
   0x4   :  { %v341_v4 = vld [vmem:[%s943_s0 + $0xc0] sm:$0xf]  ;;  %v342_v13 = vld [vmem:[%s943_s0 + $0xc4] sm:$0xf]  ;;  %v343_v24 = vld [vmem:[%s943_s0 + $0xc8] sm:$0xf] }
   0x5   :  { %v74_v5 = vmax.bf16 %v325_v2, %v41_v3  ;;  %v357_v9 = vld [vmem:[%s943_s0 + $0x100] sm:$0xf]  ;;  %v75_v14 = vmax.bf16 %v326_v8, %v42_v10  ;;  %v358_v19 = vld [vmem:[%s943_s0 + $0x104] sm:$0xf]  ;;  %v76_v26 = vmax.bf16 %v327_v17, %v43_v20  ;;  %v11_v27 = vld [vmem:[%s943_s0 + $0xc] sm:$0xf] }
   0x6   :  { %v373_v12 = vld [vmem:[%s943_s0 + $0x140] sm:$0xf]  ;;  %v374_v23 = vld [vmem:[%s943_s0 + $0x144] sm:$0xf]  ;;  %v312_v28 = vld [vmem:[%s943_s0 + $0x4c] sm:$0xf] }
   0x7   :  { %v107_v11 = vmax.bf16 %v341_v4, %v74_v5  ;;  %v389_v21 = vld [vmem:[%s943_s0 + $0x180] sm:$0xf]  ;;  %v108_v22 = vmax.bf16 %v342_v13, %v75_v14  ;;  %v328_v29 = vld [vmem:[%s943_s0 + $0x8c] sm:$0xf]  ;;  %v359_v33 = vld [vmem:[%s943_s0 + $0x108] sm:$0xf]  ;;  %v44_v34 = vmax.bf16 %v312_v28, %v11_v27  ;;  %v109_v37 = vmax.bf16 %v343_v24, %v76_v26 }
   0x8   :  { %v405_v30 = vld [vmem:[%s943_s0 + $0x1c0] sm:$0xf]  ;;  %v390_v36 = vld [vmem:[%s943_s0 + $0x184] sm:$0xf]  ;;  %v375_v38 = vld [vmem:[%s943_s0 + $0x148] sm:$0xf] }
   0x9   :  { %v140_v18 = vmax.bf16 %v357_v9, %v107_v11  ;;  %v421_v31 = vld [vmem:[%s943_s0 + $0x200] sm:$0xf]  ;;  %v141_v32 = vmax.bf16 %v358_v19, %v108_v22  ;;  %v344_v39 = vld [vmem:[%s943_s0 + $0xcc] sm:$0xf]  ;;  %v77_v41 = vmax.bf16 %v328_v29, %v44_v34  ;;  %v12_v42 = vld [vmem:[%s943_s0 + $0x10] sm:$0xf]  ;;  %v142_v48 = vmax.bf16 %v359_v33, %v109_v37 }
   0xa   :  { %v313_v43 = vld [vmem:[%s943_s0 + $0x50] sm:$0xf]  ;;  %v406_v46 = vld [vmem:[%s943_s0 + $0x1c4] sm:$0xf]  ;;  %v360_v49 = vld [vmem:[%s943_s0 + $0x10c] sm:$0xf] }
   0xb   :  { %v173_v25 = vmax.bf16 %v373_v12, %v140_v18  ;;  %v174_v40 = vmax.bf16 %v374_v23, %v141_v32  ;;  %v329_v44 = vld [vmem:[%s943_s0 + $0x90] sm:$0xf]  ;;  %v422_v47 = vld [vmem:[%s943_s0 + $0x204] sm:$0xf]  ;;  %v45_v50 = vmax.bf16 %v313_v43, %v12_v42  ;;  %v391_v52 = vld [vmem:[%s943_s0 + $0x188] sm:$0xf]  ;;  %v110_v53 = vmax.bf16 %v344_v39, %v77_v41 }
   0xc   :  { %v376_v54 = vld [vmem:[%s943_s0 + $0x14c] sm:$0xf]  ;;  %v345_v55 = vld [vmem:[%s943_s0 + $0xd0] sm:$0xf]  ;;  %v175_v57 = vmax.bf16 %v375_v38, %v142_v48  ;;  %v13_v59 = vld [vmem:[%s943_s0 + $0x14] sm:$0xf] }
   0xd   :  { %v206_v35 = vmax.bf16 %v389_v21, %v173_v25  ;;  %v207_v51 = vmax.bf16 %v390_v36, %v174_v40  ;;  %v78_v58 = vmax.bf16 %v329_v44, %v45_v50  ;;  %v314_v60 = vld [vmem:[%s943_s0 + $0x54] sm:$0xf]  ;;  %v407_v63 = vld [vmem:[%s943_s0 + $0x1c8] sm:$0xf]  ;;  %v143_v1 = vmax.bf16 %v360_v49, %v110_v53  ;;  %v361_v2 = vld [vmem:[%s943_s0 + $0x110] sm:$0xf] }
   0xe   :  { %v330_v61 = vld [vmem:[%s943_s0 + $0x94] sm:$0xf]  ;;  %v423_v0 = vld [vmem:[%s943_s0 + $0x208] sm:$0xf]  ;;  %v46_v3 = vmax.bf16 %v314_v60, %v13_v59  ;;  %v208_v4 = vmax.bf16 %v391_v52, %v175_v57  ;;  %v392_v5 = vld [vmem:[%s943_s0 + $0x18c] sm:$0xf] }
   0xf   :  { %v239_v45 = vmax.bf16 %v405_v30, %v206_v35  ;;  %v240_v62 = vmax.bf16 %v406_v46, %v207_v51  ;;  %v111_v6 = vmax.bf16 %v345_v55, %v78_v58  ;;  %v377_v7 = vld [vmem:[%s943_s0 + $0x150] sm:$0xf]  ;;  %v346_v8 = vld [vmem:[%s943_s0 + $0xd4] sm:$0xf]  ;;  %v176_v10 = vmax.bf16 %v376_v54, %v143_v1  ;;  %v14_v12 = vld [vmem:[%s943_s0 + $0x18] sm:$0xf] }
  0x10   :  { %v79_v11 = vmax.bf16 %v330_v61, %v46_v3  ;;  %v315_v13 = vld [vmem:[%s943_s0 + $0x58] sm:$0xf]  ;;  %v241_v15 = vmax.bf16 %v407_v63, %v208_v4  ;;  %v408_v16 = vld [vmem:[%s943_s0 + $0x1cc] sm:$0xf]  ;;  %v362_v19 = vld [vmem:[%s943_s0 + $0x114] sm:$0xf] }
  0x11   :  { %v272_v56 = vmax.bf16 %v421_v31, %v239_v45  ;;  %v273_v9 = vmax.bf16 %v422_v47, %v240_v62  ;;  %v331_v14 = vld [vmem:[%s943_s0 + $0x98] sm:$0xf]  ;;  %v424_v17 = vld [vmem:[%s943_s0 + $0x20c] sm:$0xf]  ;;  %v144_v18 = vmax.bf16 %v361_v2, %v111_v6  ;;  %v47_v20 = vmax.bf16 %v315_v13, %v14_v12  ;;  %v393_v22 = vld [vmem:[%s943_s0 + $0x190] sm:$0xf] }
  0x12   :  { %v209_v21 = vmax.bf16 %v392_v5, %v176_v10  ;;  %v112_v23 = vmax.bf16 %v346_v8, %v79_v11  ;;  %v378_v24 = vld [vmem:[%s943_s0 + $0x154] sm:$0xf]  ;;  %v347_v25 = vld [vmem:[%s943_s0 + $0xd8] sm:$0xf]  ;;  %v274_v26 = vmax.bf16 %v423_v0, %v241_v15  ;;  %v15_v29 = vld [vmem:[%s943_s0 + $0x1c] sm:$0xf] }
  0x13   :  { %289 = vst.msk [vmem:[%s944_s1] sm:$0xf] %vm288_vm0, %v272_v56  ;;  %290 = vst.msk [vmem:[%s944_s1 + $0x4] sm:$0xf] %vm288_vm0, %v273_v9  ;;  %v177_v27 = vmax.bf16 %v377_v7, %v144_v18  ;;  %v80_v28 = vmax.bf16 %v331_v14, %v47_v20  ;;  %v316_v30 = vld [vmem:[%s943_s0 + $0x5c] sm:$0xf] }
  0x14   :  { %v332_v31 = vld [vmem:[%s943_s0 + $0x9c] sm:$0xf]  ;;  %v242_v32 = vmax.bf16 %v408_v16, %v209_v21  ;;  %v409_v33 = vld [vmem:[%s943_s0 + $0x1d0] sm:$0xf]  ;;  %v145_v35 = vmax.bf16 %v362_v19, %v112_v23  ;;  %v363_v36 = vld [vmem:[%s943_s0 + $0x118] sm:$0xf]  ;;  %v48_v37 = vmax.bf16 %v316_v30, %v15_v29 }
  0x15   :  { %v425_v34 = vld [vmem:[%s943_s0 + $0x210] sm:$0xf]  ;;  %291 = vst.msk [vmem:[%s944_s1 + $0x8] sm:$0xf] %vm288_vm0, %v274_v26  ;;  %v210_v38 = vmax.bf16 %v393_v22, %v177_v27  ;;  %v394_v39 = vld [vmem:[%s943_s0 + $0x194] sm:$0xf]  ;;  %v113_v40 = vmax.bf16 %v347_v25, %v80_v28 }
  0x16   :  { %v379_v41 = vld [vmem:[%s943_s0 + $0x158] sm:$0xf]  ;;  %v348_v42 = vld [vmem:[%s943_s0 + $0xdc] sm:$0xf]  ;;  %v275_v43 = vmax.bf16 %v424_v17, %v242_v32  ;;  %v178_v44 = vmax.bf16 %v378_v24, %v145_v35  ;;  %v81_v45 = vmax.bf16 %v332_v31, %v48_v37  ;;  %v16_v46 = vld [vmem:[%s943_s0 + $0x20] sm:$0xf] }
  0x17   :  { %v317_v47 = vld [vmem:[%s943_s0 + $0x60] sm:$0xf]  ;;  %v243_v49 = vmax.bf16 %v409_v33, %v210_v38  ;;  %v410_v50 = vld [vmem:[%s943_s0 + $0x1d4] sm:$0xf]  ;;  %v146_v52 = vmax.bf16 %v363_v36, %v113_v40  ;;  %v364_v53 = vld [vmem:[%s943_s0 + $0x11c] sm:$0xf] }
  0x18   :  { %v333_v48 = vld [vmem:[%s943_s0 + $0xa0] sm:$0xf]  ;;  %v426_v51 = vld [vmem:[%s943_s0 + $0x214] sm:$0xf]  ;;  %v49_v54 = vmax.bf16 %v317_v47, %v16_v46  ;;  %292 = vst.msk [vmem:[%s944_s1 + $0xc] sm:$0xf] %vm288_vm0, %v275_v43  ;;  %v211_v55 = vmax.bf16 %v394_v39, %v178_v44  ;;  %v114_v57 = vmax.bf16 %v348_v42, %v81_v45 }
  0x19   :  { %v395_v56 = vld [vmem:[%s943_s0 + $0x198] sm:$0xf]  ;;  %v380_v58 = vld [vmem:[%s943_s0 + $0x15c] sm:$0xf]  ;;  %v349_v59 = vld [vmem:[%s943_s0 + $0xe0] sm:$0xf]  ;;  %v276_v60 = vmax.bf16 %v425_v34, %v243_v49  ;;  %v179_v61 = vmax.bf16 %v379_v41, %v146_v52 }
  0x1a   :  { %v82_v62 = vmax.bf16 %v333_v48, %v49_v54  ;;  %v17_v63 = vld [vmem:[%s943_s0 + $0x24] sm:$0xf]  ;;  %v244_v2 = vmax.bf16 %v410_v50, %v211_v55  ;;  %v411_v3 = vld [vmem:[%s943_s0 + $0x1d8] sm:$0xf]  ;;  %v147_v5 = vmax.bf16 %v364_v53, %v114_v57  ;;  %v365_v6 = vld [vmem:[%s943_s0 + $0x120] sm:$0xf] }
  0x1b   :  { %v318_v0 = vld [vmem:[%s943_s0 + $0x64] sm:$0xf]  ;;  %v427_v4 = vld [vmem:[%s943_s0 + $0x218] sm:$0xf]  ;;  %293 = vst.msk [vmem:[%s944_s1 + $0x10] sm:$0xf] %vm288_vm0, %v276_v60  ;;  %v212_v8 = vmax.bf16 %v395_v56, %v179_v61 }
  0x1c   :  { %v334_v1 = vld [vmem:[%s943_s0 + $0xa4] sm:$0xf]  ;;  %v50_v7 = vmax.bf16 %v318_v0, %v17_v63  ;;  %v396_v9 = vld [vmem:[%s943_s0 + $0x19c] sm:$0xf]  ;;  %v115_v10 = vmax.bf16 %v349_v59, %v82_v62  ;;  %v381_v11 = vld [vmem:[%s943_s0 + $0x160] sm:$0xf]  ;;  %v277_v13 = vmax.bf16 %v426_v51, %v244_v2  ;;  %v180_v14 = vmax.bf16 %v380_v58, %v147_v5 }
  0x1d   :  { %v350_v12 = vld [vmem:[%s943_s0 + $0xe4] sm:$0xf]  ;;  %v18_v16 = vld [vmem:[%s943_s0 + $0x28] sm:$0xf]  ;;  %v245_v19 = vmax.bf16 %v411_v3, %v212_v8  ;;  %v412_v20 = vld [vmem:[%s943_s0 + $0x1dc] sm:$0xf] }
  0x1e   :  { %v83_v15 = vmax.bf16 %v334_v1, %v50_v7  ;;  %v319_v17 = vld [vmem:[%s943_s0 + $0x68] sm:$0xf]  ;;  %v428_v21 = vld [vmem:[%s943_s0 + $0x21c] sm:$0xf]  ;;  %v148_v22 = vmax.bf16 %v365_v6, %v115_v10  ;;  %v366_v23 = vld [vmem:[%s943_s0 + $0x124] sm:$0xf]  ;;  %v213_v25 = vmax.bf16 %v396_v9, %v180_v14 }
  0x1f   :  { %v335_v18 = vld [vmem:[%s943_s0 + $0xa8] sm:$0xf]  ;;  %v51_v24 = vmax.bf16 %v319_v17, %v18_v16  ;;  %294 = vst.msk [vmem:[%s944_s1 + $0x14] sm:$0xf] %vm288_vm0, %v277_v13  ;;  %v397_v26 = vld [vmem:[%s943_s0 + $0x1a0] sm:$0xf]  ;;  %v278_v30 = vmax.bf16 %v427_v4, %v245_v19 }
  0x20   :  { %v116_v27 = vmax.bf16 %v350_v12, %v83_v15  ;;  %v382_v28 = vld [vmem:[%s943_s0 + $0x164] sm:$0xf]  ;;  %v351_v29 = vld [vmem:[%s943_s0 + $0xe8] sm:$0xf]  ;;  %v181_v31 = vmax.bf16 %v381_v11, %v148_v22  ;;  %v19_v33 = vld [vmem:[%s943_s0 + $0x2c] sm:$0xf]  ;;  %v246_v36 = vmax.bf16 %v412_v20, %v213_v25 }
  0x21   :  { %v84_v32 = vmax.bf16 %v335_v18, %v51_v24  ;;  %v320_v34 = vld [vmem:[%s943_s0 + $0x6c] sm:$0xf]  ;;  %v413_v37 = vld [vmem:[%s943_s0 + $0x1e0] sm:$0xf]  ;;  %v367_v40 = vld [vmem:[%s943_s0 + $0x128] sm:$0xf] }
  0x22   :  { %v336_v35 = vld [vmem:[%s943_s0 + $0xac] sm:$0xf]  ;;  %v429_v38 = vld [vmem:[%s943_s0 + $0x220] sm:$0xf]  ;;  %v149_v39 = vmax.bf16 %v366_v23, %v116_v27  ;;  %v52_v41 = vmax.bf16 %v320_v34, %v19_v33  ;;  %295 = vst.msk [vmem:[%s944_s1 + $0x18] sm:$0xf] %vm288_vm0, %v278_v30  ;;  %v214_v42 = vmax.bf16 %v397_v26, %v181_v31  ;;  %v279_v47 = vmax.bf16 %v428_v21, %v246_v36 }
  0x23   :  { %v398_v43 = vld [vmem:[%s943_s0 + $0x1a4] sm:$0xf]  ;;  %v117_v44 = vmax.bf16 %v351_v29, %v84_v32  ;;  %v383_v45 = vld [vmem:[%s943_s0 + $0x168] sm:$0xf]  ;;  %v352_v46 = vld [vmem:[%s943_s0 + $0xec] sm:$0xf] }
  0x24   :  { %v182_v48 = vmax.bf16 %v382_v28, %v149_v39  ;;  %v85_v49 = vmax.bf16 %v336_v35, %v52_v41  ;;  %v20_v50 = vld [vmem:[%s943_s0 + $0x30] sm:$0xf]  ;;  %v247_v53 = vmax.bf16 %v413_v37, %v214_v42  ;;  %v414_v54 = vld [vmem:[%s943_s0 + $0x1e4] sm:$0xf]  ;;  %v368_v57 = vld [vmem:[%s943_s0 + $0x12c] sm:$0xf] }
  0x25   :  { %v321_v51 = vld [vmem:[%s943_s0 + $0x70] sm:$0xf]  ;;  %v430_v55 = vld [vmem:[%s943_s0 + $0x224] sm:$0xf]  ;;  %v150_v56 = vmax.bf16 %v367_v40, %v117_v44  ;;  %296 = vst.msk [vmem:[%s944_s1 + $0x1c] sm:$0xf] %vm288_vm0, %v279_v47 }
  0x26   :  { %v337_v52 = vld [vmem:[%s943_s0 + $0xb0] sm:$0xf]  ;;  %v53_v58 = vmax.bf16 %v321_v51, %v20_v50  ;;  %v215_v59 = vmax.bf16 %v398_v43, %v182_v48  ;;  %v399_v60 = vld [vmem:[%s943_s0 + $0x1a8] sm:$0xf]  ;;  %v118_v61 = vmax.bf16 %v352_v46, %v85_v49  ;;  %v384_v62 = vld [vmem:[%s943_s0 + $0x16c] sm:$0xf]  ;;  %v280_v0 = vmax.bf16 %v429_v38, %v247_v53 }
  0x27   :  { %v353_v63 = vld [vmem:[%s943_s0 + $0xf0] sm:$0xf]  ;;  %v183_v1 = vmax.bf16 %v383_v45, %v150_v56  ;;  %v21_v3 = vld [vmem:[%s943_s0 + $0x34] sm:$0xf]  ;;  %v415_v7 = vld [vmem:[%s943_s0 + $0x1e8] sm:$0xf] }
  0x28   :  { %v86_v2 = vmax.bf16 %v337_v52, %v53_v58  ;;  %v322_v4 = vld [vmem:[%s943_s0 + $0x74] sm:$0xf]  ;;  %v248_v6 = vmax.bf16 %v414_v54, %v215_v59  ;;  %v431_v8 = vld [vmem:[%s943_s0 + $0x228] sm:$0xf]  ;;  %v151_v9 = vmax.bf16 %v368_v57, %v118_v61  ;;  %v369_v10 = vld [vmem:[%s943_s0 + $0x130] sm:$0xf] }
  0x29   :  { %v338_v5 = vld [vmem:[%s943_s0 + $0xb4] sm:$0xf]  ;;  %v54_v11 = vmax.bf16 %v322_v4, %v21_v3  ;;  %297 = vst.msk [vmem:[%s944_s1 + $0x20] sm:$0xf] %vm288_vm0, %v280_v0  ;;  %v216_v12 = vmax.bf16 %v399_v60, %v183_v1  ;;  %v400_v13 = vld [vmem:[%s943_s0 + $0x1ac] sm:$0xf] }
  0x2a   :  { %v119_v14 = vmax.bf16 %v353_v63, %v86_v2  ;;  %v385_v15 = vld [vmem:[%s943_s0 + $0x170] sm:$0xf]  ;;  %v354_v16 = vld [vmem:[%s943_s0 + $0xf4] sm:$0xf]  ;;  %v281_v17 = vmax.bf16 %v430_v55, %v248_v6  ;;  %v184_v18 = vmax.bf16 %v384_v62, %v151_v9  ;;  %v22_v20 = vld [vmem:[%s943_s0 + $0x38] sm:$0xf] }
  0x2b   :  { %v87_v19 = vmax.bf16 %v338_v5, %v54_v11  ;;  %v323_v21 = vld [vmem:[%s943_s0 + $0x78] sm:$0xf]  ;;  %v249_v23 = vmax.bf16 %v415_v7, %v216_v12  ;;  %v416_v24 = vld [vmem:[%s943_s0 + $0x1ec] sm:$0xf]  ;;  %v370_v27 = vld [vmem:[%s943_s0 + $0x134] sm:$0xf] }
  0x2c   :  { %v339_v22 = vld [vmem:[%s943_s0 + $0xb8] sm:$0xf]  ;;  %v432_v25 = vld [vmem:[%s943_s0 + $0x22c] sm:$0xf]  ;;  %v152_v26 = vmax.bf16 %v369_v10, %v119_v14  ;;  %v55_v28 = vmax.bf16 %v323_v21, %v22_v20  ;;  %298 = vst.msk [vmem:[%s944_s1 + $0x24] sm:$0xf] %vm288_vm0, %v281_v17  ;;  %v217_v29 = vmax.bf16 %v400_v13, %v184_v18 }
  0x2d   :  { %v401_v30 = vld [vmem:[%s943_s0 + $0x1b0] sm:$0xf]  ;;  %v120_v31 = vmax.bf16 %v354_v16, %v87_v19  ;;  %v386_v32 = vld [vmem:[%s943_s0 + $0x174] sm:$0xf]  ;;  %v355_v33 = vld [vmem:[%s943_s0 + $0xf8] sm:$0xf]  ;;  %v282_v34 = vmax.bf16 %v431_v8, %v249_v23 }
  0x2e   :  { %v185_v35 = vmax.bf16 %v385_v15, %v152_v26  ;;  %v88_v36 = vmax.bf16 %v339_v22, %v55_v28  ;;  %v23_v37 = vld [vmem:[%s943_s0 + $0x3c] sm:$0xf]  ;;  %v250_v40 = vmax.bf16 %v416_v24, %v217_v29  ;;  %v417_v41 = vld [vmem:[%s943_s0 + $0x1f0] sm:$0xf]  ;;  %v371_v43 = vld [vmem:[%s943_s0 + $0x138] sm:$0xf] }
  0x2f   :  { %v324_v38 = vld [vmem:[%s943_s0 + $0x7c] sm:$0xf]  ;;  %v153_v42 = vmax.bf16 %v370_v27, %v120_v31  ;;  %299 = vst.msk [vmem:[%s944_s1 + $0x28] sm:$0xf] %vm288_vm0, %v282_v34  ;;  %v402_v46 = vld [vmem:[%s943_s0 + $0x1b4] sm:$0xf] }
  0x30   :  { %v340_v39 = vld [vmem:[%s943_s0 + $0xbc] sm:$0xf]  ;;  %v56_v44 = vmax.bf16 %v324_v38, %v23_v37  ;;  %v218_v45 = vmax.bf16 %v401_v30, %v185_v35  ;;  %v121_v47 = vmax.bf16 %v355_v33, %v88_v36  ;;  %v283_v49 = vmax.bf16 %v432_v25, %v250_v40  ;;  %v433_v50 = vld [vmem:[%s943_s0 + $0x230] sm:$0xf]  ;;  %v387_v52 = vld [vmem:[%s943_s0 + $0x178] sm:$0xf] }
  0x31   :  { %v356_v48 = vld [vmem:[%s943_s0 + $0xfc] sm:$0xf]  ;;  %v186_v51 = vmax.bf16 %v386_v32, %v153_v42  ;;  %v418_v55 = vld [vmem:[%s943_s0 + $0x1f4] sm:$0xf]  ;;  %v403_v59 = vld [vmem:[%s943_s0 + $0x1b8] sm:$0xf] }
  0x32   :  { %v89_v53 = vmax.bf16 %v340_v39, %v56_v44  ;;  %v251_v54 = vmax.bf16 %v417_v41, %v218_v45  ;;  %v154_v56 = vmax.bf16 %v371_v43, %v121_v47  ;;  %v372_v57 = vld [vmem:[%s943_s0 + $0x13c] sm:$0xf]  ;;  %300 = vst.msk [vmem:[%s944_s1 + $0x2c] sm:$0xf] %vm288_vm0, %v283_v49  ;;  %v434_v62 = vld [vmem:[%s943_s0 + $0x234] sm:$0xf] }
  0x33   :  { %v219_v58 = vmax.bf16 %v402_v46, %v186_v51  ;;  %v388_v0 = vld [vmem:[%s943_s0 + $0x17c] sm:$0xf]  ;;  %v419_v2 = vld [vmem:[%s943_s0 + $0x1f8] sm:$0xf] }
  0x34   :  { %v122_v60 = vmax.bf16 %v356_v48, %v89_v53  ;;  %v284_v61 = vmax.bf16 %v433_v50, %v251_v54  ;;  %v187_v63 = vmax.bf16 %v387_v52, %v154_v56  ;;  %v404_v5 = vld [vmem:[%s943_s0 + $0x1bc] sm:$0xf]  ;;  %v435_v7 = vld [vmem:[%s943_s0 + $0x238] sm:$0xf] }
  0x35   :  { %v252_v1 = vmax.bf16 %v418_v55, %v219_v58  ;;  %v420_v10 = vld [vmem:[%s943_s0 + $0x1fc] sm:$0xf] }
  0x36   :  { %v155_v3 = vmax.bf16 %v372_v57, %v122_v60  ;;  %301 = vst.msk [vmem:[%s944_s1 + $0x30] sm:$0xf] %vm288_vm0, %v284_v61  ;;  %v220_v4 = vmax.bf16 %v403_v59, %v187_v63  ;;  %v436_v13 = vld [vmem:[%s943_s0 + $0x23c] sm:$0xf] }
  0x37   :  { %v285_v6 = vmax.bf16 %v434_v62, %v252_v1 }
  0x38   :  { %v188_v8 = vmax.bf16 %v388_v0, %v155_v3  ;;  %v253_v9 = vmax.bf16 %v419_v2, %v220_v4 }
  0x39   :  { %302 = vst.msk [vmem:[%s944_s1 + $0x34] sm:$0xf] %vm288_vm0, %v285_v6 }
  0x3a   :  { %v221_v11 = vmax.bf16 %v404_v5, %v188_v8  ;;  %v286_v12 = vmax.bf16 %v435_v7, %v253_v9 }
  0x3c   :  { %v254_v14 = vmax.bf16 %v420_v10, %v221_v11  ;;  %303 = vst.msk [vmem:[%s944_s1 + $0x38] sm:$0xf] %vm288_vm0, %v286_v12 }
  0x3e   :  { %v287_v15 = vmax.bf16 %v436_v13, %v254_v14 }
  0x40   :  { %304 = vst.msk [vmem:[%s944_s1 + $0x3c] sm:$0xf] %vm288_vm0, %v287_v15 }

// kernel: _lambda_.18
= control target key start
LH: loop header
LB: loop body
LE: loop exit
PB: predicated region body
PF: predicated region fallthrough
CT: control target
= control target key end

     0   :  { %s915_s12 = smov 0   ;;  %s917_s13 = smov 0   ;;  %s999_s0 = inlined_call_operand.vmem [shape: bf16[9,128,16], index: 0, kind: input, shape index: {}]   ;;  %s1000_s1 = inlined_call_operand.vmem [shape: bf16[9,16,128], index: 1, kind: input, shape index: {}]   ;;  %s1001_s2 = inlined_call_operand.vmem [shape: f32[1,128], index: 2, kind: input, shape index: {}]   ;;  %s1002_s3 = inlined_call_operand.vmem [shape: bf16[128,128], index: 3, kind: output, shape index: {}]  }
   0x1   :  { %s919_s14 = smov 0  }
   0x2 LB: > { %s22_s15 = sadd.s32 1, %s888_s13  ;;  %p697_p0 = scmp.ge.s32.totalorder %s892_s14, 1  ;;  %s892_s14 = sphi %s919_s14, %s13_s14   ;;  %s888_s13 = sphi %s917_s13, %s1004_s13   ;;  %s884_s12 = sphi %s915_s12, %s1003_s12  }
   0x3   : > { %p23_p1 = scmp.ge.s32.totalorder %s22_s15, 9  ;;  %p166_p2 = scmp.lt.s32.totalorder %s892_s14, 10 }
   0x5   : > { %s1006_s15 = smov (%p23_p1, %s22_s15), 0  ;;  %p167_p3 = pnand %p697_p0, %p166_p2 }
   0x6   : > { %p200_p4 = scmp.lt.s32.totalorder (!%p167_p3), %s884_s12, 8  ;;  %p702_p5 = scmp.ne.s32.totalorder (!%p167_p3), %s884_s12, 0 }
   0x7   : > { %170 = sbr.rel (%p167_p3) target bundleno = 258 (0x102), region = 32 }
   0xc   : > { %s201_s16 = scalar_select %p200_p4, %s884_s12, 8 }
   0xd   : > { %224 = sbr.rel (%p702_p5) target bundleno = 27 (0x1b), region = 36 }
   0xe   : > { %s742_s17 = sshll.u32 %s201_s16, 6  ;;  %s743_s18 = sshll.u32 %s201_s16, 3 }
   0xf   : > { %s940_s21 = scalar_lea.vmem %s999_s0, %s742_s17  ;;  %s213_s24 = scalar_lea.vmem %s1000_s1, %s743_s18 }
  0x12   : > { %v894_v0 = vmov 0.0  }
  0x13   : > { %225 = vst [vmem:[#allocation2 + $0x30] sm:$0xff] %v894_v0  ;;  %226 = vst [vmem:[#allocation2] sm:$0xff] %v894_v0 }
  0x14   : > { %227 = vst [vmem:[#allocation2 + $0x58] sm:$0xff] %v894_v0  ;;  %228 = vst [vmem:[#allocation2 + $0x18] sm:$0xff] %v894_v0 }
  0x15   : > { %229 = vst [vmem:[#allocation2 + $0x50] sm:$0xff] %v894_v0  ;;  %230 = vst [vmem:[#allocation2 + $0x68] sm:$0xff] %v894_v0 }
  0x16   : > { %231 = vst [vmem:[#allocation2 + $0x8] sm:$0xff] %v894_v0  ;;  %232 = vst [vmem:[#allocation2 + $0x48] sm:$0xff] %v894_v0 }
  0x17   : > { %233 = vst [vmem:[#allocation2 + $0x40] sm:$0xff] %v894_v0  ;;  %234 = vst [vmem:[#allocation2 + $0x20] sm:$0xff] %v894_v0 }
  0x18   : > { %235 = vst [vmem:[#allocation2 + $0x10] sm:$0xff] %v894_v0  ;;  %236 = vst [vmem:[#allocation2 + $0x38] sm:$0xff] %v894_v0 }
  0x19   : > { %237 = vst [vmem:[#allocation2 + $0x60] sm:$0xff] %v894_v0  ;;  %238 = vst [vmem:[#allocation2 + $0x70] sm:$0xff] %v894_v0 }
  0x1a   : > { %239 = vst [vmem:[#allocation2 + $0x78] sm:$0xff] %v894_v0  ;;  %240 = vst [vmem:[#allocation2 + $0x28] sm:$0xff] %v894_v0 }
  0x1b PF: > { %v861_v1 = vld [vmem:[%s213_s24] sm:$0xff]   ;;  %vm321_vm0 = vcmask 130048   ;;  %v864_v4 = vld [vmem:[%s940_s21 + $0x8] sm:$0xff]   ;;  %v866_v6 = vld [vmem:[%s940_s21 + $0x10] sm:$0xff]   ;;  %p720_p6 = scmp.ne.s32.totalorder %s884_s12, 8 }
  0x1c   : > { %v862_v2 = vld [vmem:[%s940_s21] sm:$0xff]   ;;  %816 = vmatprep.subr.bf16.mxu0 %v861_v1  ;;  %834 = vmatprep.subr.bf16.mxu1 %v861_v1  ;;  %v865_v5 = vld [vmem:[%s940_s21 + $0x28] sm:$0xff]   ;;  %v867_v7 = vld [vmem:[%s940_s21 + $0x30] sm:$0xff]  }
  0x1d   : > { %v863_v3 = vld [vmem:[%s940_s21 + $0x20] sm:$0xff]   ;;  %817 = vmatpush3.bf16.msra.mxu0 %v861_v1  ;;  %835 = vmatpush3.bf16.msra.mxu1 %v861_v1  ;;  %v868_v8 = vld [vmem:[%s940_s21 + $0x18] sm:$0xff]   ;;  %v241_v14 = vld [vmem:[#allocation2 + $0x30] sm:$0xff] }
  0x1e   : > { %818 = vmatprep.mubr.msk.bf16.mxu0 %vm321_vm0, %v862_v2  ;;  %826 = vmatprep.mubr.msk.bf16.mxu1 %vm321_vm0, %v863_v3  ;;  %v869_v9 = vld [vmem:[%s940_s21 + $0x38] sm:$0xff]   ;;  %v249_v15 = vld [vmem:[#allocation2 + $0x40] sm:$0xff]  ;;  %v247_v32 = vld [vmem:[#allocation2 + $0x8] sm:$0xff] }
  0x1f   : > { %v243_v10 = vld [vmem:[#allocation2 + $0x58] sm:$0xff]  ;;  %v251_v11 = vld [vmem:[#allocation2 + $0x10] sm:$0xff]  ;;  %v242_v26 = vld [vmem:[#allocation2] sm:$0xff] }
  0x20   : > { %819 = vmatmul.mubr.msk.bf16.vlgmr.msra.gmra.mxu0 %vm321_vm0, %v864_v4  ;;  %827 = vmatmul.mubr.msk.bf16.vlgmr.msra.gmra.mxu1 %vm321_vm0, %v865_v5  ;;  %v244_v20 = vld [vmem:[#allocation2 + $0x18] sm:$0xff]  ;;  %v250_v27 = vld [vmem:[#allocation2 + $0x20] sm:$0xff]  ;;  %v245_v38 = vld [vmem:[#allocation2 + $0x50] sm:$0xff] }
  0x21   : > { %822 = vmatprep.mubr.msk.bf16.mxu0 %vm321_vm0, %v866_v6  ;;  %830 = vmatprep.mubr.msk.bf16.mxu1 %vm321_vm0, %v867_v7  ;;  %v252_v21 = vld [vmem:[#allocation2 + $0x38] sm:$0xff]  ;;  %v253_v39 = vld [vmem:[#allocation2 + $0x60] sm:$0xff]  ;;  %v248_v44 = vld [vmem:[#allocation2 + $0x48] sm:$0xff] }
  0x22   : > { %v255_v33 = vld [vmem:[#allocation2 + $0x78] sm:$0xff]  ;;  %v256_v45 = vld [vmem:[#allocation2 + $0x28] sm:$0xff]  ;;  %v254_v51 = vld [vmem:[#allocation2 + $0x70] sm:$0xff] }
  0x23   : > { %v246_v50 = vld [vmem:[#allocation2 + $0x68] sm:$0xff] }
  0x28   : > { %823 = vmatmul.mubr.msk.bf16.gmra.mxu0 %vm321_vm0, %v868_v8  ;;  %831 = vmatmul.mubr.msk.bf16.gmra.mxu1 %vm321_vm0, %v869_v9 }
  0xe0   : > { %v820_v12 = vpop.f32.mrf.mxu0  ;;  %v828_v13 = vpop.f32.mrf.mxu1 }
  0xe1   : > { %v445_v16 = vadd.f32 %v820_v12, %v243_v10  ;;  %v453_v17 = vadd.f32 %v828_v13, %v251_v11 }
  0xe2   : > { %v380_v18 = vpop.f32.mrf.mxu0  ;;  %v412_v19 = vpop.f32.mrf.mxu1 }
  0xe3   : > { %461 = vst [vmem:[#allocation2 + $0x58] sm:$0xff] %v445_v16  ;;  %469 = vst [vmem:[#allocation2 + $0x10] sm:$0xff] %v453_v17  ;;  %v443_v22 = vadd.f32 %v380_v18, %v241_v14  ;;  %v451_v23 = vadd.f32 %v412_v19, %v249_v15 }
  0xe4   : > { %v821_v24 = vpop.f32.mrf.mxu0  ;;  %v829_v25 = vpop.f32.mrf.mxu1 }
  0xe5   : > { %459 = vst [vmem:[#allocation2 + $0x30] sm:$0xff] %v443_v22  ;;  %467 = vst [vmem:[#allocation2 + $0x40] sm:$0xff] %v451_v23  ;;  %v446_v28 = vadd.f32 %v821_v24, %v244_v20  ;;  %v454_v29 = vadd.f32 %v829_v25, %v252_v21 }
  0xe6   : > { %v383_v30 = vpop.f32.mrf.mxu0  ;;  %v415_v31 = vpop.f32.mrf.mxu1 }
  0xe7   : > { %462 = vst [vmem:[#allocation2 + $0x18] sm:$0xff] %v446_v28  ;;  %470 = vst [vmem:[#allocation2 + $0x38] sm:$0xff] %v454_v29  ;;  %v444_v34 = vadd.f32 %v383_v30, %v242_v26  ;;  %v452_v35 = vadd.f32 %v415_v31, %v250_v27 }
  0xe8   : > { %v824_v36 = vpop.f32.mrf.mxu0  ;;  %v832_v37 = vpop.f32.mrf.mxu1 }
  0xe9   : > { %460 = vst [vmem:[#allocation2] sm:$0xff] %v444_v34  ;;  %468 = vst [vmem:[#allocation2 + $0x20] sm:$0xff] %v452_v35  ;;  %v449_v40 = vadd.f32 %v824_v36, %v247_v32  ;;  %v457_v41 = vadd.f32 %v832_v37, %v255_v33 }
  0xea   : > { %v396_v42 = vpop.f32.mrf.mxu0  ;;  %v428_v43 = vpop.f32.mrf.mxu1 }
  0xeb   : > { %465 = vst [vmem:[#allocation2 + $0x8] sm:$0xff] %v449_v40  ;;  %473 = vst [vmem:[#allocation2 + $0x78] sm:$0xff] %v457_v41  ;;  %v447_v46 = vadd.f32 %v396_v42, %v245_v38  ;;  %v455_v47 = vadd.f32 %v428_v43, %v253_v39 }
  0xec   : > { %v825_v48 = vpop.f32.mrf.mxu0  ;;  %v833_v49 = vpop.f32.mrf.mxu1 }
  0xed   : > { %463 = vst [vmem:[#allocation2 + $0x50] sm:$0xff] %v447_v46  ;;  %471 = vst [vmem:[#allocation2 + $0x60] sm:$0xff] %v455_v47  ;;  %v450_v52 = vadd.f32 %v825_v48, %v248_v44  ;;  %v458_v53 = vadd.f32 %v833_v49, %v256_v45  ;;  %478 = sbr.rel (%p720_p6) target bundleno = 258 (0x102), region = 40 }
  0xee   : > { %v399_v54 = vpop.f32.mrf.mxu0  ;;  %v431_v55 = vpop.f32.mrf.mxu1 }
  0xef   : > { %466 = vst [vmem:[#allocation2 + $0x48] sm:$0xff] %v450_v52  ;;  %474 = vst [vmem:[#allocation2 + $0x28] sm:$0xff] %v458_v53  ;;  %v448_v56 = vadd.f32 %v399_v54, %v246_v50  ;;  %v456_v57 = vadd.f32 %v431_v55, %v254_v51 }
  0xf1   : > { %464 = vst [vmem:[#allocation2 + $0x68] sm:$0xff] %v448_v56  ;;  %472 = vst [vmem:[#allocation2 + $0x70] sm:$0xff] %v456_v57 }
  0xf2   : > { %v479_v58 = vld [vmem:[#allocation2 + $0x30] sm:$0xff]  ;;  %v480_v59 = vld [vmem:[#allocation2] sm:$0xff]  ;;  %v481_v63 = vld [vmem:[#allocation2 + $0x58] sm:$0xff] }
  0xf3   : > { %v721_v60 = vld [vmem:[%s1001_s2] ss:$0 sm:$0xff]  ;;  %v482_v0 = vld [vmem:[#allocation2 + $0x18] sm:$0xff]  ;;  %v485_v6 = vld [vmem:[#allocation2 + $0x8] sm:$0xff] }
  0xf4   : > { %v502_v61 = vadd.f32 %v721_v60, %v479_v58  ;;  %v503_v62 = vadd.f32 %v721_v60, %v480_v59  ;;  %v483_v1 = vld [vmem:[#allocation2 + $0x50] sm:$0xff]  ;;  %v504_v2 = vadd.f32 %v721_v60, %v481_v63  ;;  %v505_v3 = vadd.f32 %v721_v60, %v482_v0  ;;  %v487_v12 = vld [vmem:[#allocation2 + $0x40] sm:$0xff]  ;;  %v490_v19 = vld [vmem:[#allocation2 + $0x38] sm:$0xff] }
  0xf5   : > { %v506_v5 = vadd.f32 %v721_v60, %v483_v1  ;;  %v508_v11 = vadd.f32 %v721_v60, %v485_v6  ;;  %v488_v13 = vld [vmem:[#allocation2 + $0x20] sm:$0xff]  ;;  %v489_v14 = vld [vmem:[#allocation2 + $0x10] sm:$0xff]  ;;  %v510_v24 = vadd.f32 %v721_v60, %v487_v12  ;;  %v493_v30 = vld [vmem:[#allocation2 + $0x78] sm:$0xff]  ;;  %v513_v34 = vadd.f32 %v721_v60, %v490_v19 }
  0xf6   : > { %v486_v7 = vld [vmem:[#allocation2 + $0x48] sm:$0xff]  ;;  %v518_v8 = vmax.f32 %v502_v61, 0.0  ;;  %v519_v9 = vmax.f32 %v503_v62, 0.0  ;;  %v520_v15 = vmax.f32 %v504_v2, 0.0  ;;  %v521_v16 = vmax.f32 %v505_v3, 0.0  ;;  %v491_v20 = vld [vmem:[#allocation2 + $0x60] sm:$0xff] }
  0xf7   : > { %v522_v17 = vmax.f32 %v506_v5, 0.0  ;;  %v509_v18 = vadd.f32 %v721_v60, %v486_v7  ;;  %v524_v23 = vmax.f32 %v508_v11, 0.0  ;;  %v511_v28 = vadd.f32 %v721_v60, %v488_v13  ;;  %v494_v31 = vld [vmem:[#allocation2 + $0x28] sm:$0xff] }
  0xf8   : > { %v484_v4 = vld [vmem:[#allocation2 + $0x68] sm:$0xff]  ;;  %v763_v21 = vpack.c.bf16 %v519_v9, %v518_v8  ;;  %v492_v25 = vld [vmem:[#allocation2 + $0x70] sm:$0xff]  ;;  %v768_v26 = vpack.c.bf16 %v521_v16, %v520_v15  ;;  %v512_v29 = vadd.f32 %v721_v60, %v489_v14  ;;  %v526_v33 = vmax.f32 %v510_v24, 0.0 }
  0xf9   : > { %v507_v10 = vadd.f32 %v721_v60, %v484_v4  ;;  %v525_v27 = vmax.f32 %v509_v18, 0.0  ;;  %v514_v35 = vadd.f32 %v721_v60, %v491_v20  ;;  %v527_v37 = vmax.f32 %v511_v28, 0.0 }
  0xfa   : > { %764 = vst [vmem:[%s1002_s3] sm:$0xff] %v763_v21   ;;  %800 = vst [vmem:[%s1002_s3 + $0x8] sm:$0xff] %v768_v26   ;;  %v528_v38 = vmax.f32 %v512_v29, 0.0  ;;  %v515_v39 = vadd.f32 %v721_v60, %v492_v25  ;;  %v529_v40 = vmax.f32 %v513_v34, 0.0  ;;  %v516_v42 = vadd.f32 %v721_v60, %v493_v30 }
  0xfb   : > { %v523_v22 = vmax.f32 %v507_v10, 0.0  ;;  %v778_v36 = vpack.c.bf16 %v525_v27, %v524_v23  ;;  %v530_v41 = vmax.f32 %v514_v35, 0.0  ;;  %v517_v43 = vadd.f32 %v721_v60, %v494_v31 }
  0xfc   : > { %v783_v44 = vpack.c.bf16 %v527_v37, %v526_v33  ;;  %v531_v45 = vmax.f32 %v515_v39, 0.0  ;;  %v788_v46 = vpack.c.bf16 %v529_v40, %v528_v38  ;;  %v532_v47 = vmax.f32 %v516_v42, 0.0 }
  0xfd   : > { %v773_v32 = vpack.c.bf16 %v523_v22, %v522_v17  ;;  %802 = vst [vmem:[%s1002_s3 + $0x18] sm:$0xff] %v778_v36   ;;  %v533_v48 = vmax.f32 %v517_v43, 0.0 }
  0xfe   : > { %803 = vst [vmem:[%s1002_s3 + $0x20] sm:$0xff] %v783_v44   ;;  %v793_v49 = vpack.c.bf16 %v531_v45, %v530_v41  ;;  %804 = vst [vmem:[%s1002_s3 + $0x28] sm:$0xff] %v788_v46  }
  0xff   : > { %801 = vst [vmem:[%s1002_s3 + $0x10] sm:$0xff] %v773_v32   ;;  %v798_v50 = vpack.c.bf16 %v533_v48, %v532_v47 }
 0x100   : > { %805 = vst [vmem:[%s1002_s3 + $0x30] sm:$0xff] %v793_v49  }
 0x101   : > { %806 = vst [vmem:[%s1002_s3 + $0x38] sm:$0xff] %v798_v50  }
 0x102 PF: > { %s13_s14 = sadd.s32 1, %s892_s14   ;;  %s1003_s12 = smov %s888_s13 }
 0x103   : > { %p10_p7 = scmp.ge.s32.totalorder %s13_s14, 11   ;;  %s1004_s13 = smov %s1006_s15 }
 0x105   :  { %12 = sbr.rel (!%p10_p7) target bundleno = 2 (0x2), region = 73 }

// kernel: _lambda_.19
= control target key start
LH: loop header
LB: loop body
LE: loop exit
PB: predicated region body
PF: predicated region fallthrough
CT: control target
= control target key end

     0   :  { %s931_s12 = smov 0   ;;  %s933_s13 = smov 0   ;;  %s1015_s0 = inlined_call_operand.vmem [shape: bf16[9,128,24], index: 0, kind: input, shape index: {}]   ;;  %s1016_s1 = inlined_call_operand.vmem [shape: bf16[9,24,128], index: 1, kind: input, shape index: {}]   ;;  %s1017_s2 = inlined_call_operand.vmem [shape: f32[1,128], index: 2, kind: input, shape index: {}]   ;;  %s1018_s3 = inlined_call_operand.vmem [shape: bf16[128,128], index: 3, kind: output, shape index: {}]  }
   0x1   :  { %s935_s14 = smov 0  }
   0x2 LB: > { %s22_s15 = sadd.s32 1, %s904_s13  ;;  %p705_p0 = scmp.ge.s32.totalorder %s908_s14, 1  ;;  %s908_s14 = sphi %s935_s14, %s13_s14   ;;  %s904_s13 = sphi %s933_s13, %s1020_s13   ;;  %s900_s12 = sphi %s931_s12, %s1019_s12  }
   0x3   : > { %p23_p1 = scmp.ge.s32.totalorder %s22_s15, 9  ;;  %p166_p2 = scmp.lt.s32.totalorder %s908_s14, 10 }
   0x5   : > { %s1022_s15 = smov (%p23_p1, %s22_s15), 0  ;;  %p167_p3 = pnand %p705_p0, %p166_p2 }
   0x6   : > { %p200_p4 = scmp.lt.s32.totalorder (!%p167_p3), %s900_s12, 8  ;;  %p709_p5 = scmp.ne.s32.totalorder (!%p167_p3), %s900_s12, 0 }
   0x7   : > { %170 = sbr.rel (%p167_p3) target bundleno = 262 (0x106), region = 32 }
   0xc   : > { %s201_s16 = scalar_select %p200_p4, %s900_s12, 8 }
   0xd   : > { %224 = sbr.rel (%p709_p5) target bundleno = 27 (0x1b), region = 36 }
   0xe   : > { %s750_s17 = sshll.u32 %s201_s16, 6  ;;  %s850_s18 = smul.u32 12, %s201_s16 }
   0xf   : > { %s956_s21 = scalar_lea.vmem %s1015_s0, %s750_s17 }
  0x10   : > { %s213_s24 = scalar_lea.vmem %s1016_s1, %s850_s18 }
  0x12   : > { %v910_v0 = vmov 0.0  }
  0x13   : > { %225 = vst [vmem:[#allocation2 + $0x30] sm:$0xff] %v910_v0  ;;  %226 = vst [vmem:[#allocation2] sm:$0xff] %v910_v0 }
  0x14   : > { %227 = vst [vmem:[#allocation2 + $0x58] sm:$0xff] %v910_v0  ;;  %228 = vst [vmem:[#allocation2 + $0x18] sm:$0xff] %v910_v0 }
  0x15   : > { %229 = vst [vmem:[#allocation2 + $0x50] sm:$0xff] %v910_v0  ;;  %230 = vst [vmem:[#allocation2 + $0x68] sm:$0xff] %v910_v0 }
  0x16   : > { %231 = vst [vmem:[#allocation2 + $0x8] sm:$0xff] %v910_v0  ;;  %232 = vst [vmem:[#allocation2 + $0x48] sm:$0xff] %v910_v0 }
  0x17   : > { %233 = vst [vmem:[#allocation2 + $0x40] sm:$0xff] %v910_v0  ;;  %234 = vst [vmem:[#allocation2 + $0x20] sm:$0xff] %v910_v0 }
  0x18   : > { %235 = vst [vmem:[#allocation2 + $0x10] sm:$0xff] %v910_v0  ;;  %236 = vst [vmem:[#allocation2 + $0x38] sm:$0xff] %v910_v0 }
  0x19   : > { %237 = vst [vmem:[#allocation2 + $0x60] sm:$0xff] %v910_v0  ;;  %238 = vst [vmem:[#allocation2 + $0x70] sm:$0xff] %v910_v0 }
  0x1a   : > { %239 = vst [vmem:[#allocation2 + $0x78] sm:$0xff] %v910_v0  ;;  %240 = vst [vmem:[#allocation2 + $0x28] sm:$0xff] %v910_v0 }
  0x1b PF: > { %v876_v1 = vld [vmem:[%s213_s24 + $0x8] ss:$0 sps:$4 sm:$0xff]   ;;  %vm350_vm0 = vcmask 1043456   ;;  %v877_v2 = vld [vmem:[%s213_s24] sm:$0xff]   ;;  %vm325_vm1 = vcmask 195584   ;;  %v882_v8 = vld [vmem:[%s956_s21 + $0x10] sm:$0xff]  }
  0x1c   : > { %848 = vmatprep.subr.msk.bf16.mxu0 %vm350_vm0, %v876_v1  ;;  %849 = vmatprep.subr.msk.bf16.mxu1 %vm350_vm0, %v876_v1  ;;  %v352_v3 = vsel %vm350_vm0, %v876_v1, 0  ;;  %v878_v4 = vld [vmem:[%s956_s21] sm:$0xff]   ;;  %v880_v6 = vld [vmem:[%s956_s21 + $0x8] sm:$0xff]   ;;  %v883_v9 = vld [vmem:[%s956_s21 + $0x30] sm:$0xff]   ;;  %p728_p6 = scmp.ne.s32.totalorder %s900_s12, 8 }
  0x1d   : > { %v879_v5 = vld [vmem:[%s956_s21 + $0x20] sm:$0xff]   ;;  %825 = vmatpush3.bf16.msra.mxu0 %v352_v3  ;;  %846 = vmatpush3.bf16.msra.mxu1 %v352_v3  ;;  %v881_v7 = vld [vmem:[%s956_s21 + $0x28] sm:$0xff]   ;;  %v884_v10 = vld [vmem:[%s956_s21 + $0x18] sm:$0xff]  }
  0x1e   : > { %826 = vmatprep.subr.bf16.mxu0 %v877_v2  ;;  %845 = vmatprep.subr.bf16.mxu1 %v877_v2  ;;  %v885_v11 = vld [vmem:[%s956_s21 + $0x38] sm:$0xff]   ;;  %v241_v16 = vld [vmem:[#allocation2 + $0x30] sm:$0xff]  ;;  %v249_v17 = vld [vmem:[#allocation2 + $0x40] sm:$0xff] }
  0x1f   : > { %828 = vmatprep.mubr.msk.bf16.mxu0 %vm325_vm1, %v878_v4  ;;  %836 = vmatprep.mubr.msk.bf16.mxu1 %vm325_vm1, %v879_v5  ;;  %v243_v12 = vld [vmem:[#allocation2 + $0x58] sm:$0xff]  ;;  %v251_v13 = vld [vmem:[#allocation2 + $0x10] sm:$0xff]  ;;  %v242_v28 = vld [vmem:[#allocation2] sm:$0xff] }
  0x20   : > { %v244_v22 = vld [vmem:[#allocation2 + $0x18] sm:$0xff]  ;;  %v250_v29 = vld [vmem:[#allocation2 + $0x20] sm:$0xff]  ;;  %v247_v34 = vld [vmem:[#allocation2 + $0x8] sm:$0xff] }
  0x21   : > { %827 = vmatpush3.bf16.msra.mxu0 %v877_v2  ;;  %847 = vmatpush3.bf16.msra.mxu1 %v877_v2  ;;  %v252_v23 = vld [vmem:[#allocation2 + $0x38] sm:$0xff]  ;;  %v245_v40 = vld [vmem:[#allocation2 + $0x50] sm:$0xff]  ;;  %v253_v41 = vld [vmem:[#allocation2 + $0x60] sm:$0xff] }
  0x22   : > { %v255_v35 = vld [vmem:[#allocation2 + $0x78] sm:$0xff]  ;;  %v248_v46 = vld [vmem:[#allocation2 + $0x48] sm:$0xff]  ;;  %v254_v53 = vld [vmem:[#allocation2 + $0x70] sm:$0xff] }
  0x23   : > { %v256_v47 = vld [vmem:[#allocation2 + $0x28] sm:$0xff] }
  0x24   : > { %829 = vmatmul.mubr.msk.bf16.vlgmr.msra.gmra.mxu0 %vm325_vm1, %v880_v6  ;;  %837 = vmatmul.mubr.msk.bf16.vlgmr.msra.gmra.mxu1 %vm325_vm1, %v881_v7  ;;  %v246_v52 = vld [vmem:[#allocation2 + $0x68] sm:$0xff] }
  0x25   : > { %832 = vmatprep.mubr.msk.bf16.mxu0 %vm325_vm1, %v882_v8  ;;  %840 = vmatprep.mubr.msk.bf16.mxu1 %vm325_vm1, %v883_v9 }
  0x2c   : > { %833 = vmatmul.mubr.msk.bf16.gmra.mxu0 %vm325_vm1, %v884_v10  ;;  %841 = vmatmul.mubr.msk.bf16.gmra.mxu1 %vm325_vm1, %v885_v11 }
  0xe4   : > { %v830_v14 = vpop.f32.mrf.mxu0  ;;  %v838_v15 = vpop.f32.mrf.mxu1 }
  0xe5   : > { %v453_v18 = vadd.f32 %v830_v14, %v243_v12  ;;  %v461_v19 = vadd.f32 %v838_v15, %v251_v13 }
  0xe6   : > { %v388_v20 = vpop.f32.mrf.mxu0  ;;  %v420_v21 = vpop.f32.mrf.mxu1 }
  0xe7   : > { %469 = vst [vmem:[#allocation2 + $0x58] sm:$0xff] %v453_v18  ;;  %477 = vst [vmem:[#allocation2 + $0x10] sm:$0xff] %v461_v19  ;;  %v451_v24 = vadd.f32 %v388_v20, %v241_v16  ;;  %v459_v25 = vadd.f32 %v420_v21, %v249_v17 }
  0xe8   : > { %v831_v26 = vpop.f32.mrf.mxu0  ;;  %v839_v27 = vpop.f32.mrf.mxu1 }
  0xe9   : > { %467 = vst [vmem:[#allocation2 + $0x30] sm:$0xff] %v451_v24  ;;  %475 = vst [vmem:[#allocation2 + $0x40] sm:$0xff] %v459_v25  ;;  %v454_v30 = vadd.f32 %v831_v26, %v244_v22  ;;  %v462_v31 = vadd.f32 %v839_v27, %v252_v23 }
  0xea   : > { %v391_v32 = vpop.f32.mrf.mxu0  ;;  %v423_v33 = vpop.f32.mrf.mxu1 }
  0xeb   : > { %470 = vst [vmem:[#allocation2 + $0x18] sm:$0xff] %v454_v30  ;;  %478 = vst [vmem:[#allocation2 + $0x38] sm:$0xff] %v462_v31  ;;  %v452_v36 = vadd.f32 %v391_v32, %v242_v28  ;;  %v460_v37 = vadd.f32 %v423_v33, %v250_v29 }
  0xec   : > { %v834_v38 = vpop.f32.mrf.mxu0  ;;  %v842_v39 = vpop.f32.mrf.mxu1 }
  0xed   : > { %468 = vst [vmem:[#allocation2] sm:$0xff] %v452_v36  ;;  %476 = vst [vmem:[#allocation2 + $0x20] sm:$0xff] %v460_v37  ;;  %v457_v42 = vadd.f32 %v834_v38, %v247_v34  ;;  %v465_v43 = vadd.f32 %v842_v39, %v255_v35 }
  0xee   : > { %v404_v44 = vpop.f32.mrf.mxu0  ;;  %v436_v45 = vpop.f32.mrf.mxu1 }
  0xef   : > { %473 = vst [vmem:[#allocation2 + $0x8] sm:$0xff] %v457_v42  ;;  %481 = vst [vmem:[#allocation2 + $0x78] sm:$0xff] %v465_v43  ;;  %v455_v48 = vadd.f32 %v404_v44, %v245_v40  ;;  %v463_v49 = vadd.f32 %v436_v45, %v253_v41 }
  0xf0   : > { %v835_v50 = vpop.f32.mrf.mxu0  ;;  %v843_v51 = vpop.f32.mrf.mxu1 }
  0xf1   : > { %471 = vst [vmem:[#allocation2 + $0x50] sm:$0xff] %v455_v48  ;;  %479 = vst [vmem:[#allocation2 + $0x60] sm:$0xff] %v463_v49  ;;  %v458_v54 = vadd.f32 %v835_v50, %v248_v46  ;;  %v466_v55 = vadd.f32 %v843_v51, %v256_v47  ;;  %486 = sbr.rel (%p728_p6) target bundleno = 262 (0x106), region = 40 }
  0xf2   : > { %v407_v56 = vpop.f32.mrf.mxu0  ;;  %v439_v57 = vpop.f32.mrf.mxu1 }
  0xf3   : > { %474 = vst [vmem:[#allocation2 + $0x48] sm:$0xff] %v458_v54  ;;  %482 = vst [vmem:[#allocation2 + $0x28] sm:$0xff] %v466_v55  ;;  %v456_v58 = vadd.f32 %v407_v56, %v246_v52  ;;  %v464_v59 = vadd.f32 %v439_v57, %v254_v53 }
  0xf5   : > { %472 = vst [vmem:[#allocation2 + $0x68] sm:$0xff] %v456_v58  ;;  %480 = vst [vmem:[#allocation2 + $0x70] sm:$0xff] %v464_v59 }
  0xf6   : > { %v487_v60 = vld [vmem:[#allocation2 + $0x30] sm:$0xff]  ;;  %v488_v61 = vld [vmem:[#allocation2] sm:$0xff]  ;;  %v489_v1 = vld [vmem:[#allocation2 + $0x58] sm:$0xff] }
  0xf7   : > { %v729_v62 = vld [vmem:[%s1017_s2] ss:$0 sm:$0xff]  ;;  %v490_v2 = vld [vmem:[#allocation2 + $0x18] sm:$0xff]  ;;  %v493_v8 = vld [vmem:[#allocation2 + $0x8] sm:$0xff] }
  0xf8   : > { %v510_v63 = vadd.f32 %v729_v62, %v487_v60  ;;  %v511_v0 = vadd.f32 %v729_v62, %v488_v61  ;;  %v491_v3 = vld [vmem:[#allocation2 + $0x50] sm:$0xff]  ;;  %v512_v4 = vadd.f32 %v729_v62, %v489_v1  ;;  %v513_v5 = vadd.f32 %v729_v62, %v490_v2  ;;  %v495_v14 = vld [vmem:[#allocation2 + $0x40] sm:$0xff]  ;;  %v498_v21 = vld [vmem:[#allocation2 + $0x38] sm:$0xff] }
  0xf9   : > { %v514_v7 = vadd.f32 %v729_v62, %v491_v3  ;;  %v516_v13 = vadd.f32 %v729_v62, %v493_v8  ;;  %v496_v15 = vld [vmem:[#allocation2 + $0x20] sm:$0xff]  ;;  %v497_v16 = vld [vmem:[#allocation2 + $0x10] sm:$0xff]  ;;  %v518_v26 = vadd.f32 %v729_v62, %v495_v14  ;;  %v501_v32 = vld [vmem:[#allocation2 + $0x78] sm:$0xff]  ;;  %v521_v36 = vadd.f32 %v729_v62, %v498_v21 }
  0xfa   : > { %v494_v9 = vld [vmem:[#allocation2 + $0x48] sm:$0xff]  ;;  %v526_v10 = vmax.f32 %v510_v63, 0.0  ;;  %v527_v11 = vmax.f32 %v511_v0, 0.0  ;;  %v528_v17 = vmax.f32 %v512_v4, 0.0  ;;  %v529_v18 = vmax.f32 %v513_v5, 0.0  ;;  %v499_v22 = vld [vmem:[#allocation2 + $0x60] sm:$0xff] }
  0xfb   : > { %v530_v19 = vmax.f32 %v514_v7, 0.0  ;;  %v517_v20 = vadd.f32 %v729_v62, %v494_v9  ;;  %v532_v25 = vmax.f32 %v516_v13, 0.0  ;;  %v519_v30 = vadd.f32 %v729_v62, %v496_v15  ;;  %v502_v33 = vld [vmem:[#allocation2 + $0x28] sm:$0xff] }
  0xfc   : > { %v492_v6 = vld [vmem:[#allocation2 + $0x68] sm:$0xff]  ;;  %v770_v23 = vpack.c.bf16 %v527_v11, %v526_v10  ;;  %v500_v27 = vld [vmem:[#allocation2 + $0x70] sm:$0xff]  ;;  %v775_v28 = vpack.c.bf16 %v529_v18, %v528_v17  ;;  %v520_v31 = vadd.f32 %v729_v62, %v497_v16  ;;  %v534_v35 = vmax.f32 %v518_v26, 0.0 }
  0xfd   : > { %v515_v12 = vadd.f32 %v729_v62, %v492_v6  ;;  %v533_v29 = vmax.f32 %v517_v20, 0.0  ;;  %v522_v37 = vadd.f32 %v729_v62, %v499_v22  ;;  %v535_v39 = vmax.f32 %v519_v30, 0.0 }
  0xfe   : > { %771 = vst [vmem:[%s1018_s3] sm:$0xff] %v770_v23   ;;  %807 = vst [vmem:[%s1018_s3 + $0x8] sm:$0xff] %v775_v28   ;;  %v536_v40 = vmax.f32 %v520_v31, 0.0  ;;  %v523_v41 = vadd.f32 %v729_v62, %v500_v27  ;;  %v537_v42 = vmax.f32 %v521_v36, 0.0  ;;  %v524_v44 = vadd.f32 %v729_v62, %v501_v32 }
  0xff   : > { %v531_v24 = vmax.f32 %v515_v12, 0.0  ;;  %v785_v38 = vpack.c.bf16 %v533_v29, %v532_v25  ;;  %v538_v43 = vmax.f32 %v522_v37, 0.0  ;;  %v525_v45 = vadd.f32 %v729_v62, %v502_v33 }
 0x100   : > { %v790_v46 = vpack.c.bf16 %v535_v39, %v534_v35  ;;  %v539_v47 = vmax.f32 %v523_v41, 0.0  ;;  %v795_v48 = vpack.c.bf16 %v537_v42, %v536_v40  ;;  %v540_v49 = vmax.f32 %v524_v44, 0.0 }
 0x101   : > { %v780_v34 = vpack.c.bf16 %v531_v24, %v530_v19  ;;  %809 = vst [vmem:[%s1018_s3 + $0x18] sm:$0xff] %v785_v38   ;;  %v541_v50 = vmax.f32 %v525_v45, 0.0 }
 0x102   : > { %810 = vst [vmem:[%s1018_s3 + $0x20] sm:$0xff] %v790_v46   ;;  %v800_v51 = vpack.c.bf16 %v539_v47, %v538_v43  ;;  %811 = vst [vmem:[%s1018_s3 + $0x28] sm:$0xff] %v795_v48  }
 0x103   : > { %808 = vst [vmem:[%s1018_s3 + $0x10] sm:$0xff] %v780_v34   ;;  %v805_v52 = vpack.c.bf16 %v541_v50, %v540_v49 }
 0x104   : > { %812 = vst [vmem:[%s1018_s3 + $0x30] sm:$0xff] %v800_v51  }
 0x105   : > { %813 = vst [vmem:[%s1018_s3 + $0x38] sm:$0xff] %v805_v52  }
 0x106 PF: > { %s13_s14 = sadd.s32 1, %s908_s14   ;;  %s1019_s12 = smov %s904_s13 }
 0x107   : > { %p10_p7 = scmp.ge.s32.totalorder %s13_s14, 11   ;;  %s1020_s13 = smov %s1022_s15 }
 0x109   :  { %12 = sbr.rel (!%p10_p7) target bundleno = 2 (0x2), region = 73 }

// kernel: _lambda_.20
= control target key start
LH: loop header
LB: loop body
LE: loop exit
PB: predicated region body
PF: predicated region fallthrough
CT: control target
= control target key end

     0   :  { %s907_s12 = smov 0   ;;  %s909_s13 = smov 0   ;;  %s991_s0 = inlined_call_operand.vmem [shape: bf16[9,128,8], index: 0, kind: input, shape index: {}]   ;;  %s992_s1 = inlined_call_operand.vmem [shape: bf16[9,8,128], index: 1, kind: input, shape index: {}]   ;;  %s993_s2 = inlined_call_operand.vmem [shape: f32[1,128], index: 2, kind: input, shape index: {}]   ;;  %s994_s3 = inlined_call_operand.vmem [shape: bf16[128,128], index: 3, kind: output, shape index: {}]  }
   0x1   :  { %s911_s14 = smov 0  }
   0x2 LB: > { %s22_s15 = sadd.s32 1, %s880_s13  ;;  %p691_p0 = scmp.ge.s32.totalorder %s884_s14, 1  ;;  %s884_s14 = sphi %s911_s14, %s13_s14   ;;  %s880_s13 = sphi %s909_s13, %s996_s13   ;;  %s876_s12 = sphi %s907_s12, %s995_s12  }
   0x3   : > { %p23_p1 = scmp.ge.s32.totalorder %s22_s15, 9  ;;  %p165_p2 = scmp.lt.s32.totalorder %s884_s14, 10 }
   0x5   : > { %s998_s15 = smov (%p23_p1, %s22_s15), 0  ;;  %p166_p3 = pnand %p691_p0, %p165_p2 }
   0x6   : > { %p198_p4 = scmp.lt.s32.totalorder (!%p166_p3), %s876_s12, 8  ;;  %p695_p5 = scmp.ne.s32.totalorder (!%p166_p3), %s876_s12, 0 }
   0x7   : > { %169 = sbr.rel (%p166_p3) target bundleno = 258 (0x102), region = 32 }
   0xc   : > { %s199_s16 = scalar_select %p198_p4, %s876_s12, 8 }
   0xd   : > { %221 = sbr.rel (%p695_p5) target bundleno = 27 (0x1b), region = 36 }
   0xe   : > { %s734_s17 = sshll.u32 %s199_s16, 6  ;;  %s694_s18 = sshll.u32 %s199_s16, 2 }
   0xf   : > { %s932_s21 = scalar_lea.vmem %s991_s0, %s734_s17  ;;  %s210_s24 = scalar_lea.vmem %s992_s1, %s694_s18 }
  0x12   : > { %v886_v0 = vmov 0.0  }
  0x13   : > { %222 = vst [vmem:[#allocation2 + $0x30] sm:$0xff] %v886_v0  ;;  %223 = vst [vmem:[#allocation2] sm:$0xff] %v886_v0 }
  0x14   : > { %224 = vst [vmem:[#allocation2 + $0x58] sm:$0xff] %v886_v0  ;;  %225 = vst [vmem:[#allocation2 + $0x18] sm:$0xff] %v886_v0 }
  0x15   : > { %226 = vst [vmem:[#allocation2 + $0x50] sm:$0xff] %v886_v0  ;;  %227 = vst [vmem:[#allocation2 + $0x68] sm:$0xff] %v886_v0 }
  0x16   : > { %228 = vst [vmem:[#allocation2 + $0x8] sm:$0xff] %v886_v0  ;;  %229 = vst [vmem:[#allocation2 + $0x48] sm:$0xff] %v886_v0 }
  0x17   : > { %230 = vst [vmem:[#allocation2 + $0x40] sm:$0xff] %v886_v0  ;;  %231 = vst [vmem:[#allocation2 + $0x20] sm:$0xff] %v886_v0 }
  0x18   : > { %232 = vst [vmem:[#allocation2 + $0x10] sm:$0xff] %v886_v0  ;;  %233 = vst [vmem:[#allocation2 + $0x38] sm:$0xff] %v886_v0 }
  0x19   : > { %234 = vst [vmem:[#allocation2 + $0x60] sm:$0xff] %v886_v0  ;;  %235 = vst [vmem:[#allocation2 + $0x70] sm:$0xff] %v886_v0 }
  0x1a   : > { %236 = vst [vmem:[#allocation2 + $0x78] sm:$0xff] %v886_v0  ;;  %237 = vst [vmem:[#allocation2 + $0x28] sm:$0xff] %v886_v0 }
  0x1b PF: > { %v270_v1 = vld [vmem:[%s210_s24] sm:$0xf]  ;;  %vm336_vm0 = vcmask 1043456   ;;  %vm311_vm1 = vcmask 64512   ;;  %v856_v5 = vld [vmem:[%s932_s21 + $0x8] sm:$0xff]   ;;  %v858_v7 = vld [vmem:[%s932_s21 + $0x10] sm:$0xff]  }
  0x1c   : > { %v854_v2 = vld [vmem:[%s932_s21] sm:$0xff]   ;;  %827 = vmatprep.subr.msk.bf16.mxu0 %vm336_vm0, %v270_v1  ;;  %828 = vmatprep.subr.msk.bf16.mxu1 %vm336_vm0, %v270_v1  ;;  %v338_v3 = vsel %vm336_vm0, %v270_v1, 0  ;;  %v857_v6 = vld [vmem:[%s932_s21 + $0x28] sm:$0xff]   ;;  %v859_v8 = vld [vmem:[%s932_s21 + $0x30] sm:$0xff]   ;;  %p712_p6 = scmp.ne.s32.totalorder %s876_s12, 8 }
  0x1d   : > { %808 = vmatpush3.bf16.msra.mxu0 %v338_v3  ;;  %826 = vmatpush3.bf16.msra.mxu1 %v338_v3  ;;  %v855_v4 = vld [vmem:[%s932_s21 + $0x20] sm:$0xff]   ;;  %v860_v9 = vld [vmem:[%s932_s21 + $0x18] sm:$0xff]   ;;  %v238_v14 = vld [vmem:[#allocation2 + $0x30] sm:$0xff] }
  0x1e   : > { %809 = vmatprep.mubr.msk.bf16.mxu0 %vm311_vm1, %v854_v2  ;;  %817 = vmatprep.mubr.msk.bf16.mxu1 %vm311_vm1, %v855_v4  ;;  %v861_v10 = vld [vmem:[%s932_s21 + $0x38] sm:$0xff]   ;;  %v246_v17 = vld [vmem:[#allocation2 + $0x40] sm:$0xff]  ;;  %v244_v32 = vld [vmem:[#allocation2 + $0x8] sm:$0xff] }
  0x1f   : > { %v240_v11 = vld [vmem:[#allocation2 + $0x58] sm:$0xff]  ;;  %v248_v12 = vld [vmem:[#allocation2 + $0x10] sm:$0xff]  ;;  %v239_v26 = vld [vmem:[#allocation2] sm:$0xff] }
  0x20   : > { %810 = vmatmul.mubr.msk.bf16.vlgmr.msra.gmra.mxu0 %vm311_vm1, %v856_v5  ;;  %818 = vmatmul.mubr.msk.bf16.vlgmr.msra.gmra.mxu1 %vm311_vm1, %v857_v6  ;;  %v241_v20 = vld [vmem:[#allocation2 + $0x18] sm:$0xff]  ;;  %v247_v29 = vld [vmem:[#allocation2 + $0x20] sm:$0xff]  ;;  %v242_v38 = vld [vmem:[#allocation2 + $0x50] sm:$0xff] }
  0x21   : > { %813 = vmatprep.mubr.msk.bf16.mxu0 %vm311_vm1, %v858_v7  ;;  %821 = vmatprep.mubr.msk.bf16.mxu1 %vm311_vm1, %v859_v8  ;;  %v249_v23 = vld [vmem:[#allocation2 + $0x38] sm:$0xff]  ;;  %v250_v41 = vld [vmem:[#allocation2 + $0x60] sm:$0xff]  ;;  %v245_v44 = vld [vmem:[#allocation2 + $0x48] sm:$0xff] }
  0x22   : > { %v252_v35 = vld [vmem:[#allocation2 + $0x78] sm:$0xff]  ;;  %v253_v47 = vld [vmem:[#allocation2 + $0x28] sm:$0xff]  ;;  %v251_v53 = vld [vmem:[#allocation2 + $0x70] sm:$0xff] }
  0x23   : > { %v243_v50 = vld [vmem:[#allocation2 + $0x68] sm:$0xff] }
  0x28   : > { %814 = vmatmul.mubr.msk.bf16.gmra.mxu0 %vm311_vm1, %v860_v9  ;;  %822 = vmatmul.mubr.msk.bf16.gmra.mxu1 %vm311_vm1, %v861_v10 }
  0xe0   : > { %v811_v13 = vpop.f32.mrf.mxu0  ;;  %v819_v16 = vpop.f32.mrf.mxu1 }
  0xe1   : > { %v439_v15 = vadd.f32 %v811_v13, %v240_v11  ;;  %v447_v18 = vadd.f32 %v819_v16, %v248_v12 }
  0xe2   : > { %v374_v19 = vpop.f32.mrf.mxu0  ;;  %v406_v22 = vpop.f32.mrf.mxu1 }
  0xe3   : > { %455 = vst [vmem:[#allocation2 + $0x58] sm:$0xff] %v439_v15  ;;  %v437_v21 = vadd.f32 %v374_v19, %v238_v14  ;;  %463 = vst [vmem:[#allocation2 + $0x10] sm:$0xff] %v447_v18  ;;  %v445_v24 = vadd.f32 %v406_v22, %v246_v17 }
  0xe4   : > { %v812_v25 = vpop.f32.mrf.mxu0  ;;  %v820_v28 = vpop.f32.mrf.mxu1 }
  0xe5   : > { %453 = vst [vmem:[#allocation2 + $0x30] sm:$0xff] %v437_v21  ;;  %v440_v27 = vadd.f32 %v812_v25, %v241_v20  ;;  %461 = vst [vmem:[#allocation2 + $0x40] sm:$0xff] %v445_v24  ;;  %v448_v30 = vadd.f32 %v820_v28, %v249_v23 }
  0xe6   : > { %v377_v31 = vpop.f32.mrf.mxu0  ;;  %v409_v34 = vpop.f32.mrf.mxu1 }
  0xe7   : > { %456 = vst [vmem:[#allocation2 + $0x18] sm:$0xff] %v440_v27  ;;  %v438_v33 = vadd.f32 %v377_v31, %v239_v26  ;;  %464 = vst [vmem:[#allocation2 + $0x38] sm:$0xff] %v448_v30  ;;  %v446_v36 = vadd.f32 %v409_v34, %v247_v29 }
  0xe8   : > { %v815_v37 = vpop.f32.mrf.mxu0  ;;  %v823_v40 = vpop.f32.mrf.mxu1 }
  0xe9   : > { %454 = vst [vmem:[#allocation2] sm:$0xff] %v438_v33  ;;  %v443_v39 = vadd.f32 %v815_v37, %v244_v32  ;;  %462 = vst [vmem:[#allocation2 + $0x20] sm:$0xff] %v446_v36  ;;  %v451_v42 = vadd.f32 %v823_v40, %v252_v35 }
  0xea   : > { %v390_v43 = vpop.f32.mrf.mxu0  ;;  %v422_v46 = vpop.f32.mrf.mxu1 }
  0xeb   : > { %459 = vst [vmem:[#allocation2 + $0x8] sm:$0xff] %v443_v39  ;;  %v441_v45 = vadd.f32 %v390_v43, %v242_v38  ;;  %467 = vst [vmem:[#allocation2 + $0x78] sm:$0xff] %v451_v42  ;;  %v449_v48 = vadd.f32 %v422_v46, %v250_v41 }
  0xec   : > { %v816_v49 = vpop.f32.mrf.mxu0  ;;  %v824_v52 = vpop.f32.mrf.mxu1 }
  0xed   : > { %457 = vst [vmem:[#allocation2 + $0x50] sm:$0xff] %v441_v45  ;;  %v444_v51 = vadd.f32 %v816_v49, %v245_v44  ;;  %465 = vst [vmem:[#allocation2 + $0x60] sm:$0xff] %v449_v48  ;;  %v452_v54 = vadd.f32 %v824_v52, %v253_v47  ;;  %472 = sbr.rel (%p712_p6) target bundleno = 258 (0x102), region = 40 }
  0xee   : > { %v393_v55 = vpop.f32.mrf.mxu0  ;;  %v425_v57 = vpop.f32.mrf.mxu1 }
  0xef   : > { %460 = vst [vmem:[#allocation2 + $0x48] sm:$0xff] %v444_v51  ;;  %v442_v56 = vadd.f32 %v393_v55, %v243_v50  ;;  %468 = vst [vmem:[#allocation2 + $0x28] sm:$0xff] %v452_v54  ;;  %v450_v58 = vadd.f32 %v425_v57, %v251_v53 }
  0xf1   : > { %458 = vst [vmem:[#allocation2 + $0x68] sm:$0xff] %v442_v56  ;;  %466 = vst [vmem:[#allocation2 + $0x70] sm:$0xff] %v450_v58 }
  0xf2   : > { %v473_v59 = vld [vmem:[#allocation2 + $0x30] sm:$0xff]  ;;  %v474_v60 = vld [vmem:[#allocation2] sm:$0xff]  ;;  %v475_v0 = vld [vmem:[#allocation2 + $0x58] sm:$0xff] }
  0xf3   : > { %v713_v61 = vld [vmem:[%s993_s2] ss:$0 sm:$0xff]  ;;  %v476_v1 = vld [vmem:[#allocation2 + $0x18] sm:$0xff]  ;;  %v479_v7 = vld [vmem:[#allocation2 + $0x8] sm:$0xff] }
  0xf4   : > { %v496_v62 = vadd.f32 %v713_v61, %v473_v59  ;;  %v497_v63 = vadd.f32 %v713_v61, %v474_v60  ;;  %v477_v2 = vld [vmem:[#allocation2 + $0x50] sm:$0xff]  ;;  %v498_v3 = vadd.f32 %v713_v61, %v475_v0  ;;  %v499_v4 = vadd.f32 %v713_v61, %v476_v1  ;;  %v481_v13 = vld [vmem:[#allocation2 + $0x40] sm:$0xff]  ;;  %v484_v20 = vld [vmem:[#allocation2 + $0x38] sm:$0xff] }
  0xf5   : > { %v500_v6 = vadd.f32 %v713_v61, %v477_v2  ;;  %v502_v12 = vadd.f32 %v713_v61, %v479_v7  ;;  %v482_v14 = vld [vmem:[#allocation2 + $0x20] sm:$0xff]  ;;  %v483_v15 = vld [vmem:[#allocation2 + $0x10] sm:$0xff]  ;;  %v504_v25 = vadd.f32 %v713_v61, %v481_v13  ;;  %v487_v31 = vld [vmem:[#allocation2 + $0x78] sm:$0xff]  ;;  %v507_v35 = vadd.f32 %v713_v61, %v484_v20 }
  0xf6   : > { %v480_v8 = vld [vmem:[#allocation2 + $0x48] sm:$0xff]  ;;  %v512_v9 = vmax.f32 %v496_v62, 0.0  ;;  %v513_v10 = vmax.f32 %v497_v63, 0.0  ;;  %v514_v16 = vmax.f32 %v498_v3, 0.0  ;;  %v515_v17 = vmax.f32 %v499_v4, 0.0  ;;  %v485_v21 = vld [vmem:[#allocation2 + $0x60] sm:$0xff] }
  0xf7   : > { %v516_v18 = vmax.f32 %v500_v6, 0.0  ;;  %v503_v19 = vadd.f32 %v713_v61, %v480_v8  ;;  %v518_v24 = vmax.f32 %v502_v12, 0.0  ;;  %v505_v29 = vadd.f32 %v713_v61, %v482_v14  ;;  %v488_v32 = vld [vmem:[#allocation2 + $0x28] sm:$0xff] }
  0xf8   : > { %v478_v5 = vld [vmem:[#allocation2 + $0x68] sm:$0xff]  ;;  %v754_v22 = vpack.c.bf16 %v513_v10, %v512_v9  ;;  %v486_v26 = vld [vmem:[#allocation2 + $0x70] sm:$0xff]  ;;  %v759_v27 = vpack.c.bf16 %v515_v17, %v514_v16  ;;  %v506_v30 = vadd.f32 %v713_v61, %v483_v15  ;;  %v520_v34 = vmax.f32 %v504_v25, 0.0 }
  0xf9   : > { %v501_v11 = vadd.f32 %v713_v61, %v478_v5  ;;  %v519_v28 = vmax.f32 %v503_v19, 0.0  ;;  %v508_v36 = vadd.f32 %v713_v61, %v485_v21  ;;  %v521_v38 = vmax.f32 %v505_v29, 0.0 }
  0xfa   : > { %755 = vst [vmem:[%s994_s3] sm:$0xff] %v754_v22   ;;  %791 = vst [vmem:[%s994_s3 + $0x8] sm:$0xff] %v759_v27   ;;  %v522_v39 = vmax.f32 %v506_v30, 0.0  ;;  %v509_v40 = vadd.f32 %v713_v61, %v486_v26  ;;  %v523_v41 = vmax.f32 %v507_v35, 0.0  ;;  %v510_v43 = vadd.f32 %v713_v61, %v487_v31 }
  0xfb   : > { %v517_v23 = vmax.f32 %v501_v11, 0.0  ;;  %v769_v37 = vpack.c.bf16 %v519_v28, %v518_v24  ;;  %v524_v42 = vmax.f32 %v508_v36, 0.0  ;;  %v511_v44 = vadd.f32 %v713_v61, %v488_v32 }
  0xfc   : > { %v774_v45 = vpack.c.bf16 %v521_v38, %v520_v34  ;;  %v525_v46 = vmax.f32 %v509_v40, 0.0  ;;  %v779_v47 = vpack.c.bf16 %v523_v41, %v522_v39  ;;  %v526_v48 = vmax.f32 %v510_v43, 0.0 }
  0xfd   : > { %v764_v33 = vpack.c.bf16 %v517_v23, %v516_v18  ;;  %793 = vst [vmem:[%s994_s3 + $0x18] sm:$0xff] %v769_v37   ;;  %v527_v49 = vmax.f32 %v511_v44, 0.0 }
  0xfe   : > { %794 = vst [vmem:[%s994_s3 + $0x20] sm:$0xff] %v774_v45   ;;  %v784_v50 = vpack.c.bf16 %v525_v46, %v524_v42  ;;  %795 = vst [vmem:[%s994_s3 + $0x28] sm:$0xff] %v779_v47  }
  0xff   : > { %792 = vst [vmem:[%s994_s3 + $0x10] sm:$0xff] %v764_v33   ;;  %v789_v51 = vpack.c.bf16 %v527_v49, %v526_v48 }
 0x100   : > { %796 = vst [vmem:[%s994_s3 + $0x30] sm:$0xff] %v784_v50  }
 0x101   : > { %797 = vst [vmem:[%s994_s3 + $0x38] sm:$0xff] %v789_v51  }
 0x102 PF: > { %s13_s14 = sadd.s32 1, %s884_s14   ;;  %s995_s12 = smov %s880_s13 }
 0x103   : > { %p10_p7 = scmp.ge.s32.totalorder %s13_s14, 11   ;;  %s996_s13 = smov %s998_s15 }
 0x105   :  { %12 = sbr.rel (!%p10_p7) target bundleno = 2 (0x2), region = 73 }

// kernel: _lambda_.21
= control target key start
LH: loop header
LB: loop body
LE: loop exit
PB: predicated region body
PF: predicated region fallthrough
CT: control target
= control target key end

     0   :  { %s930_s12 = smov 0   ;;  %s932_s13 = smov 0   ;;  %s1014_s0 = inlined_call_operand.vmem [shape: bf16[9,128,32], index: 0, kind: input, shape index: {}]   ;;  %s1015_s1 = inlined_call_operand.vmem [shape: bf16[9,32,128], index: 1, kind: input, shape index: {}]   ;;  %s1016_s2 = inlined_call_operand.vmem [shape: f32[1,128], index: 2, kind: input, shape index: {}]   ;;  %s1017_s3 = inlined_call_operand.vmem [shape: bf16[128,128], index: 3, kind: output, shape index: {}]  }
   0x1   :  { %s934_s14 = smov 0  }
   0x2 LB: > { %s22_s15 = sadd.s32 1, %s903_s13  ;;  %p705_p0 = scmp.ge.s32.totalorder %s907_s14, 1  ;;  %s907_s14 = sphi %s934_s14, %s13_s14   ;;  %s903_s13 = sphi %s932_s13, %s1019_s13   ;;  %s899_s12 = sphi %s930_s12, %s1018_s12  }
   0x3   : > { %p23_p1 = scmp.ge.s32.totalorder %s22_s15, 9  ;;  %p166_p2 = scmp.lt.s32.totalorder %s907_s14, 10 }
   0x5   : > { %s1021_s15 = smov (%p23_p1, %s22_s15), 0  ;;  %p167_p3 = pnand %p705_p0, %p166_p2 }
   0x6   : > { %p200_p4 = scmp.lt.s32.totalorder (!%p167_p3), %s899_s12, 8  ;;  %p710_p5 = scmp.ne.s32.totalorder (!%p167_p3), %s899_s12, 0 }
   0x7   : > { %170 = sbr.rel (%p167_p3) target bundleno = 262 (0x106), region = 32 }
   0xc   : > { %s201_s16 = scalar_select %p200_p4, %s899_s12, 8 }
   0xd   : > { %224 = sbr.rel (%p710_p5) target bundleno = 27 (0x1b), region = 36 }
   0xe   : > { %s751_s17 = sshll.u32 %s201_s16, 6  ;;  %s752_s18 = sshll.u32 %s201_s16, 4 }
   0xf   : > { %s955_s21 = scalar_lea.vmem %s1014_s0, %s751_s17  ;;  %s213_s24 = scalar_lea.vmem %s1015_s1, %s752_s18 }
  0x12   : > { %v909_v0 = vmov 0.0  }
  0x13   : > { %225 = vst [vmem:[#allocation2 + $0x30] sm:$0xff] %v909_v0  ;;  %226 = vst [vmem:[#allocation2] sm:$0xff] %v909_v0 }
  0x14   : > { %227 = vst [vmem:[#allocation2 + $0x58] sm:$0xff] %v909_v0  ;;  %228 = vst [vmem:[#allocation2 + $0x18] sm:$0xff] %v909_v0 }
  0x15   : > { %229 = vst [vmem:[#allocation2 + $0x50] sm:$0xff] %v909_v0  ;;  %230 = vst [vmem:[#allocation2 + $0x68] sm:$0xff] %v909_v0 }
  0x16   : > { %231 = vst [vmem:[#allocation2 + $0x8] sm:$0xff] %v909_v0  ;;  %232 = vst [vmem:[#allocation2 + $0x48] sm:$0xff] %v909_v0 }
  0x17   : > { %233 = vst [vmem:[#allocation2 + $0x40] sm:$0xff] %v909_v0  ;;  %234 = vst [vmem:[#allocation2 + $0x20] sm:$0xff] %v909_v0 }
  0x18   : > { %235 = vst [vmem:[#allocation2 + $0x10] sm:$0xff] %v909_v0  ;;  %236 = vst [vmem:[#allocation2 + $0x38] sm:$0xff] %v909_v0 }
  0x19   : > { %237 = vst [vmem:[#allocation2 + $0x60] sm:$0xff] %v909_v0  ;;  %238 = vst [vmem:[#allocation2 + $0x70] sm:$0xff] %v909_v0 }
  0x1a   : > { %239 = vst [vmem:[#allocation2 + $0x78] sm:$0xff] %v909_v0  ;;  %240 = vst [vmem:[#allocation2 + $0x28] sm:$0xff] %v909_v0 }
  0x1b PF: > { %v875_v1 = vld [vmem:[%s213_s24 + $0x8] sm:$0xff]   ;;  %v876_v2 = vld [vmem:[%s213_s24] sm:$0xff]   ;;  %vm329_vm0 = vcmask 261120   ;;  %v881_v7 = vld [vmem:[%s955_s21 + $0x10] sm:$0xff]   ;;  %p729_p6 = scmp.ne.s32.totalorder %s899_s12, 8 }
  0x1c   : > { %826 = vmatprep.subr.bf16.mxu0 %v875_v1  ;;  %846 = vmatprep.subr.bf16.mxu1 %v875_v1  ;;  %v877_v3 = vld [vmem:[%s955_s21] sm:$0xff]   ;;  %v879_v5 = vld [vmem:[%s955_s21 + $0x8] sm:$0xff]   ;;  %v882_v8 = vld [vmem:[%s955_s21 + $0x30] sm:$0xff]  }
  0x1d   : > { %827 = vmatpush3.bf16.msra.mxu0 %v875_v1  ;;  %848 = vmatpush3.bf16.msra.mxu1 %v875_v1  ;;  %v878_v4 = vld [vmem:[%s955_s21 + $0x20] sm:$0xff]   ;;  %v880_v6 = vld [vmem:[%s955_s21 + $0x28] sm:$0xff]   ;;  %v883_v9 = vld [vmem:[%s955_s21 + $0x18] sm:$0xff]  }
  0x1e   : > { %828 = vmatprep.subr.bf16.mxu0 %v876_v2  ;;  %847 = vmatprep.subr.bf16.mxu1 %v876_v2  ;;  %v884_v10 = vld [vmem:[%s955_s21 + $0x38] sm:$0xff]   ;;  %v241_v15 = vld [vmem:[#allocation2 + $0x30] sm:$0xff]  ;;  %v249_v16 = vld [vmem:[#allocation2 + $0x40] sm:$0xff] }
  0x1f   : > { %830 = vmatprep.mubr.msk.bf16.mxu0 %vm329_vm0, %v877_v3  ;;  %838 = vmatprep.mubr.msk.bf16.mxu1 %vm329_vm0, %v878_v4  ;;  %v243_v11 = vld [vmem:[#allocation2 + $0x58] sm:$0xff]  ;;  %v251_v12 = vld [vmem:[#allocation2 + $0x10] sm:$0xff]  ;;  %v242_v27 = vld [vmem:[#allocation2] sm:$0xff] }
  0x20   : > { %v244_v21 = vld [vmem:[#allocation2 + $0x18] sm:$0xff]  ;;  %v250_v28 = vld [vmem:[#allocation2 + $0x20] sm:$0xff]  ;;  %v247_v33 = vld [vmem:[#allocation2 + $0x8] sm:$0xff] }
  0x21   : > { %829 = vmatpush3.bf16.msra.mxu0 %v876_v2  ;;  %849 = vmatpush3.bf16.msra.mxu1 %v876_v2  ;;  %v252_v22 = vld [vmem:[#allocation2 + $0x38] sm:$0xff]  ;;  %v245_v39 = vld [vmem:[#allocation2 + $0x50] sm:$0xff]  ;;  %v253_v40 = vld [vmem:[#allocation2 + $0x60] sm:$0xff] }
  0x22   : > { %v255_v34 = vld [vmem:[#allocation2 + $0x78] sm:$0xff]  ;;  %v248_v45 = vld [vmem:[#allocation2 + $0x48] sm:$0xff]  ;;  %v254_v52 = vld [vmem:[#allocation2 + $0x70] sm:$0xff] }
  0x23   : > { %v256_v46 = vld [vmem:[#allocation2 + $0x28] sm:$0xff] }
  0x24   : > { %831 = vmatmul.mubr.msk.bf16.vlgmr.msra.gmra.mxu0 %vm329_vm0, %v879_v5  ;;  %839 = vmatmul.mubr.msk.bf16.vlgmr.msra.gmra.mxu1 %vm329_vm0, %v880_v6  ;;  %v246_v51 = vld [vmem:[#allocation2 + $0x68] sm:$0xff] }
  0x25   : > { %834 = vmatprep.mubr.msk.bf16.mxu0 %vm329_vm0, %v881_v7  ;;  %842 = vmatprep.mubr.msk.bf16.mxu1 %vm329_vm0, %v882_v8 }
  0x2c   : > { %835 = vmatmul.mubr.msk.bf16.gmra.mxu0 %vm329_vm0, %v883_v9  ;;  %843 = vmatmul.mubr.msk.bf16.gmra.mxu1 %vm329_vm0, %v884_v10 }
  0xe4   : > { %v832_v13 = vpop.f32.mrf.mxu0  ;;  %v840_v14 = vpop.f32.mrf.mxu1 }
  0xe5   : > { %v453_v17 = vadd.f32 %v832_v13, %v243_v11  ;;  %v461_v18 = vadd.f32 %v840_v14, %v251_v12 }
  0xe6   : > { %v388_v19 = vpop.f32.mrf.mxu0  ;;  %v420_v20 = vpop.f32.mrf.mxu1 }
  0xe7   : > { %469 = vst [vmem:[#allocation2 + $0x58] sm:$0xff] %v453_v17  ;;  %477 = vst [vmem:[#allocation2 + $0x10] sm:$0xff] %v461_v18  ;;  %v451_v23 = vadd.f32 %v388_v19, %v241_v15  ;;  %v459_v24 = vadd.f32 %v420_v20, %v249_v16 }
  0xe8   : > { %v833_v25 = vpop.f32.mrf.mxu0  ;;  %v841_v26 = vpop.f32.mrf.mxu1 }
  0xe9   : > { %467 = vst [vmem:[#allocation2 + $0x30] sm:$0xff] %v451_v23  ;;  %475 = vst [vmem:[#allocation2 + $0x40] sm:$0xff] %v459_v24  ;;  %v454_v29 = vadd.f32 %v833_v25, %v244_v21  ;;  %v462_v30 = vadd.f32 %v841_v26, %v252_v22 }
  0xea   : > { %v391_v31 = vpop.f32.mrf.mxu0  ;;  %v423_v32 = vpop.f32.mrf.mxu1 }
  0xeb   : > { %470 = vst [vmem:[#allocation2 + $0x18] sm:$0xff] %v454_v29  ;;  %478 = vst [vmem:[#allocation2 + $0x38] sm:$0xff] %v462_v30  ;;  %v452_v35 = vadd.f32 %v391_v31, %v242_v27  ;;  %v460_v36 = vadd.f32 %v423_v32, %v250_v28 }
  0xec   : > { %v836_v37 = vpop.f32.mrf.mxu0  ;;  %v844_v38 = vpop.f32.mrf.mxu1 }
  0xed   : > { %468 = vst [vmem:[#allocation2] sm:$0xff] %v452_v35  ;;  %476 = vst [vmem:[#allocation2 + $0x20] sm:$0xff] %v460_v36  ;;  %v457_v41 = vadd.f32 %v836_v37, %v247_v33  ;;  %v465_v42 = vadd.f32 %v844_v38, %v255_v34 }
  0xee   : > { %v404_v43 = vpop.f32.mrf.mxu0  ;;  %v436_v44 = vpop.f32.mrf.mxu1 }
  0xef   : > { %473 = vst [vmem:[#allocation2 + $0x8] sm:$0xff] %v457_v41  ;;  %481 = vst [vmem:[#allocation2 + $0x78] sm:$0xff] %v465_v42  ;;  %v455_v47 = vadd.f32 %v404_v43, %v245_v39  ;;  %v463_v48 = vadd.f32 %v436_v44, %v253_v40 }
  0xf0   : > { %v837_v49 = vpop.f32.mrf.mxu0  ;;  %v845_v50 = vpop.f32.mrf.mxu1 }
  0xf1   : > { %471 = vst [vmem:[#allocation2 + $0x50] sm:$0xff] %v455_v47  ;;  %479 = vst [vmem:[#allocation2 + $0x60] sm:$0xff] %v463_v48  ;;  %v458_v53 = vadd.f32 %v837_v49, %v248_v45  ;;  %v466_v54 = vadd.f32 %v845_v50, %v256_v46  ;;  %486 = sbr.rel (%p729_p6) target bundleno = 262 (0x106), region = 40 }
  0xf2   : > { %v407_v55 = vpop.f32.mrf.mxu0  ;;  %v439_v56 = vpop.f32.mrf.mxu1 }
  0xf3   : > { %474 = vst [vmem:[#allocation2 + $0x48] sm:$0xff] %v458_v53  ;;  %482 = vst [vmem:[#allocation2 + $0x28] sm:$0xff] %v466_v54  ;;  %v456_v57 = vadd.f32 %v407_v55, %v246_v51  ;;  %v464_v58 = vadd.f32 %v439_v56, %v254_v52 }
  0xf5   : > { %472 = vst [vmem:[#allocation2 + $0x68] sm:$0xff] %v456_v57  ;;  %480 = vst [vmem:[#allocation2 + $0x70] sm:$0xff] %v464_v58 }
  0xf6   : > { %v487_v59 = vld [vmem:[#allocation2 + $0x30] sm:$0xff]  ;;  %v488_v60 = vld [vmem:[#allocation2] sm:$0xff]  ;;  %v489_v0 = vld [vmem:[#allocation2 + $0x58] sm:$0xff] }
  0xf7   : > { %v730_v61 = vld [vmem:[%s1016_s2] ss:$0 sm:$0xff]  ;;  %v490_v1 = vld [vmem:[#allocation2 + $0x18] sm:$0xff]  ;;  %v493_v7 = vld [vmem:[#allocation2 + $0x8] sm:$0xff] }
  0xf8   : > { %v510_v62 = vadd.f32 %v730_v61, %v487_v59  ;;  %v511_v63 = vadd.f32 %v730_v61, %v488_v60  ;;  %v491_v2 = vld [vmem:[#allocation2 + $0x50] sm:$0xff]  ;;  %v512_v3 = vadd.f32 %v730_v61, %v489_v0  ;;  %v513_v4 = vadd.f32 %v730_v61, %v490_v1  ;;  %v495_v13 = vld [vmem:[#allocation2 + $0x40] sm:$0xff]  ;;  %v498_v20 = vld [vmem:[#allocation2 + $0x38] sm:$0xff] }
  0xf9   : > { %v514_v6 = vadd.f32 %v730_v61, %v491_v2  ;;  %v516_v12 = vadd.f32 %v730_v61, %v493_v7  ;;  %v496_v14 = vld [vmem:[#allocation2 + $0x20] sm:$0xff]  ;;  %v497_v15 = vld [vmem:[#allocation2 + $0x10] sm:$0xff]  ;;  %v518_v25 = vadd.f32 %v730_v61, %v495_v13  ;;  %v501_v31 = vld [vmem:[#allocation2 + $0x78] sm:$0xff]  ;;  %v521_v35 = vadd.f32 %v730_v61, %v498_v20 }
  0xfa   : > { %v494_v8 = vld [vmem:[#allocation2 + $0x48] sm:$0xff]  ;;  %v526_v9 = vmax.f32 %v510_v62, 0.0  ;;  %v527_v10 = vmax.f32 %v511_v63, 0.0  ;;  %v528_v16 = vmax.f32 %v512_v3, 0.0  ;;  %v529_v17 = vmax.f32 %v513_v4, 0.0  ;;  %v499_v21 = vld [vmem:[#allocation2 + $0x60] sm:$0xff] }
  0xfb   : > { %v530_v18 = vmax.f32 %v514_v6, 0.0  ;;  %v517_v19 = vadd.f32 %v730_v61, %v494_v8  ;;  %v532_v24 = vmax.f32 %v516_v12, 0.0  ;;  %v519_v29 = vadd.f32 %v730_v61, %v496_v14  ;;  %v502_v32 = vld [vmem:[#allocation2 + $0x28] sm:$0xff] }
  0xfc   : > { %v492_v5 = vld [vmem:[#allocation2 + $0x68] sm:$0xff]  ;;  %v772_v22 = vpack.c.bf16 %v527_v10, %v526_v9  ;;  %v500_v26 = vld [vmem:[#allocation2 + $0x70] sm:$0xff]  ;;  %v777_v27 = vpack.c.bf16 %v529_v17, %v528_v16  ;;  %v520_v30 = vadd.f32 %v730_v61, %v497_v15  ;;  %v534_v34 = vmax.f32 %v518_v25, 0.0 }
  0xfd   : > { %v515_v11 = vadd.f32 %v730_v61, %v492_v5  ;;  %v533_v28 = vmax.f32 %v517_v19, 0.0  ;;  %v522_v36 = vadd.f32 %v730_v61, %v499_v21  ;;  %v535_v38 = vmax.f32 %v519_v29, 0.0 }
  0xfe   : > { %773 = vst [vmem:[%s1017_s3] sm:$0xff] %v772_v22   ;;  %809 = vst [vmem:[%s1017_s3 + $0x8] sm:$0xff] %v777_v27   ;;  %v536_v39 = vmax.f32 %v520_v30, 0.0  ;;  %v523_v40 = vadd.f32 %v730_v61, %v500_v26  ;;  %v537_v41 = vmax.f32 %v521_v35, 0.0  ;;  %v524_v43 = vadd.f32 %v730_v61, %v501_v31 }
  0xff   : > { %v531_v23 = vmax.f32 %v515_v11, 0.0  ;;  %v787_v37 = vpack.c.bf16 %v533_v28, %v532_v24  ;;  %v538_v42 = vmax.f32 %v522_v36, 0.0  ;;  %v525_v44 = vadd.f32 %v730_v61, %v502_v32 }
 0x100   : > { %v792_v45 = vpack.c.bf16 %v535_v38, %v534_v34  ;;  %v539_v46 = vmax.f32 %v523_v40, 0.0  ;;  %v797_v47 = vpack.c.bf16 %v537_v41, %v536_v39  ;;  %v540_v48 = vmax.f32 %v524_v43, 0.0 }
 0x101   : > { %v782_v33 = vpack.c.bf16 %v531_v23, %v530_v18  ;;  %811 = vst [vmem:[%s1017_s3 + $0x18] sm:$0xff] %v787_v37   ;;  %v541_v49 = vmax.f32 %v525_v44, 0.0 }
 0x102   : > { %812 = vst [vmem:[%s1017_s3 + $0x20] sm:$0xff] %v792_v45   ;;  %v802_v50 = vpack.c.bf16 %v539_v46, %v538_v42  ;;  %813 = vst [vmem:[%s1017_s3 + $0x28] sm:$0xff] %v797_v47  }
 0x103   : > { %810 = vst [vmem:[%s1017_s3 + $0x10] sm:$0xff] %v782_v33   ;;  %v807_v51 = vpack.c.bf16 %v541_v49, %v540_v48 }
 0x104   : > { %814 = vst [vmem:[%s1017_s3 + $0x30] sm:$0xff] %v802_v50  }
 0x105   : > { %815 = vst [vmem:[%s1017_s3 + $0x38] sm:$0xff] %v807_v51  }
 0x106 PF: > { %s13_s14 = sadd.s32 1, %s907_s14   ;;  %s1018_s12 = smov %s903_s13 }
 0x107   : > { %p10_p7 = scmp.ge.s32.totalorder %s13_s14, 11   ;;  %s1019_s13 = smov %s1021_s15 }
 0x109   :  { %12 = sbr.rel (!%p10_p7) target bundleno = 2 (0x2), region = 73 }

// kernel: _lambda_.22
= control target key start
LH: loop header
LB: loop body
LE: loop exit
PB: predicated region body
PF: predicated region fallthrough
CT: control target
= control target key end

     0   :  { %vm144_vm0 = vcmask 1043456   ;;  %vm119_vm1 = vcmask 195584   ;;  %s648_s1 = inlined_call_operand.vmem [shape: bf16[1,24,128], index: 1, kind: input, shape index: {}]   ;;  %s649_s0 = inlined_call_operand.vmem [shape: bf16[1,128,24], index: 0, kind: input, shape index: {}]   ;;  %s650_s2 = inlined_call_operand.vmem [shape: f32[1,128], index: 2, kind: input, shape index: {}]   ;;  %s651_s3 = inlined_call_operand.vmem [shape: bf16[128,128], index: 3, kind: output, shape index: {}]  }
   0x1   :  { %v553_v0 = vld [vmem:[%s648_s1 + $0x8] ss:$0 sps:$4 sm:$0xff]   ;;  %v554_v1 = vld [vmem:[%s648_s1] sm:$0xff]   ;;  %v559_v7 = vld [vmem:[%s649_s0 + $0x10] sm:$0xff]  }
   0x2   :  { %551 = vmatprep.subr.msk.bf16.mxu0 %vm144_vm0, %v553_v0  ;;  %552 = vmatprep.subr.msk.bf16.mxu1 %vm144_vm0, %v553_v0  ;;  %v146_v2 = vsel %vm144_vm0, %v553_v0, 0  ;;  %v555_v3 = vld [vmem:[%s649_s0] sm:$0xff]   ;;  %v557_v5 = vld [vmem:[%s649_s0 + $0x8] sm:$0xff]   ;;  %v560_v8 = vld [vmem:[%s649_s0 + $0x30] sm:$0xff]  }
   0x3   :  { %528 = vmatpush3.bf16.msra.mxu0 %v146_v2  ;;  %549 = vmatpush3.bf16.msra.mxu1 %v146_v2  ;;  %v556_v4 = vld [vmem:[%s649_s0 + $0x20] sm:$0xff]   ;;  %v558_v6 = vld [vmem:[%s649_s0 + $0x28] sm:$0xff]   ;;  %v561_v9 = vld [vmem:[%s649_s0 + $0x18] sm:$0xff]  }
   0x4   :  { %529 = vmatprep.subr.bf16.mxu0 %v554_v1  ;;  %548 = vmatprep.subr.bf16.mxu1 %v554_v1  ;;  %v562_v10 = vld [vmem:[%s649_s0 + $0x38] sm:$0xff]   ;;  %v437_v11 = vld [vmem:[%s650_s2] ss:$0 sm:$0xff] }
   0x5   :  { %531 = vmatprep.mubr.msk.bf16.mxu0 %vm119_vm1, %v555_v3  ;;  %539 = vmatprep.mubr.msk.bf16.mxu1 %vm119_vm1, %v556_v4 }
   0x7   :  { %530 = vmatpush3.bf16.msra.mxu0 %v554_v1  ;;  %550 = vmatpush3.bf16.msra.mxu1 %v554_v1 }
   0xa   :  { %532 = vmatmul.mubr.msk.bf16.vlgmr.msra.gmra.mxu0 %vm119_vm1, %v557_v5  ;;  %540 = vmatmul.mubr.msk.bf16.vlgmr.msra.gmra.mxu1 %vm119_vm1, %v558_v6 }
   0xb   :  { %535 = vmatprep.mubr.msk.bf16.mxu0 %vm119_vm1, %v559_v7  ;;  %543 = vmatprep.mubr.msk.bf16.mxu1 %vm119_vm1, %v560_v8 }
  0x12   :  { %536 = vmatmul.mubr.msk.bf16.gmra.mxu0 %vm119_vm1, %v561_v9  ;;  %544 = vmatmul.mubr.msk.bf16.gmra.mxu1 %vm119_vm1, %v562_v10 }
  0xca   :  { %v533_v12 = vpop.f32.mrf.mxu0  ;;  %v541_v13 = vpop.f32.mrf.mxu1 }
  0xcb   :  { %v305_v14 = vadd.f32 %v533_v12, %v437_v11  ;;  %v313_v15 = vadd.f32 %v541_v13, %v437_v11 }
  0xcc   :  { %v182_v16 = vpop.f32.mrf.mxu0  ;;  %v214_v17 = vpop.f32.mrf.mxu1 }
  0xcd   :  { %v303_v18 = vadd.f32 %v437_v11, %v182_v16  ;;  %v311_v19 = vadd.f32 %v437_v11, %v214_v17  ;;  %v321_v24 = vmax.f32 %v305_v14, 0.0  ;;  %v329_v25 = vmax.f32 %v313_v15, 0.0 }
  0xce   :  { %v534_v20 = vpop.f32.mrf.mxu0  ;;  %v542_v21 = vpop.f32.mrf.mxu1 }
  0xcf   :  { %v306_v22 = vadd.f32 %v534_v20, %v437_v11  ;;  %v314_v23 = vadd.f32 %v542_v21, %v437_v11  ;;  %v319_v32 = vmax.f32 %v303_v18, 0.0  ;;  %v327_v33 = vmax.f32 %v311_v19, 0.0 }
  0xd0   :  { %v185_v26 = vpop.f32.mrf.mxu0  ;;  %v217_v27 = vpop.f32.mrf.mxu1 }
  0xd1   :  { %v322_v28 = vmax.f32 %v306_v22, 0.0  ;;  %v330_v29 = vmax.f32 %v314_v23, 0.0  ;;  %v304_v30 = vadd.f32 %v437_v11, %v185_v26  ;;  %v312_v31 = vadd.f32 %v437_v11, %v217_v27 }
  0xd2   :  { %v537_v34 = vpop.f32.mrf.mxu0  ;;  %v545_v35 = vpop.f32.mrf.mxu1 }
  0xd3   :  { %v478_v36 = vpack.c.bf16 %v322_v28, %v321_v24  ;;  %v498_v37 = vpack.c.bf16 %v330_v29, %v329_v25  ;;  %v320_v38 = vmax.f32 %v304_v30, 0.0  ;;  %v328_v39 = vmax.f32 %v312_v31, 0.0 }
  0xd4   :  { %v309_v40 = vadd.f32 %v537_v34, %v437_v11  ;;  %v317_v41 = vadd.f32 %v545_v35, %v437_v11  ;;  %v198_v42 = vpop.f32.mrf.mxu0  ;;  %v230_v43 = vpop.f32.mrf.mxu1 }
  0xd5   :  { %510 = vst [vmem:[%s651_s3 + $0x8] sm:$0xff] %v478_v36   ;;  %514 = vst [vmem:[%s651_s3 + $0x28] sm:$0xff] %v498_v37   ;;  %v473_v44 = vpack.c.bf16 %v320_v38, %v319_v32  ;;  %v493_v45 = vpack.c.bf16 %v328_v39, %v327_v33  ;;  %v307_v46 = vadd.f32 %v437_v11, %v198_v42 }
  0xd6   :  { %v315_v47 = vadd.f32 %v437_v11, %v230_v43  ;;  %v538_v48 = vpop.f32.mrf.mxu0  ;;  %v546_v49 = vpop.f32.mrf.mxu1  ;;  %v325_v52 = vmax.f32 %v309_v40, 0.0  ;;  %v333_v53 = vmax.f32 %v317_v41, 0.0 }
  0xd7   :  { %474 = vst [vmem:[%s651_s3] sm:$0xff] %v473_v44   ;;  %513 = vst [vmem:[%s651_s3 + $0x20] sm:$0xff] %v493_v45   ;;  %v310_v50 = vadd.f32 %v538_v48, %v437_v11  ;;  %v318_v51 = vadd.f32 %v546_v49, %v437_v11  ;;  %v323_v60 = vmax.f32 %v307_v46, 0.0 }
  0xd8   :  { %v201_v54 = vpop.f32.mrf.mxu0  ;;  %v233_v55 = vpop.f32.mrf.mxu1  ;;  %v331_v61 = vmax.f32 %v315_v47, 0.0 }
  0xd9   :  { %v326_v56 = vmax.f32 %v310_v50, 0.0  ;;  %v334_v57 = vmax.f32 %v318_v51, 0.0  ;;  %v308_v58 = vadd.f32 %v437_v11, %v201_v54  ;;  %v316_v59 = vadd.f32 %v437_v11, %v233_v55 }
  0xdb   :  { %v488_v62 = vpack.c.bf16 %v326_v56, %v325_v52  ;;  %v508_v63 = vpack.c.bf16 %v334_v57, %v333_v53  ;;  %v324_v0 = vmax.f32 %v308_v58, 0.0  ;;  %v332_v1 = vmax.f32 %v316_v59, 0.0 }
  0xdd   :  { %512 = vst [vmem:[%s651_s3 + $0x18] sm:$0xff] %v488_v62   ;;  %516 = vst [vmem:[%s651_s3 + $0x38] sm:$0xff] %v508_v63   ;;  %v483_v2 = vpack.c.bf16 %v324_v0, %v323_v60  ;;  %v503_v3 = vpack.c.bf16 %v332_v1, %v331_v61 }
  0xdf   :  { %511 = vst [vmem:[%s651_s3 + $0x10] sm:$0xff] %v483_v2   ;;  %515 = vst [vmem:[%s651_s3 + $0x30] sm:$0xff] %v503_v3  }

// kernel: _lambda_.23
= control target key start
LH: loop header
LB: loop body
LE: loop exit
PB: predicated region body
PF: predicated region fallthrough
CT: control target
= control target key end

     0   :  { %vm39_vm0 = vcmask 191488   ;;  %s134_s0 = inlined_call_operand.vmem [shape: bf16[4,32,24], index: 0, kind: input, shape index: {}]   ;;  %s135_s1 = inlined_call_operand.vmem [shape: bf16[32,24], index: 1, kind: output, shape index: {}]  }
   0x1   :  { %v8_v0 = vld [vmem:[%s134_s0] sm:$0xf]  ;;  %v48_v1 = vld [vmem:[%s134_s0 + $0x10] sm:$0xf]  ;;  %v9_v4 = vld [vmem:[%s134_s0 + $0x4] sm:$0xf] }
   0x2   :  { %v52_v2 = vld [vmem:[%s134_s0 + $0x20] sm:$0xf]  ;;  %v17_v3 = vmax.bf16 %v48_v1, %v8_v0  ;;  %v49_v5 = vld [vmem:[%s134_s0 + $0x14] sm:$0xf]  ;;  %v56_v6 = vld [vmem:[%s134_s0 + $0x30] sm:$0xf] }
   0x3   :  { %v18_v7 = vmax.bf16 %v49_v5, %v9_v4  ;;  %v53_v8 = vld [vmem:[%s134_s0 + $0x24] sm:$0xf]  ;;  %v10_v9 = vld [vmem:[%s134_s0 + $0x8] sm:$0xf]  ;;  %v57_v11 = vld [vmem:[%s134_s0 + $0x34] sm:$0xf] }
   0x4   :  { %v26_v10 = vmax.bf16 %v52_v2, %v17_v3  ;;  %v50_v12 = vld [vmem:[%s134_s0 + $0x18] sm:$0xf]  ;;  %v54_v13 = vld [vmem:[%s134_s0 + $0x28] sm:$0xf]  ;;  %v11_v16 = vld [vmem:[%s134_s0 + $0xc] sm:$0xf] }
   0x5   :  { %v27_v14 = vmax.bf16 %v53_v8, %v18_v7  ;;  %v19_v15 = vmax.bf16 %v50_v12, %v10_v9  ;;  %v51_v17 = vld [vmem:[%s134_s0 + $0x1c] sm:$0xf]  ;;  %v55_v18 = vld [vmem:[%s134_s0 + $0x2c] sm:$0xf]  ;;  %v58_v20 = vld [vmem:[%s134_s0 + $0x38] sm:$0xf] }
   0x6   :  { %v35_v19 = vmax.bf16 %v56_v6, %v26_v10  ;;  %v20_v21 = vmax.bf16 %v51_v17, %v11_v16  ;;  %v59_v24 = vld [vmem:[%s134_s0 + $0x3c] sm:$0xf] }
   0x7   :  { %v36_v22 = vmax.bf16 %v57_v11, %v27_v14  ;;  %v28_v23 = vmax.bf16 %v54_v13, %v19_v15 }
   0x8   :  { %40 = vst.msk [vmem:[%s135_s1] sm:$0xf] %vm39_vm0, %v35_v19  ;;  %v29_v25 = vmax.bf16 %v55_v18, %v20_v21 }
   0x9   :  { %41 = vst.msk [vmem:[%s135_s1 + $0x4] sm:$0xf] %vm39_vm0, %v36_v22  ;;  %v37_v26 = vmax.bf16 %v58_v20, %v28_v23 }
   0xa   :  { %v38_v27 = vmax.bf16 %v59_v24, %v29_v25 }
   0xb   :  { %42 = vst.msk [vmem:[%s135_s1 + $0x8] sm:$0xf] %vm39_vm0, %v37_v26 }
   0xc   :  { %43 = vst.msk [vmem:[%s135_s1 + $0xc] sm:$0xf] %vm39_vm0, %v38_v27 }

// kernel: _lambda_.24
= control target key start
LH: loop header
LB: loop body
LE: loop exit
PB: predicated region body
PF: predicated region fallthrough
CT: control target
= control target key end

     0   :  { %s578_s12 = smov 0   ;;  %s580_s13 = smov 0   ;;  %s626_s0 = inlined_call_operand.vmem [shape: bf16[9,32,24], index: 0, kind: input, shape index: {}]   ;;  %s627_s1 = inlined_call_operand.vmem [shape: bf16[9,24,128], index: 1, kind: input, shape index: {}]   ;;  %s628_s2 = inlined_call_operand.vmem [shape: f32[1,128], index: 2, kind: input, shape index: {}]   ;;  %s629_s3 = inlined_call_operand.vmem [shape: bf16[32,128], index: 3, kind: output, shape index: {}]  }
   0x1   :  { %s582_s14 = smov 0  }
   0x2 LB: > { %s22_s15 = sadd.s32 1, %s551_s13  ;;  %p453_p0 = scmp.ge.s32.totalorder %s555_s14, 1  ;;  %s555_s14 = sphi %s582_s14, %s13_s14   ;;  %s551_s13 = sphi %s580_s13, %s631_s13   ;;  %s547_s12 = sphi %s578_s12, %s630_s12  }
   0x3   : > { %p23_p1 = scmp.ge.s32.totalorder %s22_s15, 9  ;;  %p166_p2 = scmp.lt.s32.totalorder %s555_s14, 10 }
   0x5   : > { %s633_s15 = smov (%p23_p1, %s22_s15), 0  ;;  %p167_p3 = pnand %p453_p0, %p166_p2 }
   0x6   : > { %p200_p4 = scmp.lt.s32.totalorder (!%p167_p3), %s547_s12, 8  ;;  %p457_p5 = scmp.ne.s32.totalorder (!%p167_p3), %s547_s12, 0 }
   0x7   : > { %170 = sbr.rel (%p167_p3) target bundleno = 246 (0xf6), region = 32 }
   0xc   : > { %s201_s16 = scalar_select %p200_p4, %s547_s12, 8 }
   0xd   : > { %224 = sbr.rel (%p457_p5) target bundleno = 21 (0x15), region = 36 }
   0xe   : > { %s474_s17 = sshll.u32 %s201_s16, 4  ;;  %s503_s18 = smul.u32 12, %s201_s16 }
   0xf   : > { %s207_s21 = scalar_lea.vmem %s626_s0, %s474_s17 }
  0x10   : > { %s213_s24 = scalar_lea.vmem %s627_s1, %s503_s18 }
  0x12   : > { %v557_v0 = vmov 0.0  }
  0x13   : > { %225 = vst [vmem:[#allocation2 + $0x10] sm:$0xff] %v557_v0  ;;  %226 = vst [vmem:[#allocation2] sm:$0xff] %v557_v0 }
  0x14   : > { %227 = vst [vmem:[#allocation2 + $0x18] sm:$0xff] %v557_v0  ;;  %228 = vst [vmem:[#allocation2 + $0x8] sm:$0xff] %v557_v0 }
  0x15 PF: > { %v529_v1 = vld [vmem:[%s213_s24 + $0x8] ss:$0 sps:$4 sm:$0xff]   ;;  %vm266_vm0 = vcmask 1043456   ;;  %v530_v2 = vld [vmem:[%s213_s24] sm:$0xff]   ;;  %vm259_vm1 = vcmask 195584   ;;  %p464_p6 = scmp.ne.s32.totalorder %s547_s12, 8 }
  0x16   : > { %502 = vmatprep.subr.msk.bf16.mxu0 %vm266_vm0, %v529_v1  ;;  %v268_v3 = vsel %vm266_vm0, %v529_v1, 0  ;;  %v531_v4 = vld [vmem:[%s207_s21] sm:$0xff]   ;;  %v532_v5 = vld [vmem:[%s207_s21 + $0x8] sm:$0xff]  }
  0x17   : > { %495 = vmatpush3.bf16.msra.mxu0 %v268_v3  ;;  %498 = vmatprep.mubr.msk.bf16.mxu0 %vm259_vm1, %v531_v4 }
  0x18   : > { %496 = vmatprep.subr.bf16.mxu0 %v530_v2 }
  0x1a   : > { %v229_v8 = vld [vmem:[#allocation2 + $0x10] sm:$0xff]  ;;  %v230_v14 = vld [vmem:[#allocation2] sm:$0xff] }
  0x1b   : > { %497 = vmatpush3.bf16.msra.mxu0 %v530_v2  ;;  %v231_v6 = vld [vmem:[#allocation2 + $0x18] sm:$0xff]  ;;  %v232_v11 = vld [vmem:[#allocation2 + $0x8] sm:$0xff] }
  0x1e   : > { %499 = vmatmul.mubr.msk.bf16.vlgmr.msra.gmra.mxu0 %vm259_vm1, %v532_v5 }
  0xde   : > { %v500_v7 = vpop.f32.mrf.mxu0 }
  0xdf   : > { %v321_v9 = vadd.f32 %v500_v7, %v231_v6 }
  0xe0   : > { %v304_v10 = vpop.f32.mrf.mxu0 }
  0xe1   : > { %325 = vst [vmem:[#allocation2 + $0x18] sm:$0xff] %v321_v9  ;;  %v319_v12 = vadd.f32 %v304_v10, %v229_v8 }
  0xe2   : > { %v501_v13 = vpop.f32.mrf.mxu0 }
  0xe3   : > { %323 = vst [vmem:[#allocation2 + $0x10] sm:$0xff] %v319_v12  ;;  %v322_v15 = vadd.f32 %v501_v13, %v232_v11  ;;  %330 = sbr.rel (%p464_p6) target bundleno = 246 (0xf6), region = 40 }
  0xe4   : > { %v307_v16 = vpop.f32.mrf.mxu0 }
  0xe5   : > { %326 = vst [vmem:[#allocation2 + $0x8] sm:$0xff] %v322_v15  ;;  %v320_v17 = vadd.f32 %v307_v16, %v230_v14 }
  0xe7   : > { %324 = vst [vmem:[#allocation2] sm:$0xff] %v320_v17 }
  0xe8   : > { %v465_v20 = vld [vmem:[%s628_s2] ss:$0 sm:$0xff]  ;;  %v333_v23 = vld [vmem:[#allocation2 + $0x18] sm:$0xff] }
  0xe9   : > { %v344_v25 = vadd.f32 %v465_v20, %v333_v23 }
  0xea   : > { %v331_v18 = vld [vmem:[#allocation2 + $0x10] sm:$0xff] }
  0xeb   : > { %v342_v21 = vadd.f32 %v465_v20, %v331_v18  ;;  %v348_v29 = vmax.f32 %v344_v25, 0.0 }
  0xec   : > { %v334_v24 = vld [vmem:[#allocation2 + $0x8] sm:$0xff] }
  0xed   : > { %v345_v26 = vadd.f32 %v465_v20, %v334_v24  ;;  %v346_v27 = vmax.f32 %v342_v21, 0.0 }
  0xee   : > { %v332_v19 = vld [vmem:[#allocation2] sm:$0xff] }
  0xef   : > { %v343_v22 = vadd.f32 %v465_v20, %v332_v19  ;;  %v349_v30 = vmax.f32 %v345_v26, 0.0 }
  0xf1   : > { %v347_v28 = vmax.f32 %v343_v22, 0.0  ;;  %v487_v32 = vpack.c.bf16 %v349_v30, %v348_v29 }
  0xf3   : > { %v482_v31 = vpack.c.bf16 %v347_v28, %v346_v27  ;;  %489 = vst [vmem:[%s629_s3 + $0x8] sm:$0xff] %v487_v32  }
  0xf5   : > { %483 = vst [vmem:[%s629_s3] sm:$0xff] %v482_v31  }
  0xf6 PF: > { %s13_s14 = sadd.s32 1, %s555_s14   ;;  %s630_s12 = smov %s551_s13 }
  0xf7   : > { %p10_p7 = scmp.ge.s32.totalorder %s13_s14, 11   ;;  %s631_s13 = smov %s633_s15 }
  0xf9   :  { %12 = sbr.rel (!%p10_p7) target bundleno = 2 (0x2), region = 73 }

// kernel: _lambda_.26
= control target key start
LH: loop header
LB: loop body
LE: loop exit
PB: predicated region body
PF: predicated region fallthrough
CT: control target
= control target key end

     0   :  { %s565_s12 = smov 0   ;;  %s567_s13 = smov 0   ;;  %s613_s0 = inlined_call_operand.vmem [shape: bf16[9,32,16], index: 0, kind: input, shape index: {}]   ;;  %s614_s1 = inlined_call_operand.vmem [shape: bf16[9,16,128], index: 1, kind: input, shape index: {}]   ;;  %s615_s2 = inlined_call_operand.vmem [shape: f32[1,128], index: 2, kind: input, shape index: {}]   ;;  %s616_s3 = inlined_call_operand.vmem [shape: bf16[32,128], index: 3, kind: output, shape index: {}]  }
   0x1   :  { %s569_s14 = smov 0  }
   0x2 LB: > { %s22_s15 = sadd.s32 1, %s538_s13  ;;  %p445_p0 = scmp.ge.s32.totalorder %s542_s14, 1  ;;  %s542_s14 = sphi %s569_s14, %s13_s14   ;;  %s538_s13 = sphi %s567_s13, %s618_s13   ;;  %s534_s12 = sphi %s565_s12, %s617_s12  }
   0x3   : > { %p23_p1 = scmp.ge.s32.totalorder %s22_s15, 9  ;;  %p166_p2 = scmp.lt.s32.totalorder %s542_s14, 10 }
   0x5   : > { %s620_s15 = smov (%p23_p1, %s22_s15), 0  ;;  %p167_p3 = pnand %p445_p0, %p166_p2 }
   0x6   : > { %p200_p4 = scmp.lt.s32.totalorder (!%p167_p3), %s534_s12, 8  ;;  %p450_p5 = scmp.ne.s32.totalorder (!%p167_p3), %s534_s12, 0 }
   0x7   : > { %170 = sbr.rel (%p167_p3) target bundleno = 242 (0xf2), region = 32 }
   0xc   : > { %s201_s16 = scalar_select %p200_p4, %s534_s12, 8 }
   0xd   : > { %224 = sbr.rel (%p450_p5) target bundleno = 21 (0x15), region = 36 }
   0xe   : > { %s466_s17 = sshll.u32 %s201_s16, 4  ;;  %s467_s18 = sshll.u32 %s201_s16, 3 }
   0xf   : > { %s207_s21 = scalar_lea.vmem %s613_s0, %s466_s17  ;;  %s213_s24 = scalar_lea.vmem %s614_s1, %s467_s18 }
  0x12   : > { %v544_v0 = vmov 0.0  }
  0x13   : > { %225 = vst [vmem:[#allocation2 + $0x10] sm:$0xff] %v544_v0  ;;  %226 = vst [vmem:[#allocation2] sm:$0xff] %v544_v0 }
  0x14   : > { %227 = vst [vmem:[#allocation2 + $0x18] sm:$0xff] %v544_v0  ;;  %228 = vst [vmem:[#allocation2 + $0x8] sm:$0xff] %v544_v0 }
  0x15 PF: > { %v517_v1 = vld [vmem:[%s213_s24] sm:$0xff]   ;;  %vm255_vm0 = vcmask 130048   ;;  %v519_v3 = vld [vmem:[%s207_s21 + $0x8] sm:$0xff]   ;;  %p456_p6 = scmp.ne.s32.totalorder %s534_s12, 8 }
  0x16   : > { %v518_v2 = vld [vmem:[%s207_s21] sm:$0xff]   ;;  %486 = vmatprep.subr.bf16.mxu0 %v517_v1 }
  0x17   : > { %487 = vmatpush3.bf16.msra.mxu0 %v517_v1  ;;  %488 = vmatprep.mubr.msk.bf16.mxu0 %vm255_vm0, %v518_v2 }
  0x1a   : > { %489 = vmatmul.mubr.msk.bf16.vlgmr.msra.gmra.mxu0 %vm255_vm0, %v519_v3  ;;  %v229_v6 = vld [vmem:[#allocation2 + $0x10] sm:$0xff]  ;;  %v230_v12 = vld [vmem:[#allocation2] sm:$0xff] }
  0x1b   : > { %v231_v4 = vld [vmem:[#allocation2 + $0x18] sm:$0xff]  ;;  %v232_v9 = vld [vmem:[#allocation2 + $0x8] sm:$0xff] }
  0xda   : > { %v490_v5 = vpop.f32.mrf.mxu0 }
  0xdb   : > { %v313_v7 = vadd.f32 %v490_v5, %v231_v4 }
  0xdc   : > { %v296_v8 = vpop.f32.mrf.mxu0 }
  0xdd   : > { %317 = vst [vmem:[#allocation2 + $0x18] sm:$0xff] %v313_v7  ;;  %v311_v10 = vadd.f32 %v296_v8, %v229_v6 }
  0xde   : > { %v491_v11 = vpop.f32.mrf.mxu0 }
  0xdf   : > { %315 = vst [vmem:[#allocation2 + $0x10] sm:$0xff] %v311_v10  ;;  %v314_v13 = vadd.f32 %v491_v11, %v232_v9  ;;  %322 = sbr.rel (%p456_p6) target bundleno = 242 (0xf2), region = 40 }
  0xe0   : > { %v299_v14 = vpop.f32.mrf.mxu0 }
  0xe1   : > { %318 = vst [vmem:[#allocation2 + $0x8] sm:$0xff] %v314_v13  ;;  %v312_v15 = vadd.f32 %v299_v14, %v230_v12 }
  0xe3   : > { %316 = vst [vmem:[#allocation2] sm:$0xff] %v312_v15 }
  0xe4   : > { %v457_v18 = vld [vmem:[%s615_s2] ss:$0 sm:$0xff]  ;;  %v325_v21 = vld [vmem:[#allocation2 + $0x18] sm:$0xff] }
  0xe5   : > { %v336_v23 = vadd.f32 %v457_v18, %v325_v21 }
  0xe6   : > { %v323_v16 = vld [vmem:[#allocation2 + $0x10] sm:$0xff] }
  0xe7   : > { %v334_v19 = vadd.f32 %v457_v18, %v323_v16  ;;  %v340_v27 = vmax.f32 %v336_v23, 0.0 }
  0xe8   : > { %v326_v22 = vld [vmem:[#allocation2 + $0x8] sm:$0xff] }
  0xe9   : > { %v337_v24 = vadd.f32 %v457_v18, %v326_v22  ;;  %v338_v25 = vmax.f32 %v334_v19, 0.0 }
  0xea   : > { %v324_v17 = vld [vmem:[#allocation2] sm:$0xff] }
  0xeb   : > { %v335_v20 = vadd.f32 %v457_v18, %v324_v17  ;;  %v341_v28 = vmax.f32 %v337_v24, 0.0 }
  0xed   : > { %v339_v26 = vmax.f32 %v335_v20, 0.0  ;;  %v480_v30 = vpack.c.bf16 %v341_v28, %v340_v27 }
  0xef   : > { %v475_v29 = vpack.c.bf16 %v339_v26, %v338_v25  ;;  %482 = vst [vmem:[%s616_s3 + $0x8] sm:$0xff] %v480_v30  }
  0xf1   : > { %476 = vst [vmem:[%s616_s3] sm:$0xff] %v475_v29  }
  0xf2 PF: > { %s13_s14 = sadd.s32 1, %s542_s14   ;;  %s617_s12 = smov %s538_s13 }
  0xf3   : > { %p10_p7 = scmp.ge.s32.totalorder %s13_s14, 11   ;;  %s618_s13 = smov %s620_s15 }
  0xf5   :  { %12 = sbr.rel (!%p10_p7) target bundleno = 2 (0x2), region = 73 }

// kernel: _lambda_.25
= control target key start
LH: loop header
LB: loop body
LE: loop exit
PB: predicated region body
PF: predicated region fallthrough
CT: control target
= control target key end

     0   :  { %s578_s12 = smov 0   ;;  %s580_s13 = smov 0   ;;  %s626_s0 = inlined_call_operand.vmem [shape: bf16[9,32,32], index: 0, kind: input, shape index: {}]   ;;  %s627_s1 = inlined_call_operand.vmem [shape: bf16[9,32,128], index: 1, kind: input, shape index: {}]   ;;  %s628_s2 = inlined_call_operand.vmem [shape: f32[1,128], index: 2, kind: input, shape index: {}]   ;;  %s629_s3 = inlined_call_operand.vmem [shape: bf16[32,128], index: 3, kind: output, shape index: {}]  }
   0x1   :  { %s582_s14 = smov 0  }
   0x2 LB: > { %s22_s15 = sadd.s32 1, %s551_s13  ;;  %p453_p0 = scmp.ge.s32.totalorder %s555_s14, 1  ;;  %s555_s14 = sphi %s582_s14, %s13_s14   ;;  %s551_s13 = sphi %s580_s13, %s631_s13   ;;  %s547_s12 = sphi %s578_s12, %s630_s12  }
   0x3   : > { %p23_p1 = scmp.ge.s32.totalorder %s22_s15, 9  ;;  %p166_p2 = scmp.lt.s32.totalorder %s555_s14, 10 }
   0x5   : > { %s633_s15 = smov (%p23_p1, %s22_s15), 0  ;;  %p167_p3 = pnand %p453_p0, %p166_p2 }
   0x6   : > { %p200_p4 = scmp.lt.s32.totalorder (!%p167_p3), %s547_s12, 8  ;;  %p458_p5 = scmp.ne.s32.totalorder (!%p167_p3), %s547_s12, 0 }
   0x7   : > { %170 = sbr.rel (%p167_p3) target bundleno = 246 (0xf6), region = 32 }
   0xc   : > { %s201_s16 = scalar_select %p200_p4, %s547_s12, 8 }
   0xd   : > { %224 = sbr.rel (%p458_p5) target bundleno = 21 (0x15), region = 36 }
   0xe   : > { %s475_s17 = sshll.u32 %s201_s16, 4 }
   0xf   : > { %s207_s20 = scalar_lea.vmem %s626_s0, %s475_s17  ;;  %s213_s23 = scalar_lea.vmem %s627_s1, %s475_s17 }
  0x12   : > { %v557_v0 = vmov 0.0  }
  0x13   : > { %225 = vst [vmem:[#allocation2 + $0x10] sm:$0xff] %v557_v0  ;;  %226 = vst [vmem:[#allocation2] sm:$0xff] %v557_v0 }
  0x14   : > { %227 = vst [vmem:[#allocation2 + $0x18] sm:$0xff] %v557_v0  ;;  %228 = vst [vmem:[#allocation2 + $0x8] sm:$0xff] %v557_v0 }
  0x15 PF: > { %v529_v1 = vld [vmem:[%s213_s23 + $0x8] sm:$0xff]   ;;  %v530_v2 = vld [vmem:[%s213_s23] sm:$0xff]   ;;  %vm263_vm0 = vcmask 261120   ;;  %p465_p6 = scmp.ne.s32.totalorder %s547_s12, 8 }
  0x16   : > { %496 = vmatprep.subr.bf16.mxu0 %v529_v1  ;;  %v531_v3 = vld [vmem:[%s207_s20] sm:$0xff]   ;;  %v532_v4 = vld [vmem:[%s207_s20 + $0x8] sm:$0xff]  }
  0x17   : > { %497 = vmatpush3.bf16.msra.mxu0 %v529_v1  ;;  %500 = vmatprep.mubr.msk.bf16.mxu0 %vm263_vm0, %v531_v3 }
  0x18   : > { %498 = vmatprep.subr.bf16.mxu0 %v530_v2 }
  0x1a   : > { %v229_v7 = vld [vmem:[#allocation2 + $0x10] sm:$0xff]  ;;  %v230_v13 = vld [vmem:[#allocation2] sm:$0xff] }
  0x1b   : > { %499 = vmatpush3.bf16.msra.mxu0 %v530_v2  ;;  %v231_v5 = vld [vmem:[#allocation2 + $0x18] sm:$0xff]  ;;  %v232_v10 = vld [vmem:[#allocation2 + $0x8] sm:$0xff] }
  0x1e   : > { %501 = vmatmul.mubr.msk.bf16.vlgmr.msra.gmra.mxu0 %vm263_vm0, %v532_v4 }
  0xde   : > { %v502_v6 = vpop.f32.mrf.mxu0 }
  0xdf   : > { %v321_v8 = vadd.f32 %v502_v6, %v231_v5 }
  0xe0   : > { %v304_v9 = vpop.f32.mrf.mxu0 }
  0xe1   : > { %325 = vst [vmem:[#allocation2 + $0x18] sm:$0xff] %v321_v8  ;;  %v319_v11 = vadd.f32 %v304_v9, %v229_v7 }
  0xe2   : > { %v503_v12 = vpop.f32.mrf.mxu0 }
  0xe3   : > { %323 = vst [vmem:[#allocation2 + $0x10] sm:$0xff] %v319_v11  ;;  %v322_v14 = vadd.f32 %v503_v12, %v232_v10  ;;  %330 = sbr.rel (%p465_p6) target bundleno = 246 (0xf6), region = 40 }
  0xe4   : > { %v307_v15 = vpop.f32.mrf.mxu0 }
  0xe5   : > { %326 = vst [vmem:[#allocation2 + $0x8] sm:$0xff] %v322_v14  ;;  %v320_v16 = vadd.f32 %v307_v15, %v230_v13 }
  0xe7   : > { %324 = vst [vmem:[#allocation2] sm:$0xff] %v320_v16 }
  0xe8   : > { %v466_v19 = vld [vmem:[%s628_s2] ss:$0 sm:$0xff]  ;;  %v333_v22 = vld [vmem:[#allocation2 + $0x18] sm:$0xff] }
  0xe9   : > { %v344_v24 = vadd.f32 %v466_v19, %v333_v22 }
  0xea   : > { %v331_v17 = vld [vmem:[#allocation2 + $0x10] sm:$0xff] }
  0xeb   : > { %v342_v20 = vadd.f32 %v466_v19, %v331_v17  ;;  %v348_v28 = vmax.f32 %v344_v24, 0.0 }
  0xec   : > { %v334_v23 = vld [vmem:[#allocation2 + $0x8] sm:$0xff] }
  0xed   : > { %v345_v25 = vadd.f32 %v466_v19, %v334_v23  ;;  %v346_v26 = vmax.f32 %v342_v20, 0.0 }
  0xee   : > { %v332_v18 = vld [vmem:[#allocation2] sm:$0xff] }
  0xef   : > { %v343_v21 = vadd.f32 %v466_v19, %v332_v18  ;;  %v349_v29 = vmax.f32 %v345_v25, 0.0 }
  0xf1   : > { %v347_v27 = vmax.f32 %v343_v21, 0.0  ;;  %v489_v31 = vpack.c.bf16 %v349_v29, %v348_v28 }
  0xf3   : > { %v484_v30 = vpack.c.bf16 %v347_v27, %v346_v26  ;;  %491 = vst [vmem:[%s629_s3 + $0x8] sm:$0xff] %v489_v31  }
  0xf5   : > { %485 = vst [vmem:[%s629_s3] sm:$0xff] %v484_v30  }
  0xf6 PF: > { %s13_s14 = sadd.s32 1, %s555_s14   ;;  %s630_s12 = smov %s551_s13 }
  0xf7   : > { %p10_p7 = scmp.ge.s32.totalorder %s13_s14, 11   ;;  %s631_s13 = smov %s633_s15 }
  0xf9   :  { %12 = sbr.rel (!%p10_p7) target bundleno = 2 (0x2), region = 73 }

// kernel: _lambda_.28
= control target key start
LH: loop header
LB: loop body
LE: loop exit
PB: predicated region body
PF: predicated region fallthrough
CT: control target
= control target key end

     0   :  { %vm57_vm0 = vcmask 261120   ;;  %s250_s1 = inlined_call_operand.vmem [shape: bf16[1,32,128], index: 1, kind: input, shape index: {}]   ;;  %s251_s0 = inlined_call_operand.vmem [shape: bf16[1,32,32], index: 0, kind: input, shape index: {}]   ;;  %s252_s2 = inlined_call_operand.vmem [shape: f32[1,128], index: 2, kind: input, shape index: {}]   ;;  %s253_s3 = inlined_call_operand.vmem [shape: bf16[32,128], index: 3, kind: output, shape index: {}]  }
   0x1   :  { %v205_v0 = vld [vmem:[%s250_s1 + $0x8] sm:$0xff]   ;;  %v206_v1 = vld [vmem:[%s250_s1] sm:$0xff]  }
   0x2   :  { %197 = vmatprep.subr.bf16.mxu0 %v205_v0  ;;  %v207_v2 = vld [vmem:[%s251_s0] sm:$0xff]   ;;  %v208_v3 = vld [vmem:[%s251_s0 + $0x8] sm:$0xff]  }
   0x3   :  { %198 = vmatpush3.bf16.msra.mxu0 %v205_v0  ;;  %201 = vmatprep.mubr.msk.bf16.mxu0 %vm57_vm0, %v207_v2  ;;  %v173_v5 = vld [vmem:[%s252_s2] ss:$0 sm:$0xff] }
   0x4   :  { %199 = vmatprep.subr.bf16.mxu0 %v206_v1 }
   0x7   :  { %200 = vmatpush3.bf16.msra.mxu0 %v206_v1 }
   0xa   :  { %202 = vmatmul.mubr.msk.bf16.vlgmr.msra.gmra.mxu0 %vm57_vm0, %v208_v3 }
  0xca   :  { %v203_v4 = vpop.f32.mrf.mxu0 }
  0xcb   :  { %v137_v7 = vadd.f32 %v203_v4, %v173_v5 }
  0xcc   :  { %v98_v6 = vpop.f32.mrf.mxu0 }
  0xcd   :  { %v135_v9 = vadd.f32 %v173_v5, %v98_v6  ;;  %v141_v12 = vmax.f32 %v137_v7, 0.0 }
  0xce   :  { %v204_v8 = vpop.f32.mrf.mxu0 }
  0xcf   :  { %v138_v10 = vadd.f32 %v204_v8, %v173_v5  ;;  %v139_v15 = vmax.f32 %v135_v9, 0.0 }
  0xd0   :  { %v101_v11 = vpop.f32.mrf.mxu0 }
  0xd1   :  { %v142_v13 = vmax.f32 %v138_v10, 0.0  ;;  %v136_v14 = vadd.f32 %v173_v5, %v101_v11 }
  0xd3   :  { %v190_v16 = vpack.c.bf16 %v142_v13, %v141_v12  ;;  %v140_v17 = vmax.f32 %v136_v14, 0.0 }
  0xd5   :  { %192 = vst [vmem:[%s253_s3 + $0x8] sm:$0xff] %v190_v16   ;;  %v185_v18 = vpack.c.bf16 %v140_v17, %v139_v15 }
  0xd7   :  { %186 = vst [vmem:[%s253_s3] sm:$0xff] %v185_v18  }

// kernel: _lambda_.27
= control target key start
LH: loop header
LB: loop body
LE: loop exit
PB: predicated region body
PF: predicated region fallthrough
CT: control target
= control target key end

     0   :  { %s591_s12 = smov 0   ;;  %s593_s13 = smov 0   ;;  %s639_s0 = inlined_call_operand.vmem [shape: bf16[9,32,40], index: 0, kind: input, shape index: {}]   ;;  %s640_s1 = inlined_call_operand.vmem [shape: bf16[9,40,128], index: 1, kind: input, shape index: {}]   ;;  %s641_s2 = inlined_call_operand.vmem [shape: f32[1,128], index: 2, kind: input, shape index: {}]   ;;  %s642_s3 = inlined_call_operand.vmem [shape: bf16[32,128], index: 3, kind: output, shape index: {}]  }
   0x1   :  { %s595_s14 = smov 0  }
   0x2 LB: > { %s22_s15 = sadd.s32 1, %s564_s13  ;;  %p461_p0 = scmp.ge.s32.totalorder %s568_s14, 1  ;;  %s568_s14 = sphi %s595_s14, %s13_s14   ;;  %s564_s13 = sphi %s593_s13, %s644_s13   ;;  %s560_s12 = sphi %s591_s12, %s643_s12  }
   0x3   : > { %p23_p1 = scmp.ge.s32.totalorder %s22_s15, 9  ;;  %p166_p2 = scmp.lt.s32.totalorder %s568_s14, 10 }
   0x5   : > { %s646_s15 = smov (%p23_p1, %s22_s15), 0  ;;  %p167_p3 = pnand %p461_p0, %p166_p2 }
   0x6   : > { %p200_p4 = scmp.lt.s32.totalorder (!%p167_p3), %s560_s12, 8  ;;  %p465_p5 = scmp.ne.s32.totalorder (!%p167_p3), %s560_s12, 0 }
   0x7   : > { %170 = sbr.rel (%p167_p3) target bundleno = 250 (0xfa), region = 32 }
   0xc   : > { %s201_s16 = scalar_select %p200_p4, %s560_s12, 8 }
   0xd   : > { %224 = sbr.rel (%p465_p5) target bundleno = 21 (0x15), region = 36 }
   0xe   : > { %s483_s17 = sshll.u32 %s201_s16, 4  ;;  %s515_s18 = smul.u32 20, %s201_s16 }
   0xf   : > { %s207_s21 = scalar_lea.vmem %s639_s0, %s483_s17 }
  0x10   : > { %s213_s24 = scalar_lea.vmem %s640_s1, %s515_s18 }
  0x12   : > { %v570_v0 = vmov 0.0  }
  0x13   : > { %225 = vst [vmem:[#allocation2 + $0x10] sm:$0xff] %v570_v0  ;;  %226 = vst [vmem:[#allocation2] sm:$0xff] %v570_v0 }
  0x14   : > { %227 = vst [vmem:[#allocation2 + $0x18] sm:$0xff] %v570_v0  ;;  %228 = vst [vmem:[#allocation2 + $0x8] sm:$0xff] %v570_v0 }
  0x15 PF: > { %v541_v1 = vld [vmem:[%s213_s24 + $0x10] ss:$0 sps:$4 sm:$0xff]   ;;  %vm274_vm0 = vcmask 1043456   ;;  %v542_v2 = vld [vmem:[%s213_s24 + $0x8] sm:$0xff]   ;;  %v544_v4 = vld [vmem:[%s207_s21] sm:$0xff]   ;;  %vm267_vm1 = vcmask 326656  }
  0x16   : > { %514 = vmatprep.subr.msk.bf16.mxu0 %vm274_vm0, %v541_v1  ;;  %v276_v3 = vsel %vm274_vm0, %v541_v1, 0  ;;  %v543_v5 = vld [vmem:[%s213_s24] sm:$0xff]   ;;  %510 = vmatprep.mubr.msk.bf16.mxu0 %vm267_vm1, %v544_v4  ;;  %v545_v6 = vld [vmem:[%s207_s21 + $0x8] sm:$0xff]   ;;  %p473_p6 = scmp.ne.s32.totalorder %s560_s12, 8 }
  0x17   : > { %505 = vmatpush3.bf16.msra.mxu0 %v276_v3 }
  0x18   : > { %506 = vmatprep.subr.bf16.mxu0 %v542_v2 }
  0x1a   : > { %v229_v9 = vld [vmem:[#allocation2 + $0x10] sm:$0xff]  ;;  %v230_v15 = vld [vmem:[#allocation2] sm:$0xff] }
  0x1b   : > { %507 = vmatpush3.bf16.msra.mxu0 %v542_v2  ;;  %v231_v7 = vld [vmem:[#allocation2 + $0x18] sm:$0xff]  ;;  %v232_v12 = vld [vmem:[#allocation2 + $0x8] sm:$0xff] }
  0x1c   : > { %508 = vmatprep.subr.bf16.mxu0 %v543_v5 }
  0x1f   : > { %509 = vmatpush3.bf16.msra.mxu0 %v543_v5 }
  0x22   : > { %511 = vmatmul.mubr.msk.bf16.vlgmr.msra.gmra.mxu0 %vm267_vm1, %v545_v6 }
  0xe2   : > { %v512_v8 = vpop.f32.mrf.mxu0 }
  0xe3   : > { %v329_v10 = vadd.f32 %v512_v8, %v231_v7 }
  0xe4   : > { %v312_v11 = vpop.f32.mrf.mxu0 }
  0xe5   : > { %333 = vst [vmem:[#allocation2 + $0x18] sm:$0xff] %v329_v10  ;;  %v327_v13 = vadd.f32 %v312_v11, %v229_v9 }
  0xe6   : > { %v513_v14 = vpop.f32.mrf.mxu0 }
  0xe7   : > { %331 = vst [vmem:[#allocation2 + $0x10] sm:$0xff] %v327_v13  ;;  %v330_v16 = vadd.f32 %v513_v14, %v232_v12  ;;  %338 = sbr.rel (%p473_p6) target bundleno = 250 (0xfa), region = 40 }
  0xe8   : > { %v315_v17 = vpop.f32.mrf.mxu0 }
  0xe9   : > { %334 = vst [vmem:[#allocation2 + $0x8] sm:$0xff] %v330_v16  ;;  %v328_v18 = vadd.f32 %v315_v17, %v230_v15 }
  0xeb   : > { %332 = vst [vmem:[#allocation2] sm:$0xff] %v328_v18 }
  0xec   : > { %v474_v21 = vld [vmem:[%s641_s2] ss:$0 sm:$0xff]  ;;  %v341_v24 = vld [vmem:[#allocation2 + $0x18] sm:$0xff] }
  0xed   : > { %v352_v26 = vadd.f32 %v474_v21, %v341_v24 }
  0xee   : > { %v339_v19 = vld [vmem:[#allocation2 + $0x10] sm:$0xff] }
  0xef   : > { %v350_v22 = vadd.f32 %v474_v21, %v339_v19  ;;  %v356_v30 = vmax.f32 %v352_v26, 0.0 }
  0xf0   : > { %v342_v25 = vld [vmem:[#allocation2 + $0x8] sm:$0xff] }
  0xf1   : > { %v353_v27 = vadd.f32 %v474_v21, %v342_v25  ;;  %v354_v28 = vmax.f32 %v350_v22, 0.0 }
  0xf2   : > { %v340_v20 = vld [vmem:[#allocation2] sm:$0xff] }
  0xf3   : > { %v351_v23 = vadd.f32 %v474_v21, %v340_v20  ;;  %v357_v31 = vmax.f32 %v353_v27, 0.0 }
  0xf5   : > { %v355_v29 = vmax.f32 %v351_v23, 0.0  ;;  %v496_v33 = vpack.c.bf16 %v357_v31, %v356_v30 }
  0xf7   : > { %v491_v32 = vpack.c.bf16 %v355_v29, %v354_v28  ;;  %498 = vst [vmem:[%s642_s3 + $0x8] sm:$0xff] %v496_v33  }
  0xf9   : > { %492 = vst [vmem:[%s642_s3] sm:$0xff] %v491_v32  }
  0xfa PF: > { %s13_s14 = sadd.s32 1, %s568_s14   ;;  %s643_s12 = smov %s564_s13 }
  0xfb   : > { %p10_p7 = scmp.ge.s32.totalorder %s13_s14, 11   ;;  %s644_s13 = smov %s646_s15 }
  0xfd   :  { %12 = sbr.rel (!%p10_p7) target bundleno = 2 (0x2), region = 73 }

// kernel: _lambda_.29
= control target key start
LH: loop header
LB: loop body
LE: loop exit
PB: predicated region body
PF: predicated region fallthrough
CT: control target
= control target key end

     0   :  { %s681_s12 = smov 0   ;;  %s683_s13 = smov 0   ;;  %s777_s0 = inlined_call_operand.vmem [shape: bf16[8,16,32], index: 0, kind: input, shape index: {}]   ;;  %s778_s1 = inlined_call_operand.vmem [shape: bf16[32,1024], index: 1, kind: input, shape index: {}]   ;;  %s779_s2 = inlined_call_operand.vmem [shape: f32[1,1024], index: 2, kind: input, shape index: {}]   ;;  %s780_s3 = inlined_call_operand.vmem [shape: f32[8,1024], index: 3, kind: output, shape index: {}]  }
   0x1   :  { %s685_s14 = smov 0  }
   0x2 LB: > { %s546_s15 = sadd.s32 4294967295, %s658_s14   ;;  %s698_s16 = sadd.s32 1, %s658_s14   ;;  %s658_s14 = sphi %s685_s14, %s783_s14   ;;  %s654_s13 = sphi %s683_s13, %s782_s13   ;;  %s650_s12 = sphi %s681_s12, %s781_s12  }
   0x3   : > { %s38_s17 = ssub.s32 %s658_s14, %s698_s16  ;;  %s41_s18 = sadd.s32 1, %s654_s13 }
   0x4   : > { %p39_p0 = scmp.eq.s32.totalorder %s38_s17, 0  ;;  %p48_p1 = scmp.ne.s32.totalorder %s654_s13, %s650_s12 }
   0x5   : > { %p49_p2 = scmp.eq.s32.totalorder %s658_s14, 0  ;;  %p549_p4 = scmp.ge.s32.totalorder %s658_s14, 4 }
   0x6   : > { %s707_s19 = scalar_select %p39_p0, %s654_s13, %s41_s18  }
   0x7   : > { %p50_p3 = por %p49_p2, %p48_p1  ;;  %129 = sbr.rel (%p549_p4) target bundleno = 20 (0x14), region = 20 }
   0xc   : > { %132 = sbr.rel (!%p50_p3) target bundleno = 20 (0x14), region = 24  ;;  %s134_s20 = sand.u32 (%p50_p3), 1, %s654_s13  }
   0xd   : > { %s565_s21 = sshll.u32 (%p50_p3), %s658_s14, 3  ;;  %s550_s22 = sshll.u32 (%p50_p3), %s134_s20, 5 }
   0xe   : > { %s139_s25 = scalar_lea.vmem (%p50_p3), %s778_s1, %s565_s21  ;;  %s136_s26 = scalar_lea.vmem (%p50_p3), [#allocation2], %s550_s22 }
   0xf   : > { %v174_v0 = vld [vmem:[%s139_s25] sm:$0xff] (%p50_p3) }
  0x10   : > { %v176_v1 = vld [vmem:[%s139_s25 + $0x20] sm:$0xff] (%p50_p3)  ;;  %175 = vst [vmem:[%s136_s26] sm:$0xff] (%p50_p3), %v174_v0 }
  0x11   : > { %v178_v2 = vld [vmem:[%s139_s25 + $0x40] sm:$0xff]  ;;  %177 = vst [vmem:[%s136_s26 + $0x8] sm:$0xff] %v176_v1 }
  0x12   : > { %179 = vst [vmem:[%s136_s26 + $0x10] sm:$0xff] %v178_v2  ;;  %v180_v3 = vld [vmem:[%s139_s25 + $0x60] sm:$0xff] }
  0x13   : > { %181 = vst [vmem:[%s136_s26 + $0x18] sm:$0xff] %v180_v3 }
  0x14 PF: > { %p553_p5 = scmp.ge.s32.totalorder %s658_s14, 1  ;;  %p194_p6 = scmp.lt.s32.totalorder %s658_s14, 5 }
  0x16   : > { %p195_p7 = pnand %p553_p5, %p194_p6 }
  0x17   : > { %s201_s27 = sand.u32 (!%p195_p7), 1, %s650_s12   ;;  %s555_s24 = sshll.u32 (!%p195_p7), %s546_s15, 1 }
  0x18   : > { %198 = sbr.rel (%p195_p7) target bundleno = 268 (0x10c), region = 66  ;;  %s554_s7 = sshll.u32 (!%p195_p7), %s201_s27, 5 }
  0x19   : > { %s203_s23 = scalar_lea.vmem (!%p195_p7), [#allocation2], %s554_s7  ;;  %p230_p8 = scmp.lt.s32.totalorder (!%p195_p7), %s555_s24, 7 }
  0x1d   : > { %v567_v4 = vld [vmem:[%s777_s0] sm:$0xff]   ;;  %v598_v5 = vld [vmem:[%s777_s0 + $0x8] sm:$0xff]   ;;  %v599_v6 = vld [vmem:[%s777_s0 + $0x10] sm:$0xff]   ;;  %v660_v7 = vmov 0   ;;  %vm273_vm0 = vcmask 261120   ;;  %vm394_vm1 = vcmask 1041409  }
  0x1e   : > { %464 = vmatprep.mubr.bf16.mxu0 %v660_v7  ;;  %v568_v8 = vunpack.c.l.bf16 %v567_v4  ;;  %v569_v9 = vunpack.c.h.bf16 %v567_v4  ;;  %v600_v10 = vld [vmem:[%s777_s0 + $0x18] sm:$0xff]   ;;  %v601_v11 = vld [vmem:[%s777_s0 + $0x20] sm:$0xff]   ;;  %v602_v12 = vld [vmem:[%s777_s0 + $0x28] sm:$0xff]   ;;  %v572_v13 = vunpack.c.l.bf16 %v598_v5  ;;  %v573_v14 = vunpack.c.h.bf16 %v598_v5  ;;  %s785_s24 = smov (!%p230_p8, %s555_s24), 7 }
  0x1f   : > { %v576_v15 = vunpack.c.l.bf16 %v599_v6  ;;  %v577_v16 = vunpack.c.h.bf16 %v599_v6  ;;  %v603_v17 = vld [vmem:[%s777_s0 + $0x30] sm:$0xff]   ;;  %v604_v18 = vld [vmem:[%s777_s0 + $0x38] sm:$0xff]   ;;  %v580_v20 = vunpack.c.l.bf16 %v600_v10  ;;  %v581_v21 = vunpack.c.h.bf16 %v600_v10  ;;  %v633_v29 = vld [vmem:[%s203_s23 + $0x4] ss:$8 sps:$4 sm:$0xff]   ;;  %s232_s27 = scalar_lea.vmem %s779_s2, %s785_s24  ;;  %s557_s28 = sshll.u32 %s785_s24, 3 }
  0x20   : > { %v630_v19 = vld [vmem:[%s203_s23 + $0x14] ss:$8 sps:$4 sm:$0xff]   ;;  %v584_v22 = vunpack.c.l.bf16 %v601_v11  ;;  %v585_v23 = vunpack.c.h.bf16 %v601_v11  ;;  %v632_v24 = vld [vmem:[%s203_s23 + $0x10] ss:$8 sps:$4 sm:$0xff]   ;;  %v588_v25 = vunpack.c.l.bf16 %v602_v12  ;;  %v589_v26 = vunpack.c.h.bf16 %v602_v12  ;;  %v635_v34 = vld [vmem:[%s203_s23] ss:$8 sps:$4 sm:$0xff]   ;;  %s238_s4 = scalar_lea.vmem %s780_s3, %s557_s28 }
  0x21   : > { %v592_v27 = vunpack.c.l.bf16 %v603_v17  ;;  %v593_v28 = vunpack.c.h.bf16 %v603_v17  ;;  %444 = vmatprep.subr.bf16.mxu0 %v630_v19  ;;  %v596_v30 = vunpack.c.l.bf16 %v604_v18  ;;  %v597_v31 = vunpack.c.h.bf16 %v604_v18 }
  0x22   : > { %v274_v32 = vsel %vm273_vm0, %v568_v8, 0.0  ;;  %v275_v33 = vsel %vm273_vm0, %v569_v9, 0.0  ;;  %445 = vmatpush1.bf16.msra.mxu0 %v632_v24  ;;  %v283_v36 = vsel %vm273_vm0, %v572_v13, 0.0  ;;  %v284_v37 = vsel %vm273_vm0, %v573_v14, 0.0 }
  0x23   : > { %v276_v35 = vadd.f32 %v275_v33, %v274_v32  ;;  %v292_v38 = vsel %vm273_vm0, %v576_v15, 0.0  ;;  %446 = vmatprep.subr.bf16.mxu0 %v633_v29  ;;  %v285_v39 = vadd.f32 %v284_v37, %v283_v36  ;;  %v293_v40 = vsel %vm273_vm0, %v577_v16, 0.0 }
  0x24   : > { %v301_v41 = vsel %vm273_vm0, %v580_v20, 0.0  ;;  %v302_v42 = vsel %vm273_vm0, %v581_v21, 0.0  ;;  %v294_v44 = vadd.f32 %v293_v40, %v292_v38  ;;  %v310_v46 = vsel %vm273_vm0, %v584_v22, 0.0 }
  0x25   : > { %v277_v43 = vrot.slane %v276_v35, 4  ;;  %v303_v45 = vadd.f32 %v302_v42, %v301_v41  ;;  %v286_v47 = vrot.slane %v285_v39, 4  ;;  %v311_v48 = vsel %vm273_vm0, %v585_v23, 0.0 }
  0x26   : > { %v319_v49 = vsel %vm273_vm0, %v588_v25, 0.0  ;;  %v320_v50 = vsel %vm273_vm0, %v589_v26, 0.0  ;;  %447 = vmatpush1.bf16.msra.mxu0 %v635_v34  ;;  %v295_v52 = vrot.slane %v294_v44, 4  ;;  %v312_v54 = vadd.f32 %v311_v48, %v310_v46 }
  0x27   : > { %v278_v51 = vadd.f32 %v277_v43, %v276_v35  ;;  %v304_v53 = vrot.slane %v303_v45, 4  ;;  %v287_v55 = vadd.f32 %v286_v47, %v285_v39  ;;  %v321_v56 = vadd.f32 %v320_v50, %v319_v49 }
  0x28   : > { %v328_v57 = vsel %vm273_vm0, %v592_v27, 0.0  ;;  %v329_v58 = vsel %vm273_vm0, %v593_v28, 0.0  ;;  %v296_v60 = vadd.f32 %v295_v52, %v294_v44  ;;  %v313_v62 = vrot.slane %v312_v54, 4 }
  0x29   : > { %v279_v59 = vrot.slane %v278_v51, 2  ;;  %v305_v61 = vadd.f32 %v304_v53, %v303_v45  ;;  %v288_v63 = vrot.slane %v287_v55, 2  ;;  %v322_v0 = vrot.slane %v321_v56, 4 }
  0x2a   : > { %v330_v1 = vadd.f32 %v329_v58, %v328_v57  ;;  %v337_v2 = vsel %vm273_vm0, %v596_v30, 0.0  ;;  %v297_v4 = vrot.slane %v296_v60, 2  ;;  %v314_v6 = vadd.f32 %v313_v62, %v312_v54 }
  0x2b   : > { %v280_v3 = vadd.f32 %v279_v59, %v278_v51  ;;  %v306_v5 = vrot.slane %v305_v61, 2  ;;  %v289_v7 = vadd.f32 %v288_v63, %v287_v55  ;;  %v323_v8 = vadd.f32 %v322_v0, %v321_v56 }
  0x2c   : > { %v331_v9 = vrot.slane %v330_v1, 4  ;;  %v338_v10 = vsel %vm273_vm0, %v597_v31, 0.0  ;;  %v298_v12 = vadd.f32 %v297_v4, %v296_v60  ;;  %v315_v14 = vrot.slane %v314_v6, 2 }
  0x2d   : > { %v281_v11 = vrot.slane %v280_v3, 1  ;;  %v307_v13 = vadd.f32 %v306_v5, %v305_v61  ;;  %v290_v15 = vrot.slane %v289_v7, 1  ;;  %v324_v16 = vrot.slane %v323_v8, 2 }
  0x2e   : > { %v332_v17 = vadd.f32 %v331_v9, %v330_v1  ;;  %v339_v18 = vadd.f32 %v338_v10, %v337_v2  ;;  %v299_v20 = vrot.slane %v298_v12, 1  ;;  %v316_v22 = vadd.f32 %v315_v14, %v314_v6 }
  0x2f   : > { %v282_v19 = vadd.f32 %v281_v11, %v280_v3  ;;  %v308_v21 = vrot.slane %v307_v13, 1  ;;  %v291_v23 = vadd.f32 %v290_v15, %v289_v7  ;;  %v325_v24 = vadd.f32 %v324_v16, %v323_v8 }
  0x30   : > { %v333_v25 = vrot.slane %v332_v17, 2  ;;  %v340_v26 = vrot.slane %v339_v18, 4  ;;  %v300_v27 = vadd.f32 %v299_v20, %v298_v12  ;;  %v317_v29 = vrot.slane %v316_v22, 1  ;;  %v366_v12 = vld [vmem:[%s232_s27] sm:$0x3] }
  0x31   : > { %v309_v28 = vadd.f32 %v308_v21, %v307_v13  ;;  %v346_v30 = vmul.f32 0.0625, %v282_v19  ;;  %v326_v31 = vrot.slane %v325_v24, 1  ;;  %v347_v34 = vmul.f32 0.0625, %v291_v23 }
  0x32   : > { %v334_v32 = vadd.f32 %v333_v25, %v332_v17  ;;  %v341_v33 = vadd.f32 %v340_v26, %v339_v18  ;;  %v318_v35 = vadd.f32 %v317_v29, %v316_v22  ;;  %v348_v36 = vmul.f32 0.0625, %v300_v27 }
  0x33   : > { %v349_v37 = vmul.f32 0.0625, %v309_v28  ;;  %v354_v38 = vpack.c.bf16 %v346_v30, %v346_v30  ;;  %v327_v39 = vadd.f32 %v326_v31, %v325_v24  ;;  %v355_v42 = vpack.c.bf16 %v347_v34, %v347_v34 }
  0x34   : > { %v335_v40 = vrot.slane %v334_v32, 1  ;;  %v342_v41 = vrot.slane %v341_v33, 2  ;;  %v350_v43 = vmul.f32 0.0625, %v318_v35  ;;  %v356_v44 = vpack.c.bf16 %v348_v36, %v348_v36 }
  0x35   : > { %v357_v45 = vpack.c.bf16 %v349_v37, %v349_v37  ;;  %v386_v46 = vunpack.c.l.b16 %v354_v38  ;;  %v351_v49 = vmul.f32 0.0625, %v327_v39  ;;  %v387_v50 = vunpack.c.l.b16 %v355_v42 }
  0x36   : > { %v336_v47 = vadd.f32 %v335_v40, %v334_v32  ;;  %v343_v48 = vadd.f32 %v342_v41, %v341_v33  ;;  %v358_v51 = vpack.c.bf16 %v350_v43, %v350_v43  ;;  %v388_v52 = vunpack.c.l.b16 %v356_v44 }
  0x37   : > { %v389_v53 = vunpack.c.l.b16 %v357_v45  ;;  %v359_v56 = vpack.c.bf16 %v351_v49, %v351_v49  ;;  %v395_v57 = vsel %vm394_vm1, %v387_v50, %v386_v46  ;;  %vm396_vm2 = vcmask 1042434  }
  0x38   : > { %v344_v54 = vrot.slane %v343_v48, 1  ;;  %v352_v55 = vmul.f32 0.0625, %v336_v47  ;;  %v390_v58 = vunpack.c.l.b16 %v358_v51  ;;  %vm398_vm3 = vcmask 1043459  }
  0x39   : > { %vm400_vm4 = vcmask 1044484   ;;  %v391_v61 = vunpack.c.l.b16 %v359_v56  ;;  %v397_v62 = vsel %vm396_vm2, %v388_v52, %v395_v57  ;;  %vm402_vm5 = vcmask 1045509  }
  0x3a   : > { %v345_v59 = vadd.f32 %v344_v54, %v343_v48  ;;  %v360_v60 = vpack.c.bf16 %v352_v55, %v352_v55  ;;  %v399_v63 = vsel %vm398_vm3, %v389_v53, %v397_v62  ;;  %vm404_vm6 = vcmask 1046534  }
  0x3b   : > { %v401_v2 = vsel %vm400_vm4, %v390_v58, %v399_v63  ;;  %vm406_vm7 = vcmask 1047559   ;;  %v368_v9 = vlaneseq }
  0x3c   : > { %v353_v0 = vmul.f32 0.0625, %v345_v59  ;;  %v392_v1 = vunpack.c.l.b16 %v360_v60  ;;  %v403_v3 = vsel %vm402_vm5, %v391_v61, %v401_v2 }
  0x3d   : > { %v369_v10 = vshrl.u32 %v368_v9, 7 }
  0x3e   : > { %v361_v4 = vpack.c.bf16 %v353_v0, %v353_v0  ;;  %v405_v5 = vsel %vm404_vm6, %v392_v1, %v403_v3 }
  0x3f   : > { %v370_v11 = vsub.s32 0, %v369_v10  ;;  %v374_v13 = vsub.s32 1, %v369_v10 }
  0x40   : > { %v393_v6 = vunpack.c.l.b16 %v361_v4 }
  0x41   : > { %v371_v14 = vrot.slane %v366_v12, %v370_v11  ;;  %v375_v15 = vrot.slane %v366_v12, %v374_v13 }
  0x42   : > { %v407_v7 = vsel %vm406_vm7, %v393_v6, %v405_v5 }
  0x43   : > { %v408_v8 = vpack.c.b16 %v407_v7, %v407_v7 }
  0x45   : > { %562 = vmatmul.mubr.msk.bf16.vlgmr.msra.gmra.mxu0 %vm273_vm0, %v408_v8 }
 0x105   : > { %v466_v16 = vpop.f32.mrf.mxu0 }
 0x106   : > { %v467_v17 = vadd.f32 %v466_v16, %v371_v14 }
 0x107   : > { %v468_v18 = vpop.f32.mrf.mxu0 }
 0x108   : > { %473 = vst [vmem:[%s238_s4] sm:$0xff] %v467_v17  ;;  %v469_v19 = vadd.f32 %v468_v18, %v375_v15 }
 0x109   : > { %v470_v20 = vpop.f32.mrf.mxu0 }
 0x10a   : > { %474 = vst [vmem:[%s238_s4 + $0x8] sm:$0xff] %v469_v19 }
 0x10b   : > { %v471_v21 = vpop.f32.mrf.mxu0 }
 0x10c PF: > { %p10_p9 = scmp.ge.s32.totalorder %s698_s16, 6   ;;  %s781_s12 = smov %s654_s13 }
 0x10d   : > { %s782_s13 = smov %s707_s19  ;;  %s783_s14 = smov %s698_s16 }
 0x10e   :  { %12 = sbr.rel (!%p10_p9) target bundleno = 2 (0x2), region = 108 }

</bundles_post_ra>
